<compile_context>
chip_gen: v7x
topology: tpu7x:2x2x1
jax: 0.10.0
libtpu: 0.0.40
codegen_flags: <defaults>
</compile_context>

<pallas_src>
import functools

import jax
import jax.numpy as jnp
from jax.experimental import pallas as pl
from jax.experimental.pallas import tpu as pltpu

# ---------------- config (small, consistent with module __init__) -----------
RNN_TYPE = "LSTM"
NTOKEN = 50
NTAG = 20
NINP = 32          # == NHID so layer-0 / layer-1 weights share one shape
NHID = 32
NLAYERS = 2        # wavefront packing below assumes exactly 2 layers
SEQ = 8
BATCH = 2
INITRANGE = 0.1

IDPAD = 128             # one-hot id space: NTOKEN + NTAG = 70, padded to 128 lanes
HEAD_PAD = 128          # pad each head's output dim to a full lane width
WORD_OFF = 0            # word logits live in lanes [0, NTOKEN)
TAG_OFF = HEAD_PAD      # tag  logits live in lanes [128, 128+NTAG)


# ---------------- fused Pallas kernel ----------------------------------------
def fused_kernel(tok_ref, tag_ref, wep_ref, bias_ref, wbig_ref, h0_ref, c0_ref,
                 whead_ref, bhead_ref, p_ref, hn_ref, cn_ref, extra_ref,
                 *, seq, bsz, nhid):
    """One-hot embed + wavefront 2-layer LSTM (word & tag packed) + fused head.

    tok_ref/tag_ref : (seq, B, 1) int32 ids (tag ids pre-offset by NTOKEN)
    wep_ref         : (128, 16H)  embedding tables composed with layer-0 Wih,
                      fused gate order [i|f|o|g], stream order [w0 t0 w1 t1]
    bias_ref        : (1, 16H)    combined b_ih + b_hh for BOTH layers
    wbig_ref        : (4H, 16H)   wavefront recurrent weight
                      rows = state lanes [h_w0|h_t0|h_w1|h_t1]
                      cols = gates of layer 0 and layer 1 (layer-1 input
                      projection from layer-0 output folded in)
    h0_ref/c0_ref   : (B, 4H)     packed initial state
    whead_ref       : (4H, 256)   composed mid+out head (layer-0 rows zero)
    bhead_ref       : (1, 256)
    p_ref           : (seq, B, 256) packed word/tag logits
    hn_ref/cn_ref   : (B, 4H)
    extra_ref       : VMEM (seq, B, 16H) per-timestep input projection (+bias)
    """
    f32 = jnp.float32
    H = nhid
    idpad = wep_ref.shape[0]
    gw = wep_ref.shape[1]                           # 16H

    bias = bias_ref[...]                            # (1, 16H)
    lane_id = jax.lax.broadcasted_iota(jnp.int32, (bsz, idpad), 1)

    # --- prologue: embedding + layer-0 input projection, hoisted & time-major
    # TODO(synk): dropout is identity (eval-mode); no stochastic masking applied.
    for t in range(seq):
        oh = ((lane_id == tok_ref[t]).astype(f32) +
              (lane_id == tag_ref[t]).astype(f32))                 # (B, 128)
        extra_ref[t] = jnp.dot(oh, wep_ref[...],
                               preferred_element_type=f32) + bias  # (B, 16H)

    # --- wavefront recurrence over both stacked layers -----------------------
    # step d: layer 0 processes time t=d (d<seq), layer 1 processes t=d-1 (d>=1)
    wbig = wbig_ref[...]
    whead = whead_ref[...]
    bhead = bhead_ref[...]
    h = h0_ref[...]                                  # (B, 4H) = 128 lanes
    c = c0_ref[...]
    l0_lanes = jax.lax.broadcasted_iota(jnp.int32, (bsz, 4 * H), 1) < 2 * H

    # TODO(synk): loops are statically unrolled for this toy size; switch to
    # lax.fori_loop(..., unroll=True) carrying (h, c) if SEQ/NLAYERS grow.
    for d in range(seq + 1):
        add = extra_ref[d] if d < seq else bias      # last step: layer 1 only
        gates = jnp.dot(h, wbig, preferred_element_type=f32) + add  # (B, 16H)
        s = jax.nn.sigmoid(gates[:, :12 * H])        # i | f | o, both layers
        g = jnp.tanh(gates[:, 12 * H:])              # g,         both layers
        c_new = s[:, 4 * H:8 * H] * c + s[:, :4 * H] * g            # (B, 4H)
        h_new = s[:, 8 * H:12 * H] * jnp.tanh(c_new)                 # (B, 4H)
        if d == 0:                                   # layer 1 not active yet
            c = jnp.where(l0_lanes, c_new, c)
            h = jnp.where(l0_lanes, h_new, h)
        elif d == seq:                               # layer 0 already finished
            c = jnp.where(l0_lanes, c, c_new)
            h = jnp.where(l0_lanes, h, h_new)
        else:
            c = c_new
            h = h_new
        if d >= 1:
            # composed head on layer-1 output at time t = d-1 (off critical path;
            # layer-0 lanes of h are killed by zero rows in whead)
            p_ref[d - 1] = jnp.dot(h, whead,
                                   preferred_element_type=f32) + bhead

    hn_ref[...] = h
    cn_ref[...] = c


def run_fused(tok, tag, wep, bias, wbig, h0, c0, whead, bhead):
    seq, bsz, _ = tok.shape
    h4 = h0.shape[1]                 # 4H
    nhid = h4 // 4
    gw = wep.shape[1]                # 16H
    hp = whead.shape[1]              # 2 * HEAD_PAD
    vmem = pl.BlockSpec(memory_space=pltpu.MemorySpace.VMEM)
    kern = functools.partial(fused_kernel, seq=seq, bsz=bsz, nhid=nhid)
    p, hn, cn = pl.pallas_call(
        kern,
        out_shape=(
            jax.ShapeDtypeStruct((seq, bsz, hp), jnp.float32),
            jax.ShapeDtypeStruct((bsz, h4), jnp.float32),
            jax.ShapeDtypeStruct((bsz, h4), jnp.float32),
        ),
        in_specs=[vmem] * 9,
        out_specs=(vmem, vmem, vmem),
        scratch_shapes=[pltpu.VMEM((seq, bsz, gw), jnp.float32)],
    )(tok, tag, wep, bias, wbig, h0, c0, whead, bhead)
    return p, hn, cn


# ---------------- parameter init (PyTorch layout, mirrors init_weights) -----
def init_params(key):
    ks = jax.random.split(key, 16)
    u = lambda k, shape, r: jax.random.uniform(k, shape, jnp.float32, -r, r)
    krec = 1.0 / jnp.sqrt(NHID)      # PyTorch default LSTM init range
    return {
        "word_emb": u(ks[0], (NTOKEN, NINP), INITRANGE),
        "tag_emb": u(ks[1], (NTAG, NINP), INITRANGE),
        # stacked LSTM weights, PyTorch layout (4H, in) per layer, gate order i,f,g,o
        "word_wih": u(ks[2], (NLAYERS, 4 * NHID, NINP), krec),
        "word_whh": u(ks[3], (NLAYERS, 4 * NHID, NHID), krec),
        "word_bih": u(ks[4], (NLAYERS, 4 * NHID), krec),
        "word_bhh": u(ks[5], (NLAYERS, 4 * NHID), krec),
        "tag_wih": u(ks[6], (NLAYERS, 4 * NHID, NINP), krec),
        "tag_whh": u(ks[7], (NLAYERS, 4 * NHID, NHID), krec),
        "tag_bih": u(ks[8], (NLAYERS, 4 * NHID), krec),
        "tag_bhh": u(ks[9], (NLAYERS, 4 * NHID), krec),
        # Linear layers, PyTorch layout (out, in); biases filled with 0
        "w_tag_mid_w": u(ks[10], (NHID, NHID), INITRANGE),
        "w_tag_mid_b": jnp.zeros((NHID,), jnp.float32),
        "w_word_mid_w": u(ks[11], (NHID, NHID), INITRANGE),
        "w_word_mid_b": jnp.zeros((NHID,), jnp.float32),
        "w_tag_out_w": u(ks[12], (NTAG, NHID), INITRANGE),
        "w_tag_out_b": jnp.zeros((NTAG,), jnp.float32),
        "w_word_out_w": u(ks[13], (NTOKEN, NHID), INITRANGE),
        "w_word_out_b": jnp.zeros((NTOKEN,), jnp.float32),
    }


# ---------------- one-time packing into kernel-friendly layouts -------------
def pack_params(p):
    assert NLAYERS == 2, "wavefront packing is written for exactly 2 layers"
    H = NHID
    f32 = jnp.float32
    PY = [0, 1, 3, 2]   # fused gate order i,f,o,g -> PyTorch row blocks i,f,g,o

    # fused gate-column offset for (gate, layer, stream); stream 0=word, 1=tag
    def col(og, layer, stream):
        return og * 4 * H + layer * 2 * H + stream * H

    streams = [
        (p["word_wih"], p["word_whh"], p["word_bih"], p["word_bhh"], p["word_emb"], 0),
        (p["tag_wih"], p["tag_whh"], p["tag_bih"], p["tag_bhh"], p["tag_emb"], NTOKEN),
    ]

    wbig = jnp.zeros((4 * H, 16 * H), f32)
    bias = jnp.zeros((1, 16 * H), f32)
    wep = jnp.zeros((IDPAD, 16 * H), f32)

    for s, (wih, whh, bih, bhh, emb, row0) in enumerate(streams):
        nvocab = emb.shape[0]
        for og in range(4):
            pg = PY[og]
            wih_g0 = wih[0, pg * H:(pg + 1) * H, :]     # (H_gate, NINP)
            wih_g1 = wih[1, pg * H:(pg + 1) * H, :]     # (H_gate, H)
            whh_g0 = whh[0, pg * H:(pg + 1) * H, :]
            whh_g1 = whh[1, pg * H:(pg + 1) * H, :]
            b_g0 = bih[0, pg * H:(pg + 1) * H] + bhh[0, pg * H:(pg + 1) * H]
            b_g1 = bih[1, pg * H:(pg + 1) * H] + bhh[1, pg * H:(pg + 1) * H]
            # layer-0 recurrence: state rows h_{s,l0} -> layer-0 gate cols
            wbig = wbig.at[s * H:(s + 1) * H,
                           col(og, 0, s):col(og, 0, s) + H].set(whh_g0.T)
            # layer-1 input projection (consumes layer-0 output of same stream)
            wbig = wbig.at[s * H:(s + 1) * H,
                           col(og, 1, s):col(og, 1, s) + H].set(wih_g1.T)
            # layer-1 recurrence: state rows h_{s,l1} -> layer-1 gate cols
            wbig = wbig.at[2 * H + s * H:2 * H + (s + 1) * H,
                           col(og, 1, s):col(og, 1, s) + H].set(whh_g1.T)
            # combined biases (b_ih + b_hh), both layers
            bias = bias.at[0, col(og, 0, s):col(og, 0, s) + H].set(b_g0)
            bias = bias.at[0, col(og, 1, s):col(og, 1, s) + H].set(b_g1)
            # embedding table composed with layer-0 input projection
            wep = wep.at[row0:row0 + nvocab,
                         col(og, 0, s):col(og, 0, s) + H].set(emb @ wih_g0.T)

    # composed linear head: fold (mid, out) into one matrix applied to the
    # packed state [h_w0|h_t0|h_w1|h_t1]; layer-0 rows stay zero.
    m_ww = p["w_word_mid_w"].T @ p["w_word_out_w"].T   # (H, NTOKEN)
    m_tw = p["w_tag_mid_w"].T @ p["w_word_out_w"].T    # (H, NTOKEN)
    m_tt = p["w_tag_mid_w"].T @ p["w_tag_out_w"].T     # (H, NTAG)
    whead = jnp.zeros((4 * H, 2 * HEAD_PAD), f32)
    whead = whead.at[2 * H:3 * H, WORD_OFF:WORD_OFF + NTOKEN].set(m_ww)
    whead = whead.at[3 * H:4 * H, WORD_OFF:WORD_OFF + NTOKEN].set(m_tw)
    whead = whead.at[3 * H:4 * H, TAG_OFF:TAG_OFF + NTAG].set(m_tt)
    bhead = jnp.zeros((1, 2 * HEAD_PAD), f32)
    bhead = bhead.at[0, WORD_OFF:WORD_OFF + NTOKEN].set(
        (p["w_word_mid_b"] + p["w_tag_mid_b"]) @ p["w_word_out_w"].T
        + p["w_word_out_b"])
    bhead = bhead.at[0, TAG_OFF:TAG_OFF + NTAG].set(
        p["w_tag_mid_b"] @ p["w_tag_out_w"].T + p["w_tag_out_b"])

    return {"wep": wep, "bias": bias, "wbig": wbig,
            "whead": whead, "bhead": bhead}


# ---------------- forward (all heavy work inside the fused kernel) ----------
def forward(packed, input_token, input_tag, hidden_word, hidden_tag):
    S, B = input_token.shape
    H = NHID
    tok = input_token.astype(jnp.int32).reshape(S, B, 1)
    tag = (input_tag.astype(jnp.int32) + NTOKEN).reshape(S, B, 1)
    hw, cw = hidden_word
    ht, ct = hidden_tag
    # packed state lanes: [word_l0 | tag_l0 | word_l1 | tag_l1]
    h0 = jnp.concatenate([hw[0], ht[0], hw[1], ht[1]], axis=-1)   # (B, 4H)
    c0 = jnp.concatenate([cw[0], ct[0], cw[1], ct[1]], axis=-1)

    p, hn, cn = run_fused(tok, tag, packed["wep"], packed["bias"],
                          packed["wbig"], h0, c0,
                          packed["whead"], packed["bhead"])

    p_word = p[:, :, WORD_OFF:WORD_OFF + NTOKEN]        # (S, B, NTOKEN)
    p_tag = p[:, :, TAG_OFF:TAG_OFF + NTAG]             # (S, B, NTAG)
    hn_w = jnp.stack([hn[:, 0:H], hn[:, 2 * H:3 * H]])  # (L, B, H)
    hn_t = jnp.stack([hn[:, H:2 * H], hn[:, 3 * H:4 * H]])
    cn_w = jnp.stack([cn[:, 0:H], cn[:, 2 * H:3 * H]])
    cn_t = jnp.stack([cn[:, H:2 * H], cn[:, 3 * H:4 * H]])
    return p_word, p_tag, (hn_w, cn_w), (hn_t, cn_t)


# ---------------- pure-JAX reference for verification -----------------------
def lstm_ref(x, wih, whh, bih, bhh, h0, c0):
    seq = x.shape[0]
    nlayers, H = wih.shape[0], h0.shape[-1]
    inp = x
    hs, cs = [], []
    for l in range(nlayers):
        h, c = h0[l], c0[l]
        outs = []
        for t in range(seq):
            gates = inp[t] @ wih[l].T + bih[l] + h @ whh[l].T + bhh[l]
            i = jax.nn.sigmoid(gates[:, :H])
            f = jax.nn.sigmoid(gates[:, H:2 * H])
            g = jnp.tanh(gates[:, 2 * H:3 * H])
            o = jax.nn.sigmoid(gates[:, 3 * H:])
            c = f * c + i * g
            h = o * jnp.tanh(c)
            outs.append(h)
        inp = jnp.stack(outs)
        hs.append(h)
        cs.append(c)
    return inp, jnp.stack(hs), jnp.stack(cs)


def forward_ref(params, input_token, input_tag, hidden_word, hidden_tag):
    we = jnp.take(params["word_emb"], input_token, axis=0)
    te = jnp.take(params["tag_emb"], input_tag, axis=0)
    ow, hnw, cnw = lstm_ref(we, params["word_wih"], params["word_whh"],
                            params["word_bih"], params["word_bhh"],
                            hidden_word[0], hidden_word[1])
    ot, hnt, cnt = lstm_ref(te, params["tag_wih"], params["tag_whh"],
                            params["tag_bih"], params["tag_bhh"],
                            hidden_tag[0], hidden_tag[1])
    h_tag = ot @ params["w_tag_mid_w"].T + params["w_tag_mid_b"]
    h_word = ow @ params["w_word_mid_w"].T + params["w_word_mid_b"]
    p_tag = h_tag @ params["w_tag_out_w"].T + params["w_tag_out_b"]
    p_word = (h_tag + h_word) @ params["w_word_out_w"].T + params["w_word_out_b"]
    return p_word, p_tag, (hnw, cnw), (hnt, cnt)


# ---------------- main -------------------------------------------------------
if __name__ == "__main__":
    key = jax.random.PRNGKey(0)
    kp, kt, kg, kh = jax.random.split(key, 4)
    params = init_params(kp)
    packed = pack_params(params)            # one-time weight packing

    input_token = jax.random.randint(kt, (SEQ, BATCH), 0, NTOKEN, dtype=jnp.int32)
    input_tag = jax.random.randint(kg, (SEQ, BATCH), 0, NTAG, dtype=jnp.int32)
    kh1, kh2, kh3, kh4 = jax.random.split(kh, 4)
    hidden_word = (0.1 * jax.random.normal(kh1, (NLAYERS, BATCH, NHID), jnp.float32),
                   0.1 * jax.random.normal(kh2, (NLAYERS, BATCH, NHID), jnp.float32))
    hidden_tag = (0.1 * jax.random.normal(kh3, (NLAYERS, BATCH, NHID), jnp.float32),
                  0.1 * jax.random.normal(kh4, (NLAYERS, BATCH, NHID), jnp.float32))

    fwd = jax.jit(forward)
    p_word, p_tag, hw, ht = fwd(packed, input_token, input_tag,
                                hidden_word, hidden_tag)
    jax.block_until_ready((p_word, p_tag, hw, ht))

    r_word, r_tag, rhw, rht = forward_ref(params, input_token, input_tag,
                                          hidden_word, hidden_tag)
    assert jnp.allclose(p_word, r_word, atol=1e-4, rtol=1e-4)
    assert jnp.allclose(p_tag, r_tag, atol=1e-4, rtol=1e-4)
    assert jnp.allclose(hw[0], rhw[0], atol=1e-4, rtol=1e-4)
    assert jnp.allclose(hw[1], rhw[1], atol=1e-4, rtol=1e-4)
    assert jnp.allclose(ht[0], rht[0], atol=1e-4, rtol=1e-4)
    assert jnp.allclose(ht[1], rht[1], atol=1e-4, rtol=1e-4)

    print("KERNEL_OK")
</pallas_src>

<mosaic_0001>
module attributes {stable_mosaic.version = 11 : i64} {
  func.func @fused_kernel(%arg0: memref<8x2x1xi32, #tpu.memory_space<vmem>>, %arg1: memref<8x2x1xi32, #tpu.memory_space<vmem>>, %arg2: memref<128x512xf32, #tpu.memory_space<vmem>>, %arg3: memref<1x512xf32, #tpu.memory_space<vmem>>, %arg4: memref<128x512xf32, #tpu.memory_space<vmem>>, %arg5: memref<2x128xf32, #tpu.memory_space<vmem>>, %arg6: memref<2x128xf32, #tpu.memory_space<vmem>>, %arg7: memref<128x256xf32, #tpu.memory_space<vmem>>, %arg8: memref<1x256xf32, #tpu.memory_space<vmem>>, %arg9: memref<8x2x256xf32, #tpu.memory_space<vmem>>, %arg10: memref<2x128xf32, #tpu.memory_space<vmem>>, %arg11: memref<2x128xf32, #tpu.memory_space<vmem>>, %arg12: memref<8x2x512xf32, #tpu.memory_space<vmem>>) attributes {dimension_semantics = [], scalar_prefetch = 0 : i64, scratch_operands = 1 : i64, tpu.core_type = #tpu.core_type<tc>} {
    %c0 = arith.constant 0 : index
    %c0_0 = arith.constant 0 : index
    %0 = vector.load %arg3[%c0, %c0_0] : memref<1x512xf32, #tpu.memory_space<vmem>>, vector<1x512xf32>
    %1 = tpu.iota {dimensions = array<i32: 1>} : vector<2x128xi32>
    %c0_1 = arith.constant 0 : index
    %c0_2 = arith.constant 0 : index
    %c0_3 = arith.constant 0 : index
    %2 = vector.load %arg0[%c0_1, %c0_2, %c0_3] : memref<8x2x1xi32, #tpu.memory_space<vmem>>, vector<1x2x1xi32>
    %3 = vector.shape_cast %2 : vector<1x2x1xi32> to vector<2x1xi32>
    %4 = vector.broadcast %3 : vector<2x1xi32> to vector<2x128xi32>
    %5 = arith.cmpi eq, %1, %4 : vector<2x128xi32>
    %6 = arith.extui %5 : vector<2x128xi1> to vector<2x128xi32>
    %7 = arith.sitofp %6 : vector<2x128xi32> to vector<2x128xf32>
    %c0_4 = arith.constant 0 : index
    %c0_5 = arith.constant 0 : index
    %c0_6 = arith.constant 0 : index
    %8 = vector.load %arg1[%c0_4, %c0_5, %c0_6] : memref<8x2x1xi32, #tpu.memory_space<vmem>>, vector<1x2x1xi32>
    %9 = vector.shape_cast %8 : vector<1x2x1xi32> to vector<2x1xi32>
    %10 = vector.broadcast %9 : vector<2x1xi32> to vector<2x128xi32>
    %11 = arith.cmpi eq, %1, %10 : vector<2x128xi32>
    %12 = arith.extui %11 : vector<2x128xi1> to vector<2x128xi32>
    %13 = arith.sitofp %12 : vector<2x128xi32> to vector<2x128xf32>
    %14 = arith.addf %7, %13 : vector<2x128xf32>
    %c0_7 = arith.constant 0 : index
    %c0_8 = arith.constant 0 : index
    %15 = vector.load %arg2[%c0_7, %c0_8] : memref<128x512xf32, #tpu.memory_space<vmem>>, vector<128x512xf32>
    %cst = arith.constant dense<0.000000e+00> : vector<2x512xf32>
    %16 = tpu.matmul %14, %15, %cst {dimension_numbers = #tpu.dot_dimension_numbers<[1], [0], [0], [1], [0, 0, 1, 1], [], []>} : vector<2x128xf32>, vector<128x512xf32>, vector<2x512xf32> -> vector<2x512xf32>
    %17 = vector.broadcast %0 : vector<1x512xf32> to vector<2x512xf32>
    %18 = arith.addf %16, %17 : vector<2x512xf32>
    %c0_9 = arith.constant 0 : index
    %c0_10 = arith.constant 0 : index
    %c0_11 = arith.constant 0 : index
    %19 = vector.load %arg12[%c0_9, %c0_10, %c0_11] : memref<8x2x512xf32, #tpu.memory_space<vmem>>, vector<1x2x512xf32>
    %20 = vector.shape_cast %19 : vector<1x2x512xf32> to vector<2x512xf32>
    %21 = vector.shape_cast %18 : vector<2x512xf32> to vector<1x2x512xf32>
    tpu.vector_store %arg12[%c0_9, %c0_10, %c0_11], %21 {strides = array<i32>} : memref<8x2x512xf32, #tpu.memory_space<vmem>>, vector<1x2x512xf32>,
    %c1 = arith.constant 1 : index
    %c0_12 = arith.constant 0 : index
    %c0_13 = arith.constant 0 : index
    %22 = vector.load %arg0[%c1, %c0_12, %c0_13] : memref<8x2x1xi32, #tpu.memory_space<vmem>>, vector<1x2x1xi32>
    %23 = vector.shape_cast %22 : vector<1x2x1xi32> to vector<2x1xi32>
    %24 = vector.broadcast %23 : vector<2x1xi32> to vector<2x128xi32>
    %25 = arith.cmpi eq, %1, %24 : vector<2x128xi32>
    %26 = arith.extui %25 : vector<2x128xi1> to vector<2x128xi32>
    %27 = arith.sitofp %26 : vector<2x128xi32> to vector<2x128xf32>
    %c1_14 = arith.constant 1 : index
    %c0_15 = arith.constant 0 : index
    %c0_16 = arith.constant 0 : index
    %28 = vector.load %arg1[%c1_14, %c0_15, %c0_16] : memref<8x2x1xi32, #tpu.memory_space<vmem>>, vector<1x2x1xi32>
    %29 = vector.shape_cast %28 : vector<1x2x1xi32> to vector<2x1xi32>
    %30 = vector.broadcast %29 : vector<2x1xi32> to vector<2x128xi32>
    %31 = arith.cmpi eq, %1, %30 : vector<2x128xi32>
    %32 = arith.extui %31 : vector<2x128xi1> to vector<2x128xi32>
    %33 = arith.sitofp %32 : vector<2x128xi32> to vector<2x128xf32>
    %34 = arith.addf %27, %33 : vector<2x128xf32>
    %c0_17 = arith.constant 0 : index
    %c0_18 = arith.constant 0 : index
    %35 = vector.load %arg2[%c0_17, %c0_18] : memref<128x512xf32, #tpu.memory_space<vmem>>, vector<128x512xf32>
    %cst_19 = arith.constant dense<0.000000e+00> : vector<2x512xf32>
    %36 = tpu.matmul %34, %35, %cst_19 {dimension_numbers = #tpu.dot_dimension_numbers<[1], [0], [0], [1], [0, 0, 1, 1], [], []>} : vector<2x128xf32>, vector<128x512xf32>, vector<2x512xf32> -> vector<2x512xf32>
    %37 = vector.broadcast %0 : vector<1x512xf32> to vector<2x512xf32>
    %38 = arith.addf %36, %37 : vector<2x512xf32>
    %c1_20 = arith.constant 1 : index
    %c0_21 = arith.constant 0 : index
    %c0_22 = arith.constant 0 : index
    %39 = vector.load %arg12[%c1_20, %c0_21, %c0_22] : memref<8x2x512xf32, #tpu.memory_space<vmem>>, vector<1x2x512xf32>
    %40 = vector.shape_cast %39 : vector<1x2x512xf32> to vector<2x512xf32>
    %41 = vector.shape_cast %38 : vector<2x512xf32> to vector<1x2x512xf32>
    tpu.vector_store %arg12[%c1_20, %c0_21, %c0_22], %41 {strides = array<i32>} : memref<8x2x512xf32, #tpu.memory_space<vmem>>, vector<1x2x512xf32>,
    %c2 = arith.constant 2 : index
    %c0_23 = arith.constant 0 : index
    %c0_24 = arith.constant 0 : index
    %42 = vector.load %arg0[%c2, %c0_23, %c0_24] : memref<8x2x1xi32, #tpu.memory_space<vmem>>, vector<1x2x1xi32>
    %43 = vector.shape_cast %42 : vector<1x2x1xi32> to vector<2x1xi32>
    %44 = vector.broadcast %43 : vector<2x1xi32> to vector<2x128xi32>
    %45 = arith.cmpi eq, %1, %44 : vector<2x128xi32>
    %46 = arith.extui %45 : vector<2x128xi1> to vector<2x128xi32>
    %47 = arith.sitofp %46 : vector<2x128xi32> to vector<2x128xf32>
    %c2_25 = arith.constant 2 : index
    %c0_26 = arith.constant 0 : index
    %c0_27 = arith.constant 0 : index
    %48 = vector.load %arg1[%c2_25, %c0_26, %c0_27] : memref<8x2x1xi32, #tpu.memory_space<vmem>>, vector<1x2x1xi32>
    %49 = vector.shape_cast %48 : vector<1x2x1xi32> to vector<2x1xi32>
    %50 = vector.broadcast %49 : vector<2x1xi32> to vector<2x128xi32>
    %51 = arith.cmpi eq, %1, %50 : vector<2x128xi32>
    %52 = arith.extui %51 : vector<2x128xi1> to vector<2x128xi32>
    %53 = arith.sitofp %52 : vector<2x128xi32> to vector<2x128xf32>
    %54 = arith.addf %47, %53 : vector<2x128xf32>
    %c0_28 = arith.constant 0 : index
    %c0_29 = arith.constant 0 : index
    %55 = vector.load %arg2[%c0_28, %c0_29] : memref<128x512xf32, #tpu.memory_space<vmem>>, vector<128x512xf32>
    %cst_30 = arith.constant dense<0.000000e+00> : vector<2x512xf32>
    %56 = tpu.matmul %54, %55, %cst_30 {dimension_numbers = #tpu.dot_dimension_numbers<[1], [0], [0], [1], [0, 0, 1, 1], [], []>} : vector<2x128xf32>, vector<128x512xf32>, vector<2x512xf32> -> vector<2x512xf32>
    %57 = vector.broadcast %0 : vector<1x512xf32> to vector<2x512xf32>
    %58 = arith.addf %56, %57 : vector<2x512xf32>
    %c2_31 = arith.constant 2 : index
    %c0_32 = arith.constant 0 : index
    %c0_33 = arith.constant 0 : index
    %59 = vector.load %arg12[%c2_31, %c0_32, %c0_33] : memref<8x2x512xf32, #tpu.memory_space<vmem>>, vector<1x2x512xf32>
    %60 = vector.shape_cast %59 : vector<1x2x512xf32> to vector<2x512xf32>
    %61 = vector.shape_cast %58 : vector<2x512xf32> to vector<1x2x512xf32>
    tpu.vector_store %arg12[%c2_31, %c0_32, %c0_33], %61 {strides = array<i32>} : memref<8x2x512xf32, #tpu.memory_space<vmem>>, vector<1x2x512xf32>,
    %c3 = arith.constant 3 : index
    %c0_34 = arith.constant 0 : index
    %c0_35 = arith.constant 0 : index
    %62 = vector.load %arg0[%c3, %c0_34, %c0_35] : memref<8x2x1xi32, #tpu.memory_space<vmem>>, vector<1x2x1xi32>
    %63 = vector.shape_cast %62 : vector<1x2x1xi32> to vector<2x1xi32>
    %64 = vector.broadcast %63 : vector<2x1xi32> to vector<2x128xi32>
    %65 = arith.cmpi eq, %1, %64 : vector<2x128xi32>
    %66 = arith.extui %65 : vector<2x128xi1> to vector<2x128xi32>
    %67 = arith.sitofp %66 : vector<2x128xi32> to vector<2x128xf32>
    %c3_36 = arith.constant 3 : index
    %c0_37 = arith.constant 0 : index
    %c0_38 = arith.constant 0 : index
    %68 = vector.load %arg1[%c3_36, %c0_37, %c0_38] : memref<8x2x1xi32, #tpu.memory_space<vmem>>, vector<1x2x1xi32>
    %69 = vector.shape_cast %68 : vector<1x2x1xi32> to vector<2x1xi32>
    %70 = vector.broadcast %69 : vector<2x1xi32> to vector<2x128xi32>
    %71 = arith.cmpi eq, %1, %70 : vector<2x128xi32>
    %72 = arith.extui %71 : vector<2x128xi1> to vector<2x128xi32>
    %73 = arith.sitofp %72 : vector<2x128xi32> to vector<2x128xf32>
    %74 = arith.addf %67, %73 : vector<2x128xf32>
    %c0_39 = arith.constant 0 : index
    %c0_40 = arith.constant 0 : index
    %75 = vector.load %arg2[%c0_39, %c0_40] : memref<128x512xf32, #tpu.memory_space<vmem>>, vector<128x512xf32>
    %cst_41 = arith.constant dense<0.000000e+00> : vector<2x512xf32>
    %76 = tpu.matmul %74, %75, %cst_41 {dimension_numbers = #tpu.dot_dimension_numbers<[1], [0], [0], [1], [0, 0, 1, 1], [], []>} : vector<2x128xf32>, vector<128x512xf32>, vector<2x512xf32> -> vector<2x512xf32>
    %77 = vector.broadcast %0 : vector<1x512xf32> to vector<2x512xf32>
    %78 = arith.addf %76, %77 : vector<2x512xf32>
    %c3_42 = arith.constant 3 : index
    %c0_43 = arith.constant 0 : index
    %c0_44 = arith.constant 0 : index
    %79 = vector.load %arg12[%c3_42, %c0_43, %c0_44] : memref<8x2x512xf32, #tpu.memory_space<vmem>>, vector<1x2x512xf32>
    %80 = vector.shape_cast %79 : vector<1x2x512xf32> to vector<2x512xf32>
    %81 = vector.shape_cast %78 : vector<2x512xf32> to vector<1x2x512xf32>
    tpu.vector_store %arg12[%c3_42, %c0_43, %c0_44], %81 {strides = array<i32>} : memref<8x2x512xf32, #tpu.memory_space<vmem>>, vector<1x2x512xf32>,
    %c4 = arith.constant 4 : index
    %c0_45 = arith.constant 0 : index
    %c0_46 = arith.constant 0 : index
    %82 = vector.load %arg0[%c4, %c0_45, %c0_46] : memref<8x2x1xi32, #tpu.memory_space<vmem>>, vector<1x2x1xi32>
    %83 = vector.shape_cast %82 : vector<1x2x1xi32> to vector<2x1xi32>
    %84 = vector.broadcast %83 : vector<2x1xi32> to vector<2x128xi32>
    %85 = arith.cmpi eq, %1, %84 : vector<2x128xi32>
    %86 = arith.extui %85 : vector<2x128xi1> to vector<2x128xi32>
    %87 = arith.sitofp %86 : vector<2x128xi32> to vector<2x128xf32>
    %c4_47 = arith.constant 4 : index
    %c0_48 = arith.constant 0 : index
    %c0_49 = arith.constant 0 : index
    %88 = vector.load %arg1[%c4_47, %c0_48, %c0_49] : memref<8x2x1xi32, #tpu.memory_space<vmem>>, vector<1x2x1xi32>
    %89 = vector.shape_cast %88 : vector<1x2x1xi32> to vector<2x1xi32>
    %90 = vector.broadcast %89 : vector<2x1xi32> to vector<2x128xi32>
    %91 = arith.cmpi eq, %1, %90 : vector<2x128xi32>
    %92 = arith.extui %91 : vector<2x128xi1> to vector<2x128xi32>
    %93 = arith.sitofp %92 : vector<2x128xi32> to vector<2x128xf32>
    %94 = arith.addf %87, %93 : vector<2x128xf32>
    %c0_50 = arith.constant 0 : index
    %c0_51 = arith.constant 0 : index
    %95 = vector.load %arg2[%c0_50, %c0_51] : memref<128x512xf32, #tpu.memory_space<vmem>>, vector<128x512xf32>
    %cst_52 = arith.constant dense<0.000000e+00> : vector<2x512xf32>
    %96 = tpu.matmul %94, %95, %cst_52 {dimension_numbers = #tpu.dot_dimension_numbers<[1], [0], [0], [1], [0, 0, 1, 1], [], []>} : vector<2x128xf32>, vector<128x512xf32>, vector<2x512xf32> -> vector<2x512xf32>
    %97 = vector.broadcast %0 : vector<1x512xf32> to vector<2x512xf32>
    %98 = arith.addf %96, %97 : vector<2x512xf32>
    %c4_53 = arith.constant 4 : index
    %c0_54 = arith.constant 0 : index
    %c0_55 = arith.constant 0 : index
    %99 = vector.load %arg12[%c4_53, %c0_54, %c0_55] : memref<8x2x512xf32, #tpu.memory_space<vmem>>, vector<1x2x512xf32>
    %100 = vector.shape_cast %99 : vector<1x2x512xf32> to vector<2x512xf32>
    %101 = vector.shape_cast %98 : vector<2x512xf32> to vector<1x2x512xf32>
    tpu.vector_store %arg12[%c4_53, %c0_54, %c0_55], %101 {strides = array<i32>} : memref<8x2x512xf32, #tpu.memory_space<vmem>>, vector<1x2x512xf32>,
    %c5 = arith.constant 5 : index
    %c0_56 = arith.constant 0 : index
    %c0_57 = arith.constant 0 : index
    %102 = vector.load %arg0[%c5, %c0_56, %c0_57] : memref<8x2x1xi32, #tpu.memory_space<vmem>>, vector<1x2x1xi32>
    %103 = vector.shape_cast %102 : vector<1x2x1xi32> to vector<2x1xi32>
    %104 = vector.broadcast %103 : vector<2x1xi32> to vector<2x128xi32>
    %105 = arith.cmpi eq, %1, %104 : vector<2x128xi32>
    %106 = arith.extui %105 : vector<2x128xi1> to vector<2x128xi32>
    %107 = arith.sitofp %106 : vector<2x128xi32> to vector<2x128xf32>
    %c5_58 = arith.constant 5 : index
    %c0_59 = arith.constant 0 : index
    %c0_60 = arith.constant 0 : index
    %108 = vector.load %arg1[%c5_58, %c0_59, %c0_60] : memref<8x2x1xi32, #tpu.memory_space<vmem>>, vector<1x2x1xi32>
    %109 = vector.shape_cast %108 : vector<1x2x1xi32> to vector<2x1xi32>
    %110 = vector.broadcast %109 : vector<2x1xi32> to vector<2x128xi32>
    %111 = arith.cmpi eq, %1, %110 : vector<2x128xi32>
    %112 = arith.extui %111 : vector<2x128xi1> to vector<2x128xi32>
    %113 = arith.sitofp %112 : vector<2x128xi32> to vector<2x128xf32>
    %114 = arith.addf %107, %113 : vector<2x128xf32>
    %c0_61 = arith.constant 0 : index
    %c0_62 = arith.constant 0 : index
    %115 = vector.load %arg2[%c0_61, %c0_62] : memref<128x512xf32, #tpu.memory_space<vmem>>, vector<128x512xf32>
    %cst_63 = arith.constant dense<0.000000e+00> : vector<2x512xf32>
    %116 = tpu.matmul %114, %115, %cst_63 {dimension_numbers = #tpu.dot_dimension_numbers<[1], [0], [0], [1], [0, 0, 1, 1], [], []>} : vector<2x128xf32>, vector<128x512xf32>, vector<2x512xf32> -> vector<2x512xf32>
    %117 = vector.broadcast %0 : vector<1x512xf32> to vector<2x512xf32>
    %118 = arith.addf %116, %117 : vector<2x512xf32>
    %c5_64 = arith.constant 5 : index
    %c0_65 = arith.constant 0 : index
    %c0_66 = arith.constant 0 : index
    %119 = vector.load %arg12[%c5_64, %c0_65, %c0_66] : memref<8x2x512xf32, #tpu.memory_space<vmem>>, vector<1x2x512xf32>
    %120 = vector.shape_cast %119 : vector<1x2x512xf32> to vector<2x512xf32>
    %121 = vector.shape_cast %118 : vector<2x512xf32> to vector<1x2x512xf32>
    tpu.vector_store %arg12[%c5_64, %c0_65, %c0_66], %121 {strides = array<i32>} : memref<8x2x512xf32, #tpu.memory_space<vmem>>, vector<1x2x512xf32>,
    %c6 = arith.constant 6 : index
    %c0_67 = arith.constant 0 : index
    %c0_68 = arith.constant 0 : index
    %122 = vector.load %arg0[%c6, %c0_67, %c0_68] : memref<8x2x1xi32, #tpu.memory_space<vmem>>, vector<1x2x1xi32>
    %123 = vector.shape_cast %122 : vector<1x2x1xi32> to vector<2x1xi32>
    %124 = vector.broadcast %123 : vector<2x1xi32> to vector<2x128xi32>
    %125 = arith.cmpi eq, %1, %124 : vector<2x128xi32>
    %126 = arith.extui %125 : vector<2x128xi1> to vector<2x128xi32>
    %127 = arith.sitofp %126 : vector<2x128xi32> to vector<2x128xf32>
    %c6_69 = arith.constant 6 : index
    %c0_70 = arith.constant 0 : index
    %c0_71 = arith.constant 0 : index
    %128 = vector.load %arg1[%c6_69, %c0_70, %c0_71] : memref<8x2x1xi32, #tpu.memory_space<vmem>>, vector<1x2x1xi32>
    %129 = vector.shape_cast %128 : vector<1x2x1xi32> to vector<2x1xi32>
    %130 = vector.broadcast %129 : vector<2x1xi32> to vector<2x128xi32>
    %131 = arith.cmpi eq, %1, %130 : vector<2x128xi32>
    %132 = arith.extui %131 : vector<2x128xi1> to vector<2x128xi32>
    %133 = arith.sitofp %132 : vector<2x128xi32> to vector<2x128xf32>
    %134 = arith.addf %127, %133 : vector<2x128xf32>
    %c0_72 = arith.constant 0 : index
    %c0_73 = arith.constant 0 : index
    %135 = vector.load %arg2[%c0_72, %c0_73] : memref<128x512xf32, #tpu.memory_space<vmem>>, vector<128x512xf32>
    %cst_74 = arith.constant dense<0.000000e+00> : vector<2x512xf32>
    %136 = tpu.matmul %134, %135, %cst_74 {dimension_numbers = #tpu.dot_dimension_numbers<[1], [0], [0], [1], [0, 0, 1, 1], [], []>} : vector<2x128xf32>, vector<128x512xf32>, vector<2x512xf32> -> vector<2x512xf32>
    %137 = vector.broadcast %0 : vector<1x512xf32> to vector<2x512xf32>
    %138 = arith.addf %136, %137 : vector<2x512xf32>
    %c6_75 = arith.constant 6 : index
    %c0_76 = arith.constant 0 : index
    %c0_77 = arith.constant 0 : index
    %139 = vector.load %arg12[%c6_75, %c0_76, %c0_77] : memref<8x2x512xf32, #tpu.memory_space<vmem>>, vector<1x2x512xf32>
    %140 = vector.shape_cast %139 : vector<1x2x512xf32> to vector<2x512xf32>
    %141 = vector.shape_cast %138 : vector<2x512xf32> to vector<1x2x512xf32>
    tpu.vector_store %arg12[%c6_75, %c0_76, %c0_77], %141 {strides = array<i32>} : memref<8x2x512xf32, #tpu.memory_space<vmem>>, vector<1x2x512xf32>,
    %c7 = arith.constant 7 : index
    %c0_78 = arith.constant 0 : index
    %c0_79 = arith.constant 0 : index
    %142 = vector.load %arg0[%c7, %c0_78, %c0_79] : memref<8x2x1xi32, #tpu.memory_space<vmem>>, vector<1x2x1xi32>
    %143 = vector.shape_cast %142 : vector<1x2x1xi32> to vector<2x1xi32>
    %144 = vector.broadcast %143 : vector<2x1xi32> to vector<2x128xi32>
    %145 = arith.cmpi eq, %1, %144 : vector<2x128xi32>
    %146 = arith.extui %145 : vector<2x128xi1> to vector<2x128xi32>
    %147 = arith.sitofp %146 : vector<2x128xi32> to vector<2x128xf32>
    %c7_80 = arith.constant 7 : index
    %c0_81 = arith.constant 0 : index
    %c0_82 = arith.constant 0 : index
    %148 = vector.load %arg1[%c7_80, %c0_81, %c0_82] : memref<8x2x1xi32, #tpu.memory_space<vmem>>, vector<1x2x1xi32>
    %149 = vector.shape_cast %148 : vector<1x2x1xi32> to vector<2x1xi32>
    %150 = vector.broadcast %149 : vector<2x1xi32> to vector<2x128xi32>
    %151 = arith.cmpi eq, %1, %150 : vector<2x128xi32>
    %152 = arith.extui %151 : vector<2x128xi1> to vector<2x128xi32>
    %153 = arith.sitofp %152 : vector<2x128xi32> to vector<2x128xf32>
    %154 = arith.addf %147, %153 : vector<2x128xf32>
    %c0_83 = arith.constant 0 : index
    %c0_84 = arith.constant 0 : index
    %155 = vector.load %arg2[%c0_83, %c0_84] : memref<128x512xf32, #tpu.memory_space<vmem>>, vector<128x512xf32>
    %cst_85 = arith.constant dense<0.000000e+00> : vector<2x512xf32>
    %156 = tpu.matmul %154, %155, %cst_85 {dimension_numbers = #tpu.dot_dimension_numbers<[1], [0], [0], [1], [0, 0, 1, 1], [], []>} : vector<2x128xf32>, vector<128x512xf32>, vector<2x512xf32> -> vector<2x512xf32>
    %157 = vector.broadcast %0 : vector<1x512xf32> to vector<2x512xf32>
    %158 = arith.addf %156, %157 : vector<2x512xf32>
    %c7_86 = arith.constant 7 : index
    %c0_87 = arith.constant 0 : index
    %c0_88 = arith.constant 0 : index
    %159 = vector.load %arg12[%c7_86, %c0_87, %c0_88] : memref<8x2x512xf32, #tpu.memory_space<vmem>>, vector<1x2x512xf32>
    %160 = vector.shape_cast %159 : vector<1x2x512xf32> to vector<2x512xf32>
    %161 = vector.shape_cast %158 : vector<2x512xf32> to vector<1x2x512xf32>
    tpu.vector_store %arg12[%c7_86, %c0_87, %c0_88], %161 {strides = array<i32>} : memref<8x2x512xf32, #tpu.memory_space<vmem>>, vector<1x2x512xf32>,
    %c0_89 = arith.constant 0 : index
    %c0_90 = arith.constant 0 : index
    %162 = vector.load %arg4[%c0_89, %c0_90] : memref<128x512xf32, #tpu.memory_space<vmem>>, vector<128x512xf32>
    %c0_91 = arith.constant 0 : index
    %c0_92 = arith.constant 0 : index
    %163 = vector.load %arg7[%c0_91, %c0_92] : memref<128x256xf32, #tpu.memory_space<vmem>>, vector<128x256xf32>
    %c0_93 = arith.constant 0 : index
    %c0_94 = arith.constant 0 : index
    %164 = vector.load %arg8[%c0_93, %c0_94] : memref<1x256xf32, #tpu.memory_space<vmem>>, vector<1x256xf32>
    %c0_95 = arith.constant 0 : index
    %c0_96 = arith.constant 0 : index
    %165 = vector.load %arg5[%c0_95, %c0_96] : memref<2x128xf32, #tpu.memory_space<vmem>>, vector<2x128xf32>
    %c0_97 = arith.constant 0 : index
    %c0_98 = arith.constant 0 : index
    %166 = vector.load %arg6[%c0_97, %c0_98] : memref<2x128xf32, #tpu.memory_space<vmem>>, vector<2x128xf32>
    %167 = tpu.iota {dimensions = array<i32: 1>} : vector<2x128xi32>
    %c64_i32 = arith.constant 64 : i32
    %168 = vector.broadcast %c64_i32 : i32 to vector<2x128xi32>
    %169 = arith.cmpi slt, %167, %168 : vector<2x128xi32>
    %c0_99 = arith.constant 0 : index
    %c0_100 = arith.constant 0 : index
    %c0_101 = arith.constant 0 : index
    %170 = vector.load %arg12[%c0_99, %c0_100, %c0_101] : memref<8x2x512xf32, #tpu.memory_space<vmem>>, vector<1x2x512xf32>
    %171 = vector.shape_cast %170 : vector<1x2x512xf32> to vector<2x512xf32>
    %cst_102 = arith.constant dense<0.000000e+00> : vector<2x512xf32>
    %172 = tpu.matmul %165, %162, %cst_102 {dimension_numbers = #tpu.dot_dimension_numbers<[1], [0], [0], [1], [0, 0, 1, 1], [], []>} : vector<2x128xf32>, vector<128x512xf32>, vector<2x512xf32> -> vector<2x512xf32>
    %173 = arith.addf %172, %171 : vector<2x512xf32>
    %174 = vector.extract_strided_slice %173 {offsets = [0, 0], sizes = [2, 384], strides = [1, 1]} : vector<2x512xf32> to vector<2x384xf32>
    %175 = arith.negf %174 : vector<2x384xf32>
    %176 = math.exp %175 : vector<2x384xf32>
    %cst_103 = arith.constant 1.000000e+00 : f32
    %177 = vector.broadcast %cst_103 : f32 to vector<2x384xf32>
    %178 = arith.addf %177, %176 : vector<2x384xf32>
    %179 = arith.divf %177, %178 : vector<2x384xf32>
    %180 = vector.extract_strided_slice %173 {offsets = [0, 384], sizes = [2, 128], strides = [1, 1]} : vector<2x512xf32> to vector<2x128xf32>
    %181 = math.tanh %180 : vector<2x128xf32>
    %182 = vector.extract_strided_slice %179 {offsets = [0, 128], sizes = [2, 128], strides = [1, 1]} : vector<2x384xf32> to vector<2x128xf32>
    %183 = arith.mulf %182, %166 : vector<2x128xf32>
    %184 = vector.extract_strided_slice %179 {offsets = [0, 0], sizes = [2, 128], strides = [1, 1]} : vector<2x384xf32> to vector<2x128xf32>
    %185 = arith.mulf %184, %181 : vector<2x128xf32>
    %186 = arith.addf %183, %185 : vector<2x128xf32>
    %187 = vector.extract_strided_slice %179 {offsets = [0, 256], sizes = [2, 128], strides = [1, 1]} : vector<2x384xf32> to vector<2x128xf32>
    %188 = math.tanh %186 : vector<2x128xf32>
    %189 = arith.mulf %187, %188 : vector<2x128xf32>
    %190 = arith.select %169, %186, %166 : vector<2x128xi1>, vector<2x128xf32>
    %191 = arith.select %169, %189, %165 : vector<2x128xi1>, vector<2x128xf32>
    %c1_104 = arith.constant 1 : index
    %c0_105 = arith.constant 0 : index
    %c0_106 = arith.constant 0 : index
    %192 = vector.load %arg12[%c1_104, %c0_105, %c0_106] : memref<8x2x512xf32, #tpu.memory_space<vmem>>, vector<1x2x512xf32>
    %193 = vector.shape_cast %192 : vector<1x2x512xf32> to vector<2x512xf32>
    %cst_107 = arith.constant dense<0.000000e+00> : vector<2x512xf32>
    %194 = tpu.matmul %191, %162, %cst_107 {dimension_numbers = #tpu.dot_dimension_numbers<[1], [0], [0], [1], [0, 0, 1, 1], [], []>} : vector<2x128xf32>, vector<128x512xf32>, vector<2x512xf32> -> vector<2x512xf32>
    %195 = arith.addf %194, %193 : vector<2x512xf32>
    %196 = vector.extract_strided_slice %195 {offsets = [0, 0], sizes = [2, 384], strides = [1, 1]} : vector<2x512xf32> to vector<2x384xf32>
    %197 = arith.negf %196 : vector<2x384xf32>
    %198 = math.exp %197 : vector<2x384xf32>
    %cst_108 = arith.constant 1.000000e+00 : f32
    %199 = vector.broadcast %cst_108 : f32 to vector<2x384xf32>
    %200 = arith.addf %199, %198 : vector<2x384xf32>
    %201 = arith.divf %199, %200 : vector<2x384xf32>
    %202 = vector.extract_strided_slice %195 {offsets = [0, 384], sizes = [2, 128], strides = [1, 1]} : vector<2x512xf32> to vector<2x128xf32>
    %203 = math.tanh %202 : vector<2x128xf32>
    %204 = vector.extract_strided_slice %201 {offsets = [0, 128], sizes = [2, 128], strides = [1, 1]} : vector<2x384xf32> to vector<2x128xf32>
    %205 = arith.mulf %204, %190 : vector<2x128xf32>
    %206 = vector.extract_strided_slice %201 {offsets = [0, 0], sizes = [2, 128], strides = [1, 1]} : vector<2x384xf32> to vector<2x128xf32>
    %207 = arith.mulf %206, %203 : vector<2x128xf32>
    %208 = arith.addf %205, %207 : vector<2x128xf32>
    %209 = vector.extract_strided_slice %201 {offsets = [0, 256], sizes = [2, 128], strides = [1, 1]} : vector<2x384xf32> to vector<2x128xf32>
    %210 = math.tanh %208 : vector<2x128xf32>
    %211 = arith.mulf %209, %210 : vector<2x128xf32>
    %cst_109 = arith.constant dense<0.000000e+00> : vector<2x256xf32>
    %212 = tpu.matmul %211, %163, %cst_109 {dimension_numbers = #tpu.dot_dimension_numbers<[1], [0], [0], [1], [0, 0, 1, 1], [], []>} : vector<2x128xf32>, vector<128x256xf32>, vector<2x256xf32> -> vector<2x256xf32>
    %213 = vector.broadcast %164 : vector<1x256xf32> to vector<2x256xf32>
    %214 = arith.addf %212, %213 : vector<2x256xf32>
    %c0_110 = arith.constant 0 : index
    %c0_111 = arith.constant 0 : index
    %c0_112 = arith.constant 0 : index
    %215 = vector.load %arg9[%c0_110, %c0_111, %c0_112] : memref<8x2x256xf32, #tpu.memory_space<vmem>>, vector<1x2x256xf32>
    %216 = vector.shape_cast %215 : vector<1x2x256xf32> to vector<2x256xf32>
    %217 = vector.shape_cast %214 : vector<2x256xf32> to vector<1x2x256xf32>
    tpu.vector_store %arg9[%c0_110, %c0_111, %c0_112], %217 {strides = array<i32>} : memref<8x2x256xf32, #tpu.memory_space<vmem>>, vector<1x2x256xf32>,
    %c2_113 = arith.constant 2 : index
    %c0_114 = arith.constant 0 : index
    %c0_115 = arith.constant 0 : index
    %218 = vector.load %arg12[%c2_113, %c0_114, %c0_115] : memref<8x2x512xf32, #tpu.memory_space<vmem>>, vector<1x2x512xf32>
    %219 = vector.shape_cast %218 : vector<1x2x512xf32> to vector<2x512xf32>
    %cst_116 = arith.constant dense<0.000000e+00> : vector<2x512xf32>
    %220 = tpu.matmul %211, %162, %cst_116 {dimension_numbers = #tpu.dot_dimension_numbers<[1], [0], [0], [1], [0, 0, 1, 1], [], []>} : vector<2x128xf32>, vector<128x512xf32>, vector<2x512xf32> -> vector<2x512xf32>
    %221 = arith.addf %220, %219 : vector<2x512xf32>
    %222 = vector.extract_strided_slice %221 {offsets = [0, 0], sizes = [2, 384], strides = [1, 1]} : vector<2x512xf32> to vector<2x384xf32>
    %223 = arith.negf %222 : vector<2x384xf32>
    %224 = math.exp %223 : vector<2x384xf32>
    %cst_117 = arith.constant 1.000000e+00 : f32
    %225 = vector.broadcast %cst_117 : f32 to vector<2x384xf32>
    %226 = arith.addf %225, %224 : vector<2x384xf32>
    %227 = arith.divf %225, %226 : vector<2x384xf32>
    %228 = vector.extract_strided_slice %221 {offsets = [0, 384], sizes = [2, 128], strides = [1, 1]} : vector<2x512xf32> to vector<2x128xf32>
    %229 = math.tanh %228 : vector<2x128xf32>
    %230 = vector.extract_strided_slice %227 {offsets = [0, 128], sizes = [2, 128], strides = [1, 1]} : vector<2x384xf32> to vector<2x128xf32>
    %231 = arith.mulf %230, %208 : vector<2x128xf32>
    %232 = vector.extract_strided_slice %227 {offsets = [0, 0], sizes = [2, 128], strides = [1, 1]} : vector<2x384xf32> to vector<2x128xf32>
    %233 = arith.mulf %232, %229 : vector<2x128xf32>
    %234 = arith.addf %231, %233 : vector<2x128xf32>
    %235 = vector.extract_strided_slice %227 {offsets = [0, 256], sizes = [2, 128], strides = [1, 1]} : vector<2x384xf32> to vector<2x128xf32>
    %236 = math.tanh %234 : vector<2x128xf32>
    %237 = arith.mulf %235, %236 : vector<2x128xf32>
    %cst_118 = arith.constant dense<0.000000e+00> : vector<2x256xf32>
    %238 = tpu.matmul %237, %163, %cst_118 {dimension_numbers = #tpu.dot_dimension_numbers<[1], [0], [0], [1], [0, 0, 1, 1], [], []>} : vector<2x128xf32>, vector<128x256xf32>, vector<2x256xf32> -> vector<2x256xf32>
    %239 = vector.broadcast %164 : vector<1x256xf32> to vector<2x256xf32>
    %240 = arith.addf %238, %239 : vector<2x256xf32>
    %c1_119 = arith.constant 1 : index
    %c0_120 = arith.constant 0 : index
    %c0_121 = arith.constant 0 : index
    %241 = vector.load %arg9[%c1_119, %c0_120, %c0_121] : memref<8x2x256xf32, #tpu.memory_space<vmem>>, vector<1x2x256xf32>
    %242 = vector.shape_cast %241 : vector<1x2x256xf32> to vector<2x256xf32>
    %243 = vector.shape_cast %240 : vector<2x256xf32> to vector<1x2x256xf32>
    tpu.vector_store %arg9[%c1_119, %c0_120, %c0_121], %243 {strides = array<i32>} : memref<8x2x256xf32, #tpu.memory_space<vmem>>, vector<1x2x256xf32>,
    %c3_122 = arith.constant 3 : index
    %c0_123 = arith.constant 0 : index
    %c0_124 = arith.constant 0 : index
    %244 = vector.load %arg12[%c3_122, %c0_123, %c0_124] : memref<8x2x512xf32, #tpu.memory_space<vmem>>, vector<1x2x512xf32>
    %245 = vector.shape_cast %244 : vector<1x2x512xf32> to vector<2x512xf32>
    %cst_125 = arith.constant dense<0.000000e+00> : vector<2x512xf32>
    %246 = tpu.matmul %237, %162, %cst_125 {dimension_numbers = #tpu.dot_dimension_numbers<[1], [0], [0], [1], [0, 0, 1, 1], [], []>} : vector<2x128xf32>, vector<128x512xf32>, vector<2x512xf32> -> vector<2x512xf32>
    %247 = arith.addf %246, %245 : vector<2x512xf32>
    %248 = vector.extract_strided_slice %247 {offsets = [0, 0], sizes = [2, 384], strides = [1, 1]} : vector<2x512xf32> to vector<2x384xf32>
    %249 = arith.negf %248 : vector<2x384xf32>
    %250 = math.exp %249 : vector<2x384xf32>
    %cst_126 = arith.constant 1.000000e+00 : f32
    %251 = vector.broadcast %cst_126 : f32 to vector<2x384xf32>
    %252 = arith.addf %251, %250 : vector<2x384xf32>
    %253 = arith.divf %251, %252 : vector<2x384xf32>
    %254 = vector.extract_strided_slice %247 {offsets = [0, 384], sizes = [2, 128], strides = [1, 1]} : vector<2x512xf32> to vector<2x128xf32>
    %255 = math.tanh %254 : vector<2x128xf32>
    %256 = vector.extract_strided_slice %253 {offsets = [0, 128], sizes = [2, 128], strides = [1, 1]} : vector<2x384xf32> to vector<2x128xf32>
    %257 = arith.mulf %256, %234 : vector<2x128xf32>
    %258 = vector.extract_strided_slice %253 {offsets = [0, 0], sizes = [2, 128], strides = [1, 1]} : vector<2x384xf32> to vector<2x128xf32>
    %259 = arith.mulf %258, %255 : vector<2x128xf32>
    %260 = arith.addf %257, %259 : vector<2x128xf32>
    %261 = vector.extract_strided_slice %253 {offsets = [0, 256], sizes = [2, 128], strides = [1, 1]} : vector<2x384xf32> to vector<2x128xf32>
    %262 = math.tanh %260 : vector<2x128xf32>
    %263 = arith.mulf %261, %262 : vector<2x128xf32>
    %cst_127 = arith.constant dense<0.000000e+00> : vector<2x256xf32>
    %264 = tpu.matmul %263, %163, %cst_127 {dimension_numbers = #tpu.dot_dimension_numbers<[1], [0], [0], [1], [0, 0, 1, 1], [], []>} : vector<2x128xf32>, vector<128x256xf32>, vector<2x256xf32> -> vector<2x256xf32>
    %265 = vector.broadcast %164 : vector<1x256xf32> to vector<2x256xf32>
    %266 = arith.addf %264, %265 : vector<2x256xf32>
    %c2_128 = arith.constant 2 : index
    %c0_129 = arith.constant 0 : index
    %c0_130 = arith.constant 0 : index
    %267 = vector.load %arg9[%c2_128, %c0_129, %c0_130] : memref<8x2x256xf32, #tpu.memory_space<vmem>>, vector<1x2x256xf32>
    %268 = vector.shape_cast %267 : vector<1x2x256xf32> to vector<2x256xf32>
    %269 = vector.shape_cast %266 : vector<2x256xf32> to vector<1x2x256xf32>
    tpu.vector_store %arg9[%c2_128, %c0_129, %c0_130], %269 {strides = array<i32>} : memref<8x2x256xf32, #tpu.memory_space<vmem>>, vector<1x2x256xf32>,
    %c4_131 = arith.constant 4 : index
    %c0_132 = arith.constant 0 : index
    %c0_133 = arith.constant 0 : index
    %270 = vector.load %arg12[%c4_131, %c0_132, %c0_133] : memref<8x2x512xf32, #tpu.memory_space<vmem>>, vector<1x2x512xf32>
    %271 = vector.shape_cast %270 : vector<1x2x512xf32> to vector<2x512xf32>
    %cst_134 = arith.constant dense<0.000000e+00> : vector<2x512xf32>
    %272 = tpu.matmul %263, %162, %cst_134 {dimension_numbers = #tpu.dot_dimension_numbers<[1], [0], [0], [1], [0, 0, 1, 1], [], []>} : vector<2x128xf32>, vector<128x512xf32>, vector<2x512xf32> -> vector<2x512xf32>
    %273 = arith.addf %272, %271 : vector<2x512xf32>
    %274 = vector.extract_strided_slice %273 {offsets = [0, 0], sizes = [2, 384], strides = [1, 1]} : vector<2x512xf32> to vector<2x384xf32>
    %275 = arith.negf %274 : vector<2x384xf32>
    %276 = math.exp %275 : vector<2x384xf32>
    %cst_135 = arith.constant 1.000000e+00 : f32
    %277 = vector.broadcast %cst_135 : f32 to vector<2x384xf32>
    %278 = arith.addf %277, %276 : vector<2x384xf32>
    %279 = arith.divf %277, %278 : vector<2x384xf32>
    %280 = vector.extract_strided_slice %273 {offsets = [0, 384], sizes = [2, 128], strides = [1, 1]} : vector<2x512xf32> to vector<2x128xf32>
    %281 = math.tanh %280 : vector<2x128xf32>
    %282 = vector.extract_strided_slice %279 {offsets = [0, 128], sizes = [2, 128], strides = [1, 1]} : vector<2x384xf32> to vector<2x128xf32>
    %283 = arith.mulf %282, %260 : vector<2x128xf32>
    %284 = vector.extract_strided_slice %279 {offsets = [0, 0], sizes = [2, 128], strides = [1, 1]} : vector<2x384xf32> to vector<2x128xf32>
    %285 = arith.mulf %284, %281 : vector<2x128xf32>
    %286 = arith.addf %283, %285 : vector<2x128xf32>
    %287 = vector.extract_strided_slice %279 {offsets = [0, 256], sizes = [2, 128], strides = [1, 1]} : vector<2x384xf32> to vector<2x128xf32>
    %288 = math.tanh %286 : vector<2x128xf32>
    %289 = arith.mulf %287, %288 : vector<2x128xf32>
    %cst_136 = arith.constant dense<0.000000e+00> : vector<2x256xf32>
    %290 = tpu.matmul %289, %163, %cst_136 {dimension_numbers = #tpu.dot_dimension_numbers<[1], [0], [0], [1], [0, 0, 1, 1], [], []>} : vector<2x128xf32>, vector<128x256xf32>, vector<2x256xf32> -> vector<2x256xf32>
    %291 = vector.broadcast %164 : vector<1x256xf32> to vector<2x256xf32>
    %292 = arith.addf %290, %291 : vector<2x256xf32>
    %c3_137 = arith.constant 3 : index
    %c0_138 = arith.constant 0 : index
    %c0_139 = arith.constant 0 : index
    %293 = vector.load %arg9[%c3_137, %c0_138, %c0_139] : memref<8x2x256xf32, #tpu.memory_space<vmem>>, vector<1x2x256xf32>
    %294 = vector.shape_cast %293 : vector<1x2x256xf32> to vector<2x256xf32>
    %295 = vector.shape_cast %292 : vector<2x256xf32> to vector<1x2x256xf32>
    tpu.vector_store %arg9[%c3_137, %c0_138, %c0_139], %295 {strides = array<i32>} : memref<8x2x256xf32, #tpu.memory_space<vmem>>, vector<1x2x256xf32>,
    %c5_140 = arith.constant 5 : index
    %c0_141 = arith.constant 0 : index
    %c0_142 = arith.constant 0 : index
    %296 = vector.load %arg12[%c5_140, %c0_141, %c0_142] : memref<8x2x512xf32, #tpu.memory_space<vmem>>, vector<1x2x512xf32>
    %297 = vector.shape_cast %296 : vector<1x2x512xf32> to vector<2x512xf32>
    %cst_143 = arith.constant dense<0.000000e+00> : vector<2x512xf32>
    %298 = tpu.matmul %289, %162, %cst_143 {dimension_numbers = #tpu.dot_dimension_numbers<[1], [0], [0], [1], [0, 0, 1, 1], [], []>} : vector<2x128xf32>, vector<128x512xf32>, vector<2x512xf32> -> vector<2x512xf32>
    %299 = arith.addf %298, %297 : vector<2x512xf32>
    %300 = vector.extract_strided_slice %299 {offsets = [0, 0], sizes = [2, 384], strides = [1, 1]} : vector<2x512xf32> to vector<2x384xf32>
    %301 = arith.negf %300 : vector<2x384xf32>
    %302 = math.exp %301 : vector<2x384xf32>
    %cst_144 = arith.constant 1.000000e+00 : f32
    %303 = vector.broadcast %cst_144 : f32 to vector<2x384xf32>
    %304 = arith.addf %303, %302 : vector<2x384xf32>
    %305 = arith.divf %303, %304 : vector<2x384xf32>
    %306 = vector.extract_strided_slice %299 {offsets = [0, 384], sizes = [2, 128], strides = [1, 1]} : vector<2x512xf32> to vector<2x128xf32>
    %307 = math.tanh %306 : vector<2x128xf32>
    %308 = vector.extract_strided_slice %305 {offsets = [0, 128], sizes = [2, 128], strides = [1, 1]} : vector<2x384xf32> to vector<2x128xf32>
    %309 = arith.mulf %308, %286 : vector<2x128xf32>
    %310 = vector.extract_strided_slice %305 {offsets = [0, 0], sizes = [2, 128], strides = [1, 1]} : vector<2x384xf32> to vector<2x128xf32>
    %311 = arith.mulf %310, %307 : vector<2x128xf32>
    %312 = arith.addf %309, %311 : vector<2x128xf32>
    %313 = vector.extract_strided_slice %305 {offsets = [0, 256], sizes = [2, 128], strides = [1, 1]} : vector<2x384xf32> to vector<2x128xf32>
    %314 = math.tanh %312 : vector<2x128xf32>
    %315 = arith.mulf %313, %314 : vector<2x128xf32>
    %cst_145 = arith.constant dense<0.000000e+00> : vector<2x256xf32>
    %316 = tpu.matmul %315, %163, %cst_145 {dimension_numbers = #tpu.dot_dimension_numbers<[1], [0], [0], [1], [0, 0, 1, 1], [], []>} : vector<2x128xf32>, vector<128x256xf32>, vector<2x256xf32> -> vector<2x256xf32>
    %317 = vector.broadcast %164 : vector<1x256xf32> to vector<2x256xf32>
    %318 = arith.addf %316, %317 : vector<2x256xf32>
    %c4_146 = arith.constant 4 : index
    %c0_147 = arith.constant 0 : index
    %c0_148 = arith.constant 0 : index
    %319 = vector.load %arg9[%c4_146, %c0_147, %c0_148] : memref<8x2x256xf32, #tpu.memory_space<vmem>>, vector<1x2x256xf32>
    %320 = vector.shape_cast %319 : vector<1x2x256xf32> to vector<2x256xf32>
    %321 = vector.shape_cast %318 : vector<2x256xf32> to vector<1x2x256xf32>
    tpu.vector_store %arg9[%c4_146, %c0_147, %c0_148], %321 {strides = array<i32>} : memref<8x2x256xf32, #tpu.memory_space<vmem>>, vector<1x2x256xf32>,
    %c6_149 = arith.constant 6 : index
    %c0_150 = arith.constant 0 : index
    %c0_151 = arith.constant 0 : index
    %322 = vector.load %arg12[%c6_149, %c0_150, %c0_151] : memref<8x2x512xf32, #tpu.memory_space<vmem>>, vector<1x2x512xf32>
    %323 = vector.shape_cast %322 : vector<1x2x512xf32> to vector<2x512xf32>
    %cst_152 = arith.constant dense<0.000000e+00> : vector<2x512xf32>
    %324 = tpu.matmul %315, %162, %cst_152 {dimension_numbers = #tpu.dot_dimension_numbers<[1], [0], [0], [1], [0, 0, 1, 1], [], []>} : vector<2x128xf32>, vector<128x512xf32>, vector<2x512xf32> -> vector<2x512xf32>
    %325 = arith.addf %324, %323 : vector<2x512xf32>
    %326 = vector.extract_strided_slice %325 {offsets = [0, 0], sizes = [2, 384], strides = [1, 1]} : vector<2x512xf32> to vector<2x384xf32>
    %327 = arith.negf %326 : vector<2x384xf32>
    %328 = math.exp %327 : vector<2x384xf32>
    %cst_153 = arith.constant 1.000000e+00 : f32
    %329 = vector.broadcast %cst_153 : f32 to vector<2x384xf32>
    %330 = arith.addf %329, %328 : vector<2x384xf32>
    %331 = arith.divf %329, %330 : vector<2x384xf32>
    %332 = vector.extract_strided_slice %325 {offsets = [0, 384], sizes = [2, 128], strides = [1, 1]} : vector<2x512xf32> to vector<2x128xf32>
    %333 = math.tanh %332 : vector<2x128xf32>
    %334 = vector.extract_strided_slice %331 {offsets = [0, 128], sizes = [2, 128], strides = [1, 1]} : vector<2x384xf32> to vector<2x128xf32>
    %335 = arith.mulf %334, %312 : vector<2x128xf32>
    %336 = vector.extract_strided_slice %331 {offsets = [0, 0], sizes = [2, 128], strides = [1, 1]} : vector<2x384xf32> to vector<2x128xf32>
    %337 = arith.mulf %336, %333 : vector<2x128xf32>
    %338 = arith.addf %335, %337 : vector<2x128xf32>
    %339 = vector.extract_strided_slice %331 {offsets = [0, 256], sizes = [2, 128], strides = [1, 1]} : vector<2x384xf32> to vector<2x128xf32>
    %340 = math.tanh %338 : vector<2x128xf32>
    %341 = arith.mulf %339, %340 : vector<2x128xf32>
    %cst_154 = arith.constant dense<0.000000e+00> : vector<2x256xf32>
    %342 = tpu.matmul %341, %163, %cst_154 {dimension_numbers = #tpu.dot_dimension_numbers<[1], [0], [0], [1], [0, 0, 1, 1], [], []>} : vector<2x128xf32>, vector<128x256xf32>, vector<2x256xf32> -> vector<2x256xf32>
    %343 = vector.broadcast %164 : vector<1x256xf32> to vector<2x256xf32>
    %344 = arith.addf %342, %343 : vector<2x256xf32>
    %c5_155 = arith.constant 5 : index
    %c0_156 = arith.constant 0 : index
    %c0_157 = arith.constant 0 : index
    %345 = vector.load %arg9[%c5_155, %c0_156, %c0_157] : memref<8x2x256xf32, #tpu.memory_space<vmem>>, vector<1x2x256xf32>
    %346 = vector.shape_cast %345 : vector<1x2x256xf32> to vector<2x256xf32>
    %347 = vector.shape_cast %344 : vector<2x256xf32> to vector<1x2x256xf32>
    tpu.vector_store %arg9[%c5_155, %c0_156, %c0_157], %347 {strides = array<i32>} : memref<8x2x256xf32, #tpu.memory_space<vmem>>, vector<1x2x256xf32>,
    %c7_158 = arith.constant 7 : index
    %c0_159 = arith.constant 0 : index
    %c0_160 = arith.constant 0 : index
    %348 = vector.load %arg12[%c7_158, %c0_159, %c0_160] : memref<8x2x512xf32, #tpu.memory_space<vmem>>, vector<1x2x512xf32>
    %349 = vector.shape_cast %348 : vector<1x2x512xf32> to vector<2x512xf32>
    %cst_161 = arith.constant dense<0.000000e+00> : vector<2x512xf32>
    %350 = tpu.matmul %341, %162, %cst_161 {dimension_numbers = #tpu.dot_dimension_numbers<[1], [0], [0], [1], [0, 0, 1, 1], [], []>} : vector<2x128xf32>, vector<128x512xf32>, vector<2x512xf32> -> vector<2x512xf32>
    %351 = arith.addf %350, %349 : vector<2x512xf32>
    %352 = vector.extract_strided_slice %351 {offsets = [0, 0], sizes = [2, 384], strides = [1, 1]} : vector<2x512xf32> to vector<2x384xf32>
    %353 = arith.negf %352 : vector<2x384xf32>
    %354 = math.exp %353 : vector<2x384xf32>
    %cst_162 = arith.constant 1.000000e+00 : f32
    %355 = vector.broadcast %cst_162 : f32 to vector<2x384xf32>
    %356 = arith.addf %355, %354 : vector<2x384xf32>
    %357 = arith.divf %355, %356 : vector<2x384xf32>
    %358 = vector.extract_strided_slice %351 {offsets = [0, 384], sizes = [2, 128], strides = [1, 1]} : vector<2x512xf32> to vector<2x128xf32>
    %359 = math.tanh %358 : vector<2x128xf32>
    %360 = vector.extract_strided_slice %357 {offsets = [0, 128], sizes = [2, 128], strides = [1, 1]} : vector<2x384xf32> to vector<2x128xf32>
    %361 = arith.mulf %360, %338 : vector<2x128xf32>
    %362 = vector.extract_strided_slice %357 {offsets = [0, 0], sizes = [2, 128], strides = [1, 1]} : vector<2x384xf32> to vector<2x128xf32>
    %363 = arith.mulf %362, %359 : vector<2x128xf32>
    %364 = arith.addf %361, %363 : vector<2x128xf32>
    %365 = vector.extract_strided_slice %357 {offsets = [0, 256], sizes = [2, 128], strides = [1, 1]} : vector<2x384xf32> to vector<2x128xf32>
    %366 = math.tanh %364 : vector<2x128xf32>
    %367 = arith.mulf %365, %366 : vector<2x128xf32>
    %cst_163 = arith.constant dense<0.000000e+00> : vector<2x256xf32>
    %368 = tpu.matmul %367, %163, %cst_163 {dimension_numbers = #tpu.dot_dimension_numbers<[1], [0], [0], [1], [0, 0, 1, 1], [], []>} : vector<2x128xf32>, vector<128x256xf32>, vector<2x256xf32> -> vector<2x256xf32>
    %369 = vector.broadcast %164 : vector<1x256xf32> to vector<2x256xf32>
    %370 = arith.addf %368, %369 : vector<2x256xf32>
    %c6_164 = arith.constant 6 : index
    %c0_165 = arith.constant 0 : index
    %c0_166 = arith.constant 0 : index
    %371 = vector.load %arg9[%c6_164, %c0_165, %c0_166] : memref<8x2x256xf32, #tpu.memory_space<vmem>>, vector<1x2x256xf32>
    %372 = vector.shape_cast %371 : vector<1x2x256xf32> to vector<2x256xf32>
    %373 = vector.shape_cast %370 : vector<2x256xf32> to vector<1x2x256xf32>
    tpu.vector_store %arg9[%c6_164, %c0_165, %c0_166], %373 {strides = array<i32>} : memref<8x2x256xf32, #tpu.memory_space<vmem>>, vector<1x2x256xf32>,
    %cst_167 = arith.constant dense<0.000000e+00> : vector<2x512xf32>
    %374 = tpu.matmul %367, %162, %cst_167 {dimension_numbers = #tpu.dot_dimension_numbers<[1], [0], [0], [1], [0, 0, 1, 1], [], []>} : vector<2x128xf32>, vector<128x512xf32>, vector<2x512xf32> -> vector<2x512xf32>
    %375 = vector.broadcast %0 : vector<1x512xf32> to vector<2x512xf32>
    %376 = arith.addf %374, %375 : vector<2x512xf32>
    %377 = vector.extract_strided_slice %376 {offsets = [0, 0], sizes = [2, 384], strides = [1, 1]} : vector<2x512xf32> to vector<2x384xf32>
    %378 = arith.negf %377 : vector<2x384xf32>
    %379 = math.exp %378 : vector<2x384xf32>
    %cst_168 = arith.constant 1.000000e+00 : f32
    %380 = vector.broadcast %cst_168 : f32 to vector<2x384xf32>
    %381 = arith.addf %380, %379 : vector<2x384xf32>
    %382 = arith.divf %380, %381 : vector<2x384xf32>
    %383 = vector.extract_strided_slice %376 {offsets = [0, 384], sizes = [2, 128], strides = [1, 1]} : vector<2x512xf32> to vector<2x128xf32>
    %384 = math.tanh %383 : vector<2x128xf32>
    %385 = vector.extract_strided_slice %382 {offsets = [0, 128], sizes = [2, 128], strides = [1, 1]} : vector<2x384xf32> to vector<2x128xf32>
    %386 = arith.mulf %385, %364 : vector<2x128xf32>
    %387 = vector.extract_strided_slice %382 {offsets = [0, 0], sizes = [2, 128], strides = [1, 1]} : vector<2x384xf32> to vector<2x128xf32>
    %388 = arith.mulf %387, %384 : vector<2x128xf32>
    %389 = arith.addf %386, %388 : vector<2x128xf32>
    %390 = vector.extract_strided_slice %382 {offsets = [0, 256], sizes = [2, 128], strides = [1, 1]} : vector<2x384xf32> to vector<2x128xf32>
    %391 = math.tanh %389 : vector<2x128xf32>
    %392 = arith.mulf %390, %391 : vector<2x128xf32>
    %393 = arith.select %169, %364, %389 : vector<2x128xi1>, vector<2x128xf32>
    %394 = arith.select %169, %367, %392 : vector<2x128xi1>, vector<2x128xf32>
    %cst_169 = arith.constant dense<0.000000e+00> : vector<2x256xf32>
    %395 = tpu.matmul %394, %163, %cst_169 {dimension_numbers = #tpu.dot_dimension_numbers<[1], [0], [0], [1], [0, 0, 1, 1], [], []>} : vector<2x128xf32>, vector<128x256xf32>, vector<2x256xf32> -> vector<2x256xf32>
    %396 = vector.broadcast %164 : vector<1x256xf32> to vector<2x256xf32>
    %397 = arith.addf %395, %396 : vector<2x256xf32>
    %c7_170 = arith.constant 7 : index
    %c0_171 = arith.constant 0 : index
    %c0_172 = arith.constant 0 : index
    %398 = vector.load %arg9[%c7_170, %c0_171, %c0_172] : memref<8x2x256xf32, #tpu.memory_space<vmem>>, vector<1x2x256xf32>
    %399 = vector.shape_cast %398 : vector<1x2x256xf32> to vector<2x256xf32>
    %400 = vector.shape_cast %397 : vector<2x256xf32> to vector<1x2x256xf32>
    tpu.vector_store %arg9[%c7_170, %c0_171, %c0_172], %400 {strides = array<i32>} : memref<8x2x256xf32, #tpu.memory_space<vmem>>, vector<1x2x256xf32>,
    %c0_173 = arith.constant 0 : index
    %c0_174 = arith.constant 0 : index
    %401 = vector.load %arg10[%c0_173, %c0_174] : memref<2x128xf32, #tpu.memory_space<vmem>>, vector<2x128xf32>
    tpu.vector_store %arg10[%c0_173, %c0_174], %394 {strides = array<i32>} : memref<2x128xf32, #tpu.memory_space<vmem>>, vector<2x128xf32>,
    %c0_175 = arith.constant 0 : index
    %c0_176 = arith.constant 0 : index
    %402 = vector.load %arg11[%c0_175, %c0_176] : memref<2x128xf32, #tpu.memory_space<vmem>>, vector<2x128xf32>
    tpu.vector_store %arg11[%c0_175, %c0_176], %393 {strides = array<i32>} : memref<2x128xf32, #tpu.memory_space<vmem>>, vector<2x128xf32>,
    return
  }
}

</mosaic_0001>

<bundles_post_ra>
// kernel: forward.1
= control target key start
LH: loop header
LB: loop body
LE: loop exit
PB: predicated region body
PF: predicated region fallthrough
CT: control target
= control target key end

     0   :  { %17 = vsyncpa [#allocation4], 0  ;;  %s7633_s0 = inlined_call_operand.vmem [shape: s32[8,2,1], index: 0, kind: input, shape index: {}]   ;;  %s7634_s1 = inlined_call_operand.vmem [shape: s32[8,2,1], index: 1, kind: input, shape index: {}]   ;;  %s7635_s2 = inlined_call_operand.hbm [shape: f32[128,512], index: 2, kind: input, shape index: {}]   ;;  %s7636_s3 = inlined_call_operand.vmem [shape: f32[1,512], index: 3, kind: input, shape index: {}]   ;;  %s7637_s4 = inlined_call_operand.hbm [shape: f32[128,512], index: 4, kind: input, shape index: {}]   ;;  %s7638_s5 = inlined_call_operand.vmem [shape: f32[2,128], index: 5, kind: input, shape index: {}]   ;;  %s7639_s6 = inlined_call_operand.vmem [shape: f32[2,128], index: 6, kind: input, shape index: {}]   ;;  %s7640_s7 = inlined_call_operand.hbm [shape: f32[128,256], index: 7, kind: input, shape index: {}]   ;;  %s7641_s8 = inlined_call_operand.vmem [shape: f32[1,256], index: 8, kind: input, shape index: {}]   ;;  %s7642_s9 = inlined_call_operand.vmem [shape: f32[8,2,256], index: 9, kind: output, shape index: {0}]   ;;  %s7643_s10 = inlined_call_operand.vmem [shape: f32[2,128], index: 10, kind: output, shape index: {1}]   ;;  %s7644_s11 = inlined_call_operand.vmem [shape: f32[2,128], index: 11, kind: output, shape index: {2}]  }
   0x1   :  { %18 = vsyncpa [#allocation6], 0  ;;  %s6203_s17 = smov [#allocation5]   ;;  %s6204_s19 = smov [#allocation3]  }
   0x2   :  { %s42_s18 = sshll.u32 %s6203_s17, 4  ;;  %s28_s20 = sshll.u32 %s6204_s19, 4  ;;  %s43_s18 = int_to_ptr.vmem [resolvable:$true] %s42_s18  ;;  %s6273_s20 = int_to_ptr.vmem [resolvable:$true] %s28_s20 }
   0x3   :  { %s6133_s23 = scalar_lea.hbm %s7637_s4, 8192 }
   0x4   :  { %p6134_p0 = scmp.ne.s32.totalorder %s7637_s4, %s6133_s23  ;;  %p6137_p1 = scmp.lt.u32.totalorder %s6133_s23, %s7637_s4 }
   0x6   :  { %p6139_p2 = pnand %p6137_p1, %p6134_p0 }
   0x8   :  { %6142 = shalt.err (!%p6139_p2)
}
   0x9   :  { %s6143_s28 = scalar_lea.vmem %s43_s18, 8192  ;;  %p6148_p4 = scmp.lt.s32.totalorder %s43_s18, %s43_s18 }
   0xa   :  { %p6144_p3 = scmp.ne.s32.totalorder %s43_s18, %s6143_s28  ;;  %p6149_p5 = scmp.lt.s32.totalorder %s6143_s28, %s6143_s28 }
   0xc   :  { %p6150_p6 = por %p6149_p5, %p6148_p4 }
   0xe   :  { %p6151_p7 = pnand %p6150_p6, %p6144_p3 }
  0x10   :  { %6154 = shalt.err (!%p6151_p7)
}
  0x11   :  { %s6205_s29 = smov 512   ;;  %s6206_s30 = smov 32  }
  0x12   :  { %48 = dma.hbm_to_vmem [thread:$0]  %s7637_s4, 8192, %s43_s18, [#allocation6], %s6205_s29, %s6205_s29, %s6206_s30  }
  0x13   :  { %s6155_s16 = scalar_lea.hbm %s7635_s2, 8192 }
  0x14   :  { %p6156_p8 = scmp.ne.s32.totalorder %s7635_s2, %s6155_s16  ;;  %p6159_p9 = scmp.lt.u32.totalorder %s6155_s16, %s7635_s2 }
  0x16   :  { %p6161_p10 = pnand %p6159_p9, %p6156_p8 }
  0x18   :  { %6164 = shalt.err (!%p6161_p10)
}
  0x19   :  { %s6165_s23 = scalar_lea.vmem %s6273_s20, 8192  ;;  %p6170_p12 = scmp.lt.s32.totalorder %s6273_s20, %s6273_s20 }
  0x1a   :  { %p6166_p11 = scmp.ne.s32.totalorder %s6273_s20, %s6165_s23  ;;  %p6171_p13 = scmp.lt.s32.totalorder %s6165_s23, %s6165_s23 }
  0x1c   :  { %p6172_p0 = por %p6171_p13, %p6170_p12 }
  0x1e   :  { %p6173_p1 = pnand %p6172_p0, %p6166_p11 }
  0x20   :  { %6176 = shalt.err (!%p6173_p1)
}
  0x21   :  { %34 = dma.hbm_to_vmem [thread:$0]  %s7635_s2, 8192, %s6273_s20, [#allocation4], %s6205_s29, %s6205_s29, %s6206_s30  }
  0x22   :  { %s6207_s24 = smov [#allocation7]   ;;  %s6177_s28 = scalar_lea.hbm %s7640_s7, 4096 }
  0x23   :  { %s58_s25 = sshll.u32 %s6207_s24, 4  ;;  %p6178_p2 = scmp.ne.s32.totalorder %s7640_s7, %s6177_s28  ;;  %s59_s25 = int_to_ptr.vmem [resolvable:$true] %s58_s25 }
  0x24   :  { %p6181_p3 = scmp.lt.u32.totalorder %s6177_s28, %s7640_s7 }
  0x26   :  { %p6183_p4 = pnand %p6181_p3, %p6178_p2 }
  0x28   :  { %6186 = shalt.err (!%p6183_p4)
}
  0x29   :  { %s6187_s16 = scalar_lea.vmem %s59_s25, 4096  ;;  %p6192_p6 = scmp.lt.s32.totalorder %s59_s25, %s59_s25 }
  0x2a   :  { %p6188_p5 = scmp.ne.s32.totalorder %s59_s25, %s6187_s16  ;;  %p6193_p7 = scmp.lt.s32.totalorder %s6187_s16, %s6187_s16 }
  0x2c   :  { %p6194_p8 = por %p6193_p7, %p6192_p6 }
  0x2e   :  { %p6195_p9 = pnand %p6194_p8, %p6188_p5 }
  0x30   :  { %6198 = shalt.err (!%p6195_p9)
}
  0x31   :  { %s6208_s2 = smov 256   ;;  %s6209_s20 = smov 16  }
  0x32   :  { %64 = dma.hbm_to_vmem [thread:$0]  %s7640_s7, 4096, %s59_s25, [#allocation6], %s6208_s2, %s6208_s2, %s6209_s20  }
  0x33   :  { %6199 = dma.done.wait [#allocation4], 8192  }
  0x34   :  { %6200 = vsyncadd [#allocation4], 4294959104 }
  0x35   :  { %6201 = dma.done.wait [#allocation6], 12288  }
  0x36   :  { %6202 = vsyncadd [#allocation6], 4294955008  ;;  %v6210_v0 = vmov 0   ;;  %v7647_v1 = vmov 0.0   ;;  %v4555_v2 = vld [vmem:[%s7633_s0 + $0x2] sm:$0x3] }
  0x37   :  { %5988 = vset.pattern.permute.xlu1 %v6210_v0  ;;  %5987 = vset.pattern.permute.xlu0 %v6210_v0  ;;  %v79_v3 = vld [vmem:[%s7633_s0] sm:$0x3]  ;;  %v4557_v4 = vld [vmem:[%s7634_s1 + $0x2] sm:$0x3]  ;;  %v4561_v6 = vld [vmem:[%s7634_s1 + $0x4] sm:$0x3] }
  0x38   :  { %243 = vmatprep.mubr.f32.mxu0 %v7647_v1  ;;  %314 = vmatprep.mubr.f32.mxu1 %v7647_v1  ;;  %v86_v5 = vld [vmem:[%s7634_s1] sm:$0x3]  ;;  %v4559_v7 = vld [vmem:[%s7633_s0 + $0x4] sm:$0x3]  ;;  %v95_v8 = vld [vmem:[#allocation3 + $0x8] sm:$0xff] }
  0x39   :  { %347 = vperm.xlu1 %5988, %v4555_v2   ;;  %81 = vperm.xlu0 %5987, %v79_v3   ;;  %v99_v9 = vld [vmem:[#allocation3 + $0x28] sm:$0xff]  ;;  %v97_v11 = vld [vmem:[#allocation3 + $0x18] sm:$0xff]  ;;  %v94_v13 = vld [vmem:[#allocation3] sm:$0xff] }
  0x3a   :  { %v6336_v10 = vpack.c.bf16 %v99_v9, %v95_v8  ;;  %v101_v12 = vld [vmem:[#allocation3 + $0x38] sm:$0xff]  ;;  %v98_v15 = vld [vmem:[#allocation3 + $0x20] sm:$0xff]  ;;  %v96_v16 = vld [vmem:[#allocation3 + $0x10] sm:$0xff] }
  0x3b   :  { %v6338_v14 = vpack.c.bf16 %v101_v12, %v97_v11  ;;  %v100_v17 = vld [vmem:[#allocation3 + $0x30] sm:$0xff]  ;;  %v4565_v18 = vld [vmem:[%s7634_s1 + $0x6] sm:$0x3]  ;;  %v6347_v20 = vpack.c.bf16 %v98_v15, %v94_v13  ;;  %v103_v22 = vld [vmem:[#allocation3 + $0x48] sm:$0xff] }
  0x3c   :  { %v4563_v19 = vld [vmem:[%s7633_s0 + $0x6] sm:$0x3]  ;;  %4634 = vmatprep.subr.bf16.mxu0 %v6336_v10  ;;  %v6349_v21 = vpack.c.bf16 %v100_v17, %v96_v16  ;;  %v107_v23 = vld [vmem:[#allocation3 + $0x68] sm:$0xff]  ;;  %v105_v24 = vld [vmem:[#allocation3 + $0x58] sm:$0xff] }
  0x3d   :  { %355 = vperm.xlu1 %5988, %v4557_v4   ;;  %88 = vperm.xlu0 %5987, %v86_v5   ;;  %v6351_v25 = vpack.c.bf16 %v107_v23, %v103_v22  ;;  %v109_v26 = vld [vmem:[#allocation3 + $0x78] sm:$0xff]  ;;  %v102_v27 = vld [vmem:[#allocation3 + $0x40] sm:$0xff]  ;;  %v104_v31 = vld [vmem:[#allocation3 + $0x50] sm:$0xff] }
  0x3e   :  { %v106_v28 = vld [vmem:[#allocation3 + $0x60] sm:$0xff]  ;;  %4666 = vmatprep.subr.bf16.mxu1 %v6338_v14  ;;  %4636 = vmatpush1.bf16.msra.mxu0 %v6347_v20  ;;  %v6355_v29 = vpack.c.bf16 %v109_v26, %v105_v24  ;;  %v108_v32 = vld [vmem:[#allocation3 + $0x70] sm:$0xff]  ;;  %v111_v33 = vld [vmem:[#allocation3 + $0x88] sm:$0xff] }
  0x3f   :  { %v6357_v30 = vpack.c.bf16 %v106_v28, %v102_v27  ;;  %4668 = vmatpush1.bf16.msra.mxu1 %v6349_v21  ;;  %4638 = vmatprep.subr.bf16.mxu0 %v6351_v25  ;;  %v6361_v34 = vpack.c.bf16 %v108_v32, %v104_v31  ;;  %v115_v35 = vld [vmem:[#allocation3 + $0xa8] sm:$0xff]  ;;  %v113_v36 = vld [vmem:[#allocation3 + $0x98] sm:$0xff]  ;;  %v110_v41 = vld [vmem:[#allocation3 + $0x80] sm:$0xff] }
  0x40   :  { %v117_v37 = vld [vmem:[#allocation3 + $0xb8] sm:$0xff]  ;;  %v4569_v38 = vld [vmem:[%s7634_s1 + $0x8] sm:$0x3]  ;;  %4670 = vmatprep.subr.bf16.mxu1 %v6355_v29  ;;  %v6367_v39 = vpack.c.bf16 %v115_v35, %v111_v33  ;;  %v114_v42 = vld [vmem:[#allocation3 + $0xa0] sm:$0xff] }
  0x41   :  { %602 = vperm.xlu1 %5988, %v4561_v6   ;;  %594 = vperm.xlu0 %5987, %v4559_v7   ;;  %v6369_v40 = vpack.c.bf16 %v117_v37, %v113_v36  ;;  %v112_v43 = vld [vmem:[#allocation3 + $0x90] sm:$0xff]  ;;  %v119_v45 = vld [vmem:[#allocation3 + $0xc8] sm:$0xff]  ;;  %v6375_v48 = vpack.c.bf16 %v114_v42, %v110_v41  ;;  %v121_v49 = vld [vmem:[#allocation3 + $0xd8] sm:$0xff] }
  0x42   :  { %v116_v44 = vld [vmem:[#allocation3 + $0xb0] sm:$0xff]  ;;  %v123_v46 = vld [vmem:[#allocation3 + $0xe8] sm:$0xff]  ;;  %4640 = vmatpush1.bf16.msra.mxu0 %v6357_v30  ;;  %v125_v50 = vld [vmem:[#allocation3 + $0xf8] sm:$0xff] }
  0x43   :  { %v4567_v47 = vld [vmem:[%s7633_s0 + $0x8] sm:$0x3]  ;;  %4672 = vmatpush1.bf16.msra.mxu1 %v6361_v34  ;;  %4642 = vmatprep.subr.bf16.mxu0 %v6367_v39  ;;  %v6379_v51 = vpack.c.bf16 %v116_v44, %v112_v43  ;;  %v6381_v52 = vpack.c.bf16 %v123_v46, %v119_v45  ;;  %v118_v53 = vld [vmem:[#allocation3 + $0xc0] sm:$0xff]  ;;  %v120_v55 = vld [vmem:[#allocation3 + $0xd0] sm:$0xff]  ;;  %v6384_v56 = vpack.c.bf16 %v125_v50, %v121_v49 }
  0x44   :  { %v122_v54 = vld [vmem:[#allocation3 + $0xe0] sm:$0xff]  ;;  %4674 = vmatprep.subr.bf16.mxu1 %v6369_v40  ;;  %v124_v57 = vld [vmem:[#allocation3 + $0xf0] sm:$0xff]  ;;  %v127_v58 = vld [vmem:[#allocation3 + $0x108] sm:$0xff] }
  0x45   :  { %849 = vperm.xlu1 %5988, %v4565_v18   ;;  %841 = vperm.xlu0 %5987, %v4563_v19   ;;  %v131_v59 = vld [vmem:[#allocation3 + $0x128] sm:$0xff]  ;;  %v129_v60 = vld [vmem:[#allocation3 + $0x118] sm:$0xff]  ;;  %v6393_v0 = vpack.c.bf16 %v122_v54, %v118_v53  ;;  %v6397_v2 = vpack.c.bf16 %v124_v57, %v120_v55  ;;  %v126_v4 = vld [vmem:[#allocation3 + $0x100] sm:$0xff] }
  0x46   :  { %v133_v61 = vld [vmem:[#allocation3 + $0x138] sm:$0xff]  ;;  %v4573_v62 = vld [vmem:[%s7634_s1 + $0xa] sm:$0x3]  ;;  %4644 = vmatpush1.bf16.msra.mxu0 %v6375_v48  ;;  %v6399_v3 = vpack.c.bf16 %v131_v59, %v127_v58  ;;  %v130_v5 = vld [vmem:[#allocation3 + $0x120] sm:$0xff] }
  0x47   :  { %v4571_v63 = vld [vmem:[%s7633_s0 + $0xa] sm:$0x3]  ;;  %4676 = vmatpush1.bf16.msra.mxu1 %v6379_v51  ;;  %4646 = vmatprep.subr.bf16.mxu0 %v6381_v52  ;;  %v128_v6 = vld [vmem:[#allocation3 + $0x110] sm:$0xff]  ;;  %v6402_v7 = vpack.c.bf16 %v133_v61, %v129_v60  ;;  %v137_v12 = vld [vmem:[#allocation3 + $0x158] sm:$0xff]  ;;  %v6411_v17 = vpack.c.bf16 %v130_v5, %v126_v4  ;;  %v77_v5 = vlaneseq }
  0x48   :  { %4678 = vmatprep.subr.bf16.mxu1 %v6384_v56  ;;  %v132_v8 = vld [vmem:[#allocation3 + $0x130] sm:$0xff]  ;;  %v135_v9 = vld [vmem:[#allocation3 + $0x148] sm:$0xff]  ;;  %v141_v13 = vld [vmem:[#allocation3 + $0x178] sm:$0xff] }
  0x49   :  { %1096 = vperm.xlu1 %5988, %v4569_v38   ;;  %1088 = vperm.xlu0 %5987, %v4567_v47   ;;  %v139_v11 = vld [vmem:[#allocation3 + $0x168] sm:$0xff]  ;;  %v6415_v18 = vpack.c.bf16 %v132_v8, %v128_v6  ;;  %v134_v22 = vld [vmem:[#allocation3 + $0x140] sm:$0xff]  ;;  %v136_v24 = vld [vmem:[#allocation3 + $0x150] sm:$0xff]  ;;  %v6420_v26 = vpack.c.bf16 %v141_v13, %v137_v12  ;;  %v6465_v6 = vand.u32 127, %v77_v5 }
  0x4a   :  { %v4577_v15 = vld [vmem:[%s7634_s1 + $0xc] sm:$0x3]  ;;  %4648 = vmatpush1.bf16.msra.mxu0 %v6393_v0  ;;  %v6417_v19 = vpack.c.bf16 %v139_v11, %v135_v9  ;;  %v138_v23 = vld [vmem:[#allocation3 + $0x160] sm:$0xff]  ;;  %v140_v27 = vld [vmem:[#allocation3 + $0x170] sm:$0xff] }
  0x4b   :  { %v4575_v16 = vld [vmem:[%s7633_s0 + $0xc] sm:$0x3]  ;;  %4680 = vmatpush1.bf16.msra.mxu1 %v6397_v2  ;;  %4650 = vmatprep.subr.bf16.mxu0 %v6399_v3  ;;  %v145_v32 = vld [vmem:[#allocation3 + $0x198] sm:$0xff]  ;;  %v4581_v35 = vld [vmem:[%s7634_s1 + $0xe] sm:$0x3]  ;;  %v6429_v37 = vpack.c.bf16 %v138_v23, %v134_v22  ;;  %v6433_v38 = vpack.c.bf16 %v140_v27, %v136_v24  ;;  %7693 = vst [vmem:[#allocation10_spill] sm:$0xff] %v6465_v6 }
  0x4c   :  { %4682 = vmatprep.subr.bf16.mxu1 %v6402_v7  ;;  %v143_v28 = vld [vmem:[#allocation3 + $0x188] sm:$0xff]  ;;  %v149_v33 = vld [vmem:[#allocation3 + $0x1b8] sm:$0xff]  ;;  %v142_v42 = vld [vmem:[#allocation3 + $0x180] sm:$0xff] }
  0x4d   :  { %1343 = vperm.xlu1 %5988, %v4573_v62   ;;  %1335 = vperm.xlu0 %5987, %v4571_v63   ;;  %v147_v31 = vld [vmem:[#allocation3 + $0x1a8] sm:$0xff]  ;;  %v146_v43 = vld [vmem:[#allocation3 + $0x1a0] sm:$0xff]  ;;  %v144_v44 = vld [vmem:[#allocation3 + $0x190] sm:$0xff]  ;;  %v6438_v45 = vpack.c.bf16 %v149_v33, %v145_v32 }
  0x4e   :  { %v4579_v36 = vld [vmem:[%s7633_s0 + $0xe] sm:$0x3]  ;;  %4652 = vmatpush1.bf16.msra.mxu0 %v6411_v17  ;;  %v6435_v41 = vpack.c.bf16 %v147_v31, %v143_v28  ;;  %v148_v46 = vld [vmem:[#allocation3 + $0x1b0] sm:$0xff]  ;;  %v153_v50 = vld [vmem:[#allocation3 + $0x1d8] sm:$0xff]  ;;  %v6441_v54 = vpack.c.bf16 %v146_v43, %v142_v42 }
  0x4f   :  { %4684 = vmatpush1.bf16.msra.mxu1 %v6415_v18  ;;  %4654 = vmatprep.subr.bf16.mxu0 %v6417_v19  ;;  %v151_v47 = vld [vmem:[#allocation3 + $0x1c8] sm:$0xff]  ;;  %v157_v53 = vld [vmem:[#allocation3 + $0x1f8] sm:$0xff]  ;;  %v6445_v55 = vpack.c.bf16 %v148_v46, %v144_v44  ;;  %v150_v58 = vld [vmem:[#allocation3 + $0x1c0] sm:$0xff] }
  0x50   :  { %4686 = vmatprep.subr.bf16.mxu1 %v6420_v26  ;;  %v155_v49 = vld [vmem:[#allocation3 + $0x1e8] sm:$0xff]  ;;  %v154_v59 = vld [vmem:[#allocation3 + $0x1e0] sm:$0xff]  ;;  %v6450_v60 = vpack.c.bf16 %v157_v53, %v153_v50  ;;  %v152_v61 = vld [vmem:[#allocation3 + $0x1d0] sm:$0xff] }
  0x51   :  { %1590 = vperm.xlu1 %5988, %v4577_v15   ;;  %1582 = vperm.xlu0 %5987, %v4575_v16   ;;  %v6447_v57 = vpack.c.bf16 %v155_v49, %v151_v47  ;;  %v156_v62 = vld [vmem:[#allocation3 + $0x1f0] sm:$0xff]  ;;  %v6453_v63 = vpack.c.bf16 %v154_v59, %v150_v58  ;;  %v1119_v42 = vld [vmem:[#allocation3 + $0x88] sm:$0xff]  ;;  %v1121_v44 = vld [vmem:[#allocation3 + $0x98] sm:$0xff] }
  0x52   :  { %4656 = vmatpush1.bf16.msra.mxu0 %v6429_v37  ;;  %v6457_v4 = vpack.c.bf16 %v156_v62, %v152_v61  ;;  %v1123_v43 = vld [vmem:[#allocation3 + $0xa8] sm:$0xff]  ;;  %v1118_v49 = vld [vmem:[#allocation3 + $0x80] sm:$0xff]  ;;  %v1133_v61 = vld [vmem:[#allocation3 + $0xf8] sm:$0xff] }
  0x53   :  { %4688 = vmatpush1.bf16.msra.mxu1 %v6433_v38  ;;  %4658 = vmatprep.subr.bf16.mxu0 %v6435_v41  ;;  %v1122_v50 = vld [vmem:[#allocation3 + $0xa0] sm:$0xff]  ;;  %v6605_v53 = vpack.c.bf16 %v1123_v43, %v1119_v42  ;;  %v1127_v58 = vld [vmem:[#allocation3 + $0xc8] sm:$0xff] }
  0x54   :  { %4690 = vmatprep.subr.bf16.mxu1 %v6438_v45  ;;  %v1131_v59 = vld [vmem:[#allocation3 + $0xe8] sm:$0xff]  ;;  %v6613_v62 = vpack.c.bf16 %v1122_v50, %v1118_v49  ;;  %v1154_v42 = vld [vmem:[#allocation3 + $0x1a0] sm:$0xff]  ;;  %v1156_v49 = vld [vmem:[#allocation3 + $0x1b0] sm:$0xff] }
  0x55   :  { %1837 = vperm.xlu1 %5988, %v4581_v35   ;;  %1829 = vperm.xlu0 %5987, %v4579_v36   ;;  %v1159_v50 = vld [vmem:[#allocation3 + $0x1c8] sm:$0xff] }
  0x56   :  { %4660 = vmatpush1.bf16.msra.mxu0 %v6441_v54 }
  0x57   :  { %4692 = vmatpush1.bf16.msra.mxu1 %v6445_v55  ;;  %4662 = vmatprep.subr.bf16.mxu0 %v6447_v57 }
  0x58   :  { %4694 = vmatprep.subr.bf16.mxu1 %v6450_v60 }
  0x5a   :  { %4664 = vmatpush1.bf16.msra.mxu0 %v6453_v63 }
  0x5b   :  { %4696 = vmatpush1.bf16.msra.mxu1 %v6457_v4  ;;  %4698 = vmatprep.subr.bf16.mxu0 %v6336_v10 }
  0x5c   :  { %4730 = vmatprep.subr.bf16.mxu1 %v6338_v14 }
  0xb8   :  { %v82_v8 = vpop.permute.xlu0 %81  ;;  %v348_v15 = vpop.permute.xlu1 %347 }
  0xb9   :  { %vm83_vm0 = vcmp.eq.s32.totalorder %v6465_v6, %v82_v8  ;;  %vm349_vm2 = vcmp.eq.s32.totalorder %v6465_v6, %v348_v15  ;;  %v1130_v8 = vld [vmem:[#allocation3 + $0xe0] sm:$0xff]  ;;  %v1135_v15 = vld [vmem:[#allocation3 + $0x108] sm:$0xff] }
  0xba   :  { %v4553_v11 = vsel %vm83_vm0, 1.0, %v7647_v1  ;;  %v4556_v22 = vsel %vm349_vm2, 1.0, %v7647_v1  ;;  %vm2172_vm0 = vcmp.lt.s32.totalorder %v6465_v6, 64 }
  0xbc   :  { %v89_v9 = vpop.permute.xlu0 %88  ;;  %v356_v16 = vpop.permute.xlu1 %355 }
  0xbd   :  { %vm90_vm1 = vcmp.eq.s32.totalorder %v6465_v6, %v89_v9  ;;  %vm357_vm3 = vcmp.eq.s32.totalorder %v6465_v6, %v356_v16  ;;  %v6619_v9 = vpack.c.bf16 %v1131_v59, %v1127_v58  ;;  %v1139_v16 = vld [vmem:[#allocation3 + $0x128] sm:$0xff]  ;;  %v1165_v58 = vld [vmem:[#allocation3 + $0x1f8] sm:$0xff] }
  0xbe   :  { %v4554_v12 = vsel %vm90_vm1, 1.0, %v7647_v1  ;;  %v4558_v23 = vsel %vm357_vm3, 1.0, %v7647_v1 }
  0xbf   :  { %v93_v13 = vadd.f32 %v4554_v12, %v4553_v11  ;;  %v360_v24 = vadd.f32 %v4558_v23, %v4556_v22  ;;  %v1128_v12 = vld [vmem:[#allocation3 + $0xd0] sm:$0xff]  ;;  %v1137_v22 = vld [vmem:[#allocation3 + $0x118] sm:$0xff] }
  0xc0   :  { %v603_v27 = vpop.permute.xlu1 %602  ;;  %v595_v28 = vpop.permute.xlu0 %594  ;;  %v1141_v23 = vld [vmem:[#allocation3 + $0x138] sm:$0xff] }
  0xc1   :  { %244 = vmatmul.mubr.f32.vlgmr.msra.gmra.mrb[0].mxu0 %v93_v13  ;;  %315 = vmatmul.mubr.f32.vlgmr.msra.gmra.mrb[0].mxu1 %v93_v13  ;;  %vm604_vm4 = vcmp.eq.s32.totalorder %v6465_v6, %v603_v27  ;;  %vm596_vm5 = vcmp.eq.s32.totalorder %v6465_v6, %v595_v28  ;;  %v1132_v13 = vld [vmem:[#allocation3 + $0xf0] sm:$0xff]  ;;  %v1134_v28 = vld [vmem:[#allocation3 + $0x100] sm:$0xff] }
  0xc2   :  { %4700 = vmatpush1.bf16.msra.mxu0 %v6347_v20  ;;  %4732 = vmatpush1.bf16.msra.mxu1 %v6349_v21  ;;  %v4562_v31 = vsel %vm604_vm4, 1.0, %v7647_v1  ;;  %v4560_v32 = vsel %vm596_vm5, 1.0, %v7647_v1  ;;  %v6627_v27 = vpack.c.bf16 %v1132_v13, %v1128_v12 }
  0xc3   :  { %4702 = vmatprep.subr.bf16.mxu0 %v6351_v25  ;;  %4734 = vmatprep.subr.bf16.mxu1 %v6355_v29  ;;  %v607_v33 = vadd.f32 %v4562_v31, %v4560_v32  ;;  %v1138_v31 = vld [vmem:[#allocation3 + $0x120] sm:$0xff]  ;;  %v6631_v32 = vpack.c.bf16 %v1139_v16, %v1135_v15  ;;  %v1160_v16 = vld [vmem:[#allocation3 + $0x1d0] sm:$0xff] }
  0xc4   :  { %489 = vmatprep.mubr.f32.mxu0 %v7647_v1  ;;  %560 = vmatprep.mubr.f32.mxu1 %v7647_v1  ;;  %v1162_v15 = vld [vmem:[#allocation3 + $0x1e0] sm:$0xff] }
  0xc6   :  { %4704 = vmatpush1.bf16.msra.mxu0 %v6357_v30  ;;  %4736 = vmatpush1.bf16.msra.mxu1 %v6361_v34 }
  0xc7   :  { %4706 = vmatprep.subr.bf16.mxu0 %v6367_v39  ;;  %4738 = vmatprep.subr.bf16.mxu1 %v6369_v40 }
  0xca   :  { %4708 = vmatpush1.bf16.msra.mxu0 %v6375_v48  ;;  %4740 = vmatpush1.bf16.msra.mxu1 %v6379_v51 }
  0xcb   :  { %4710 = vmatprep.subr.bf16.mxu0 %v6381_v52  ;;  %4742 = vmatprep.subr.bf16.mxu1 %v6384_v56 }
  0xce   :  { %4712 = vmatpush1.bf16.msra.mxu0 %v6393_v0  ;;  %4744 = vmatpush1.bf16.msra.mxu1 %v6397_v2 }
  0xcf   :  { %4714 = vmatprep.subr.bf16.mxu0 %v6399_v3  ;;  %4746 = vmatprep.subr.bf16.mxu1 %v6402_v7 }
  0xd2   :  { %4716 = vmatpush1.bf16.msra.mxu0 %v6411_v17  ;;  %4748 = vmatpush1.bf16.msra.mxu1 %v6415_v18 }
  0xd3   :  { %4718 = vmatprep.subr.bf16.mxu0 %v6417_v19  ;;  %4750 = vmatprep.subr.bf16.mxu1 %v6420_v26 }
  0xd6   :  { %4720 = vmatpush1.bf16.msra.mxu0 %v6429_v37  ;;  %4752 = vmatpush1.bf16.msra.mxu1 %v6433_v38 }
  0xd7   :  { %4722 = vmatprep.subr.bf16.mxu0 %v6435_v41  ;;  %4754 = vmatprep.subr.bf16.mxu1 %v6438_v45 }
  0xda   :  { %4724 = vmatpush1.bf16.msra.mxu0 %v6441_v54  ;;  %4756 = vmatpush1.bf16.msra.mxu1 %v6445_v55 }
  0xdb   :  { %4726 = vmatprep.subr.bf16.mxu0 %v6447_v57  ;;  %4758 = vmatprep.subr.bf16.mxu1 %v6450_v60 }
  0xde   :  { %4728 = vmatpush1.bf16.msra.mxu0 %v6453_v63  ;;  %4760 = vmatpush1.bf16.msra.mxu1 %v6457_v4 }
  0xdf   :  { %4762 = vmatprep.subr.bf16.mxu0 %v6336_v10  ;;  %4794 = vmatprep.subr.bf16.mxu1 %v6338_v14 }
  0xe1   :  { %490 = vmatmul.mubr.f32.vlgmr.msra.gmra.mrb[2].mxu0 %v360_v24  ;;  %561 = vmatmul.mubr.f32.vlgmr.msra.gmra.mrb[2].mxu1 %v360_v24 }
  0xe2   :  { %4764 = vmatpush1.bf16.msra.mxu0 %v6347_v20  ;;  %4796 = vmatpush1.bf16.msra.mxu1 %v6349_v21 }
  0xe3   :  { %4766 = vmatprep.subr.bf16.mxu0 %v6351_v25  ;;  %4798 = vmatprep.subr.bf16.mxu1 %v6355_v29 }
  0xe4   :  { %736 = vmatprep.mubr.f32.mxu0 %v7647_v1  ;;  %807 = vmatprep.mubr.f32.mxu1 %v7647_v1 }
  0xe6   :  { %4768 = vmatpush1.bf16.msra.mxu0 %v6357_v30  ;;  %4800 = vmatpush1.bf16.msra.mxu1 %v6361_v34 }
  0xe7   :  { %4770 = vmatprep.subr.bf16.mxu0 %v6367_v39  ;;  %4802 = vmatprep.subr.bf16.mxu1 %v6369_v40 }
  0xea   :  { %4772 = vmatpush1.bf16.msra.mxu0 %v6375_v48  ;;  %4804 = vmatpush1.bf16.msra.mxu1 %v6379_v51 }
  0xeb   :  { %4774 = vmatprep.subr.bf16.mxu0 %v6381_v52  ;;  %4806 = vmatprep.subr.bf16.mxu1 %v6384_v56 }
  0xee   :  { %4776 = vmatpush1.bf16.msra.mxu0 %v6393_v0  ;;  %4808 = vmatpush1.bf16.msra.mxu1 %v6397_v2 }
  0xef   :  { %4778 = vmatprep.subr.bf16.mxu0 %v6399_v3  ;;  %4810 = vmatprep.subr.bf16.mxu1 %v6402_v7 }
  0xf2   :  { %4780 = vmatpush1.bf16.msra.mxu0 %v6411_v17  ;;  %4812 = vmatpush1.bf16.msra.mxu1 %v6415_v18 }
  0xf3   :  { %4782 = vmatprep.subr.bf16.mxu0 %v6417_v19  ;;  %4814 = vmatprep.subr.bf16.mxu1 %v6420_v26 }
  0xf6   :  { %4784 = vmatpush1.bf16.msra.mxu0 %v6429_v37  ;;  %4816 = vmatpush1.bf16.msra.mxu1 %v6433_v38 }
  0xf7   :  { %4786 = vmatprep.subr.bf16.mxu0 %v6435_v41  ;;  %4818 = vmatprep.subr.bf16.mxu1 %v6438_v45 }
  0xfa   :  { %4788 = vmatpush1.bf16.msra.mxu0 %v6441_v54  ;;  %4820 = vmatpush1.bf16.msra.mxu1 %v6445_v55 }
  0xfb   :  { %4790 = vmatprep.subr.bf16.mxu0 %v6447_v57  ;;  %4822 = vmatprep.subr.bf16.mxu1 %v6450_v60 }
  0xfe   :  { %4792 = vmatpush1.bf16.msra.mxu0 %v6453_v63  ;;  %4824 = vmatpush1.bf16.msra.mxu1 %v6457_v4 }
  0xff   :  { %4826 = vmatprep.subr.bf16.mxu0 %v6336_v10  ;;  %4858 = vmatprep.subr.bf16.mxu1 %v6338_v14  ;;  %v850_v10 = vpop.permute.xlu1 %849  ;;  %v842_v14 = vpop.permute.xlu0 %841 }
 0x100   :  { %vm851_vm6 = vcmp.eq.s32.totalorder %v6465_v6, %v850_v10  ;;  %vm843_vm7 = vcmp.eq.s32.totalorder %v6465_v6, %v842_v14  ;;  %v1136_v10 = vld [vmem:[#allocation3 + $0x110] sm:$0xff] }
 0x101   :  { %737 = vmatmul.mubr.f32.vlgmr.msra.gmra.mrb[4].mxu0 %v607_v33  ;;  %808 = vmatmul.mubr.f32.vlgmr.msra.gmra.mrb[4].mxu1 %v607_v33  ;;  %v6633_v33 = vpack.c.bf16 %v1141_v23, %v1137_v22  ;;  %v1140_v14 = vld [vmem:[#allocation3 + $0x130] sm:$0xff] }
 0x102   :  { %4828 = vmatpush1.bf16.msra.mxu0 %v6347_v20  ;;  %4860 = vmatpush1.bf16.msra.mxu1 %v6349_v21  ;;  %v1103_v20 = vld [vmem:[#allocation3 + $0x8] sm:$0xff]  ;;  %v1164_v22 = vld [vmem:[#allocation3 + $0x1f0] sm:$0xff] }
 0x103   :  { %4830 = vmatprep.subr.bf16.mxu0 %v6351_v25  ;;  %4862 = vmatprep.subr.bf16.mxu1 %v6355_v29  ;;  %v1107_v21 = vld [vmem:[#allocation3 + $0x28] sm:$0xff]  ;;  %v1105_v25 = vld [vmem:[#allocation3 + $0x18] sm:$0xff]  ;;  %v1097_v59 = vpop.permute.xlu1 %1096 }
 0x104   :  { %983 = vmatprep.mubr.f32.mxu0 %v7647_v1  ;;  %1054 = vmatprep.mubr.f32.mxu1 %v7647_v1  ;;  %v1109_v29 = vld [vmem:[#allocation3 + $0x38] sm:$0xff]  ;;  %vm1098_vm8 = vcmp.eq.s32.totalorder %v6465_v6, %v1097_v59  ;;  %v2079_v59 = vld [vmem:[#allocation5 + $0x30] sm:$0xff] }
 0x106   :  { %4832 = vmatpush1.bf16.msra.mxu0 %v6357_v30  ;;  %4864 = vmatpush1.bf16.msra.mxu1 %v6361_v34  ;;  %v1102_v30 = vld [vmem:[#allocation3] sm:$0xff] }
 0x107   :  { %4834 = vmatprep.subr.bf16.mxu0 %v6367_v39  ;;  %4866 = vmatprep.subr.bf16.mxu1 %v6369_v40  ;;  %v1106_v34 = vld [vmem:[#allocation3 + $0x20] sm:$0xff]  ;;  %v6579_v39 = vpack.c.bf16 %v1107_v21, %v1103_v20  ;;  %v6581_v40 = vpack.c.bf16 %v1109_v29, %v1105_v25  ;;  %v1143_v20 = vld [vmem:[#allocation3 + $0x148] sm:$0xff]  ;;  %v1145_v25 = vld [vmem:[#allocation3 + $0x158] sm:$0xff] }
 0x108   :  { %v1147_v21 = vld [vmem:[#allocation3 + $0x168] sm:$0xff]  ;;  %v1149_v29 = vld [vmem:[#allocation3 + $0x178] sm:$0xff] }
 0x10a   :  { %4836 = vmatpush1.bf16.msra.mxu0 %v6375_v48  ;;  %4868 = vmatpush1.bf16.msra.mxu1 %v6379_v51  ;;  %v1104_v48 = vld [vmem:[#allocation3 + $0x10] sm:$0xff] }
 0x10b   :  { %4838 = vmatprep.subr.bf16.mxu0 %v6381_v52  ;;  %4870 = vmatprep.subr.bf16.mxu1 %v6384_v56  ;;  %v1108_v51 = vld [vmem:[#allocation3 + $0x30] sm:$0xff]  ;;  %v1111_v52 = vld [vmem:[#allocation3 + $0x48] sm:$0xff]  ;;  %v4566_v56 = vsel %vm851_vm6, 1.0, %v7647_v1 }
 0x10e   :  { %4840 = vmatpush1.bf16.msra.mxu0 %v6393_v0  ;;  %4872 = vmatpush1.bf16.msra.mxu1 %v6397_v2  ;;  %v4564_v0 = vsel %vm843_vm7, 1.0, %v7647_v1  ;;  %v1115_v2 = vld [vmem:[#allocation3 + $0x68] sm:$0xff] }
 0x10f   :  { %4842 = vmatprep.subr.bf16.mxu0 %v6399_v3  ;;  %4874 = vmatprep.subr.bf16.mxu1 %v6402_v7  ;;  %v1113_v3 = vld [vmem:[#allocation3 + $0x58] sm:$0xff]  ;;  %v854_v35 = vadd.f32 %v4566_v56, %v4564_v0  ;;  %v6593_v36 = vpack.c.bf16 %v1115_v2, %v1111_v52  ;;  %v6643_v52 = vpack.c.bf16 %v1147_v21, %v1143_v20  ;;  %v1144_v0 = vld [vmem:[#allocation3 + $0x150] sm:$0xff]  ;;  %v1344_v20 = vpop.permute.xlu1 %1343 }
 0x110   :  { %v1117_v7 = vld [vmem:[#allocation3 + $0x78] sm:$0xff]  ;;  %v6645_v56 = vpack.c.bf16 %v1149_v29, %v1145_v25  ;;  %v1148_v2 = vld [vmem:[#allocation3 + $0x170] sm:$0xff]  ;;  %vm1345_vm10 = vcmp.eq.s32.totalorder %v6465_v6, %v1344_v20 }
 0x111   :  { %v4574_v25 = vsel %vm1345_vm10, 1.0, %v7647_v1 }
 0x112   :  { %4844 = vmatpush1.bf16.msra.mxu0 %v6411_v17  ;;  %4876 = vmatpush1.bf16.msra.mxu1 %v6415_v18  ;;  %v6587_v17 = vpack.c.bf16 %v1106_v34, %v1102_v30  ;;  %v6589_v18 = vpack.c.bf16 %v1108_v51, %v1104_v48  ;;  %v6637_v30 = vpack.c.bf16 %v1138_v31, %v1134_v28  ;;  %v1142_v48 = vld [vmem:[#allocation3 + $0x140] sm:$0xff]  ;;  %v4570_v31 = vsel %vm1098_vm8, 1.0, %v7647_v1 }
 0x113   :  { %4846 = vmatprep.subr.bf16.mxu0 %v6417_v19  ;;  %4878 = vmatprep.subr.bf16.mxu1 %v6420_v26  ;;  %v1110_v19 = vld [vmem:[#allocation3 + $0x40] sm:$0xff]  ;;  %v6639_v34 = vpack.c.bf16 %v1140_v14, %v1136_v10  ;;  %v6677_v28 = vpack.c.bf16 %v1164_v22, %v1160_v16  ;;  %v2084_v16 = vld [vmem:[#allocation5 + $0x58] sm:$0xff] }
 0x114   :  { %v1114_v26 = vld [vmem:[#allocation3 + $0x60] sm:$0xff] }
 0x115   :  { %v6599_v46 = vpack.c.bf16 %v1114_v26, %v1110_v19  ;;  %v1146_v51 = vld [vmem:[#allocation3 + $0x160] sm:$0xff]  ;;  %v1153_v19 = vld [vmem:[#allocation3 + $0x198] sm:$0xff] }
 0x116   :  { %4848 = vmatpush1.bf16.msra.mxu0 %v6429_v37  ;;  %4880 = vmatpush1.bf16.msra.mxu1 %v6433_v38  ;;  %v6595_v37 = vpack.c.bf16 %v1117_v7, %v1113_v3  ;;  %v1112_v38 = vld [vmem:[#allocation3 + $0x50] sm:$0xff]  ;;  %v1151_v3 = vld [vmem:[#allocation3 + $0x188] sm:$0xff]  ;;  %v1157_v26 = vld [vmem:[#allocation3 + $0x1b8] sm:$0xff] }
 0x117   :  { %4850 = vmatprep.subr.bf16.mxu0 %v6435_v41  ;;  %4882 = vmatprep.subr.bf16.mxu1 %v6438_v45  ;;  %v1116_v41 = vld [vmem:[#allocation3 + $0x70] sm:$0xff]  ;;  %v1125_v45 = vld [vmem:[#allocation3 + $0xb8] sm:$0xff]  ;;  %v1155_v7 = vld [vmem:[#allocation3 + $0x1a8] sm:$0xff] }
 0x118   :  { %v6601_v47 = vpack.c.bf16 %v1116_v41, %v1112_v38  ;;  %v6651_v38 = vpack.c.bf16 %v1148_v2, %v1144_v0  ;;  %v1150_v41 = vld [vmem:[#allocation3 + $0x180] sm:$0xff]  ;;  %v6655_v43 = vpack.c.bf16 %v1155_v7, %v1151_v3 }
 0x11a   :  { %4852 = vmatpush1.bf16.msra.mxu0 %v6441_v54  ;;  %4884 = vmatpush1.bf16.msra.mxu1 %v6445_v55  ;;  %v6607_v54 = vpack.c.bf16 %v1125_v45, %v1121_v44  ;;  %v1120_v55 = vld [vmem:[#allocation3 + $0x90] sm:$0xff]  ;;  %v6657_v44 = vpack.c.bf16 %v1157_v26, %v1153_v19 }
 0x11b   :  { %4854 = vmatprep.subr.bf16.mxu0 %v6447_v57  ;;  %4886 = vmatprep.subr.bf16.mxu1 %v6450_v60  ;;  %v1124_v57 = vld [vmem:[#allocation3 + $0xb0] sm:$0xff]  ;;  %v1129_v60 = vld [vmem:[#allocation3 + $0xd8] sm:$0xff] }
 0x11c   :  { %v6621_v11 = vpack.c.bf16 %v1133_v61, %v1129_v60  ;;  %v1152_v45 = vld [vmem:[#allocation3 + $0x190] sm:$0xff]  ;;  %v1089_v60 = vpop.permute.xlu0 %1088  ;;  %v6661_v61 = vpack.c.bf16 %v1154_v42, %v1150_v41 }
 0x11d   :  { %vm1090_vm9 = vcmp.eq.s32.totalorder %v6465_v6, %v1089_v60  ;;  %v2082_v60 = vld [vmem:[#allocation5 + $0x48] sm:$0xff] }
 0x11e   :  { %4856 = vmatpush1.bf16.msra.mxu0 %v6453_v63  ;;  %4888 = vmatpush1.bf16.msra.mxu1 %v6457_v4  ;;  %v6615_v63 = vpack.c.bf16 %v1124_v57, %v1120_v55  ;;  %v1126_v4 = vld [vmem:[#allocation3 + $0xc0] sm:$0xff]  ;;  %v1163_v55 = vld [vmem:[#allocation3 + $0x1e8] sm:$0xff]  ;;  %v1161_v57 = vld [vmem:[#allocation3 + $0x1d8] sm:$0xff]  ;;  %v4568_v10 = vsel %vm1090_vm9, 1.0, %v7647_v1 }
 0x11f   :  { %4890 = vmatprep.subr.bf16.mxu0 %v6579_v39  ;;  %4922 = vmatprep.subr.bf16.mxu1 %v6581_v40  ;;  %v6625_v24 = vpack.c.bf16 %v1130_v8, %v1126_v4  ;;  %v6663_v4 = vpack.c.bf16 %v1156_v49, %v1152_v45  ;;  %v1158_v8 = vld [vmem:[#allocation3 + $0x1c0] sm:$0xff]  ;;  %v6667_v12 = vpack.c.bf16 %v1163_v55, %v1159_v50  ;;  %v2078_v45 = vld [vmem:[#allocation5 + $0x28] sm:$0xff]  ;;  %v2076_v49 = vld [vmem:[#allocation5 + $0x18] sm:$0xff] }
 0x120   :  { %v6669_v13 = vpack.c.bf16 %v1165_v58, %v1161_v57  ;;  %v6675_v23 = vpack.c.bf16 %v1162_v15, %v1158_v8  ;;  %v1101_v14 = vadd.f32 %v4570_v31, %v4568_v10  ;;  %v1336_v21 = vpop.permute.xlu0 %1335  ;;  %v2080_v50 = vld [vmem:[#allocation5 + $0x38] sm:$0xff]  ;;  %v2075_v58 = vld [vmem:[#allocation5 + $0x10] sm:$0xff]  ;;  %v2081_v31 = vld [vmem:[#allocation5 + $0x40] sm:$0xff] }
 0x121   :  { %984 = vmatmul.mubr.f32.vlgmr.msra.gmra.mrb[6].mxu0 %v854_v35  ;;  %1055 = vmatmul.mubr.f32.vlgmr.msra.gmra.mrb[6].mxu1 %v854_v35  ;;  %v6649_v35 = vpack.c.bf16 %v1146_v51, %v1142_v48  ;;  %vm1337_vm11 = vcmp.eq.s32.totalorder %v6465_v6, %v1336_v21  ;;  %v1591_v51 = vpop.permute.xlu1 %1590  ;;  %v6832_v57 = vpack.c.bf16 %v2080_v50, %v2076_v49  ;;  %v2085_v10 = vld [vmem:[#allocation5 + $0x60] sm:$0xff] }
 0x122   :  { %4892 = vmatpush1.bf16.msra.mxu0 %v6587_v17  ;;  %4924 = vmatpush1.bf16.msra.mxu1 %v6589_v18  ;;  %v4572_v29 = vsel %vm1337_vm11, 1.0, %v7647_v1  ;;  %vm1592_vm12 = vcmp.eq.s32.totalorder %v6465_v6, %v1591_v51  ;;  %v2096_v51 = vld [vmem:[#allocation5 + $0xb8] sm:$0xff] }
 0x123   :  { %4894 = vmatprep.subr.bf16.mxu0 %v6593_v36  ;;  %4926 = vmatprep.subr.bf16.mxu1 %v6595_v37  ;;  %v1348_v48 = vadd.f32 %v4574_v25, %v4572_v29  ;;  %v4578_v2 = vsel %vm1592_vm12, 1.0, %v7647_v1  ;;  %v2083_v25 = vld [vmem:[#allocation5 + $0x50] sm:$0xff] }
 0x124   :  { %1230 = vmatprep.mubr.f32.mxu0 %v7647_v1  ;;  %1301 = vmatprep.mubr.f32.mxu1 %v7647_v1  ;;  %v1583_v0 = vpop.permute.xlu0 %1582  ;;  %v2087_v29 = vld [vmem:[#allocation5 + $0x70] sm:$0xff] }
 0x125   :  { %vm1584_vm13 = vcmp.eq.s32.totalorder %v6465_v6, %v1583_v0  ;;  %v6852_v0 = vpack.c.bf16 %v2085_v10, %v2081_v31 }
 0x126   :  { %4896 = vmatpush1.bf16.msra.mxu0 %v6599_v46  ;;  %4928 = vmatpush1.bf16.msra.mxu1 %v6601_v47  ;;  %v4576_v3 = vsel %vm1584_vm13, 1.0, %v7647_v1 }
 0x127   :  { %4898 = vmatprep.subr.bf16.mxu0 %v6605_v53  ;;  %4930 = vmatprep.subr.bf16.mxu1 %v6607_v54  ;;  %v1595_v7 = vadd.f32 %v4578_v2, %v4576_v3  ;;  %v6854_v2 = vpack.c.bf16 %v2087_v29, %v2083_v25  ;;  %v2089_v3 = vld [vmem:[#allocation5 + $0x80] sm:$0xff] }
 0x128   :  { %v2117_v25 = vld [vmem:[#allocation5 + $0x160] sm:$0xff] }
 0x12a   :  { %4900 = vmatpush1.bf16.msra.mxu0 %v6613_v62  ;;  %4932 = vmatpush1.bf16.msra.mxu1 %v6615_v63 }
 0x12b   :  { %4902 = vmatprep.subr.bf16.mxu0 %v6619_v9  ;;  %4934 = vmatprep.subr.bf16.mxu1 %v6621_v11 }
 0x12e   :  { %4904 = vmatpush1.bf16.msra.mxu0 %v6625_v24  ;;  %4936 = vmatpush1.bf16.msra.mxu1 %v6627_v27 }
 0x12f   :  { %4906 = vmatprep.subr.bf16.mxu0 %v6631_v32  ;;  %4938 = vmatprep.subr.bf16.mxu1 %v6633_v33 }
 0x132   :  { %4908 = vmatpush1.bf16.msra.mxu0 %v6637_v30  ;;  %4940 = vmatpush1.bf16.msra.mxu1 %v6639_v34 }
 0x133   :  { %4910 = vmatprep.subr.bf16.mxu0 %v6643_v52  ;;  %4942 = vmatprep.subr.bf16.mxu1 %v6645_v56 }
 0x136   :  { %4912 = vmatpush1.bf16.msra.mxu0 %v6649_v35  ;;  %4944 = vmatpush1.bf16.msra.mxu1 %v6651_v38 }
 0x137   :  { %4914 = vmatprep.subr.bf16.mxu0 %v6655_v43  ;;  %4946 = vmatprep.subr.bf16.mxu1 %v6657_v44 }
 0x13a   :  { %4916 = vmatpush1.bf16.msra.mxu0 %v6661_v61  ;;  %4948 = vmatpush1.bf16.msra.mxu1 %v6663_v4 }
 0x13b   :  { %4918 = vmatprep.subr.bf16.mxu0 %v6667_v12  ;;  %4950 = vmatprep.subr.bf16.mxu1 %v6669_v13 }
 0x13e   :  { %4920 = vmatpush1.bf16.msra.mxu0 %v6675_v23  ;;  %4952 = vmatpush1.bf16.msra.mxu1 %v6677_v28 }
 0x13f   :  { %4954 = vmatprep.subr.bf16.mxu0 %v6579_v39  ;;  %4986 = vmatprep.subr.bf16.mxu1 %v6581_v40 }
 0x141   :  { %1231 = vmatmul.mubr.f32.vlgmr.msra.gmra.mrb[8].mxu0 %v1101_v14  ;;  %1302 = vmatmul.mubr.f32.vlgmr.msra.gmra.mrb[8].mxu1 %v1101_v14 }
 0x142   :  { %4956 = vmatpush1.bf16.msra.mxu0 %v6587_v17  ;;  %4988 = vmatpush1.bf16.msra.mxu1 %v6589_v18 }
 0x143   :  { %4958 = vmatprep.subr.bf16.mxu0 %v6593_v36  ;;  %4990 = vmatprep.subr.bf16.mxu1 %v6595_v37 }
 0x144   :  { %1477 = vmatprep.mubr.f32.mxu0 %v7647_v1  ;;  %1548 = vmatprep.mubr.f32.mxu1 %v7647_v1 }
 0x146   :  { %4960 = vmatpush1.bf16.msra.mxu0 %v6599_v46  ;;  %4992 = vmatpush1.bf16.msra.mxu1 %v6601_v47 }
 0x147   :  { %4962 = vmatprep.subr.bf16.mxu0 %v6605_v53  ;;  %4994 = vmatprep.subr.bf16.mxu1 %v6607_v54 }
 0x14a   :  { %4964 = vmatpush1.bf16.msra.mxu0 %v6613_v62  ;;  %4996 = vmatpush1.bf16.msra.mxu1 %v6615_v63 }
 0x14b   :  { %4966 = vmatprep.subr.bf16.mxu0 %v6619_v9  ;;  %4998 = vmatprep.subr.bf16.mxu1 %v6621_v11 }
 0x14e   :  { %4968 = vmatpush1.bf16.msra.mxu0 %v6625_v24  ;;  %5000 = vmatpush1.bf16.msra.mxu1 %v6627_v27 }
 0x14f   :  { %4970 = vmatprep.subr.bf16.mxu0 %v6631_v32  ;;  %5002 = vmatprep.subr.bf16.mxu1 %v6633_v33 }
 0x152   :  { %4972 = vmatpush1.bf16.msra.mxu0 %v6637_v30  ;;  %5004 = vmatpush1.bf16.msra.mxu1 %v6639_v34 }
 0x153   :  { %4974 = vmatprep.subr.bf16.mxu0 %v6643_v52  ;;  %5006 = vmatprep.subr.bf16.mxu1 %v6645_v56 }
 0x156   :  { %4976 = vmatpush1.bf16.msra.mxu0 %v6649_v35  ;;  %5008 = vmatpush1.bf16.msra.mxu1 %v6651_v38 }
 0x157   :  { %4978 = vmatprep.subr.bf16.mxu0 %v6655_v43  ;;  %5010 = vmatprep.subr.bf16.mxu1 %v6657_v44 }
 0x15a   :  { %4980 = vmatpush1.bf16.msra.mxu0 %v6661_v61  ;;  %5012 = vmatpush1.bf16.msra.mxu1 %v6663_v4 }
 0x15b   :  { %4982 = vmatprep.subr.bf16.mxu0 %v6667_v12  ;;  %5014 = vmatprep.subr.bf16.mxu1 %v6669_v13 }
 0x15e   :  { %4984 = vmatpush1.bf16.msra.mxu0 %v6675_v23  ;;  %5016 = vmatpush1.bf16.msra.mxu1 %v6677_v28 }
 0x15f   :  { %5018 = vmatprep.subr.bf16.mxu0 %v6579_v39  ;;  %5050 = vmatprep.subr.bf16.mxu1 %v6581_v40 }
 0x161   :  { %1478 = vmatmul.mubr.f32.vlgmr.msra.gmra.mrb[10].mxu0 %v1348_v48  ;;  %1549 = vmatmul.mubr.f32.vlgmr.msra.gmra.mrb[10].mxu1 %v1348_v48  ;;  %v2094_v48 = vld [vmem:[#allocation5 + $0xa8] sm:$0xff] }
 0x162   :  { %5020 = vmatpush1.bf16.msra.mxu0 %v6587_v17  ;;  %5052 = vmatpush1.bf16.msra.mxu1 %v6589_v18 }
 0x163   :  { %5022 = vmatprep.subr.bf16.mxu0 %v6593_v36  ;;  %5054 = vmatprep.subr.bf16.mxu1 %v6595_v37 }
 0x164   :  { %1724 = vmatprep.mubr.f32.mxu0 %v7647_v1  ;;  %1795 = vmatprep.mubr.f32.mxu1 %v7647_v1 }
 0x166   :  { %5024 = vmatpush1.bf16.msra.mxu0 %v6599_v46  ;;  %5056 = vmatpush1.bf16.msra.mxu1 %v6601_v47 }
 0x167   :  { %5026 = vmatprep.subr.bf16.mxu0 %v6605_v53  ;;  %5058 = vmatprep.subr.bf16.mxu1 %v6607_v54 }
 0x16a   :  { %5028 = vmatpush1.bf16.msra.mxu0 %v6613_v62  ;;  %5060 = vmatpush1.bf16.msra.mxu1 %v6615_v63 }
 0x16b   :  { %5030 = vmatprep.subr.bf16.mxu0 %v6619_v9  ;;  %5062 = vmatprep.subr.bf16.mxu1 %v6621_v11 }
 0x16e   :  { %5032 = vmatpush1.bf16.msra.mxu0 %v6625_v24  ;;  %5064 = vmatpush1.bf16.msra.mxu1 %v6627_v27 }
 0x16f   :  { %5034 = vmatprep.subr.bf16.mxu0 %v6631_v32  ;;  %5066 = vmatprep.subr.bf16.mxu1 %v6633_v33 }
 0x172   :  { %5036 = vmatpush1.bf16.msra.mxu0 %v6637_v30  ;;  %5068 = vmatpush1.bf16.msra.mxu1 %v6639_v34 }
 0x173   :  { %5038 = vmatprep.subr.bf16.mxu0 %v6643_v52  ;;  %5070 = vmatprep.subr.bf16.mxu1 %v6645_v56 }
 0x176   :  { %5040 = vmatpush1.bf16.msra.mxu0 %v6649_v35  ;;  %5072 = vmatpush1.bf16.msra.mxu1 %v6651_v38 }
 0x177   :  { %5042 = vmatprep.subr.bf16.mxu0 %v6655_v43  ;;  %5074 = vmatprep.subr.bf16.mxu1 %v6657_v44 }
 0x17a   :  { %5044 = vmatpush1.bf16.msra.mxu0 %v6661_v61  ;;  %5076 = vmatpush1.bf16.msra.mxu1 %v6663_v4 }
 0x17b   :  { %5046 = vmatprep.subr.bf16.mxu0 %v6667_v12  ;;  %5078 = vmatprep.subr.bf16.mxu1 %v6669_v13 }
 0x17e   :  { %5048 = vmatpush1.bf16.msra.mxu0 %v6675_v23  ;;  %5080 = vmatpush1.bf16.msra.mxu1 %v6677_v28 }
 0x17f   :  { %5082 = vmatprep.subr.bf16.mxu0 %v6579_v39  ;;  %5114 = vmatprep.subr.bf16.mxu1 %v6581_v40  ;;  %v6774_v39 = vshrl.u32 %v77_v5, 7  ;;  %v76_v5 = vld [vmem:[%s7636_s3] sm:$0xf] }
 0x181   :  { %1725 = vmatmul.mubr.f32.vlgmr.msra.gmra.mrb[12].mxu0 %v1595_v7  ;;  %1796 = vmatmul.mubr.f32.vlgmr.msra.gmra.mrb[12].mxu1 %v1595_v7  ;;  %7694 = vst [vmem:[#allocation11_spill] sm:$0xff] %v6774_v39  ;;  %v7646_v40 = vsub.s32 0, %v6774_v39  ;;  %v2093_v7 = vld [vmem:[#allocation5 + $0xa0] sm:$0xff] }
 0x182   :  { %5084 = vmatpush1.bf16.msra.mxu0 %v6587_v17  ;;  %5116 = vmatpush1.bf16.msra.mxu1 %v6589_v18  ;;  %v169_v17 = vsub.s32 2, %v6774_v39  ;;  %v7645_v18 = vsub.s32 1, %v6774_v39 }
 0x183   :  { %5086 = vmatprep.subr.bf16.mxu0 %v6593_v36  ;;  %5118 = vmatprep.subr.bf16.mxu1 %v6595_v37  ;;  %v6212_v36 = vmov 1983009808  }
 0x184   :  { %1971 = vmatprep.mubr.f32.mxu0 %v7647_v1  ;;  %2042 = vmatprep.mubr.f32.mxu1 %v7647_v1  ;;  %v328_v37 = vunpack.c.l.s4 %v6212_v36  ;;  %v2091_v36 = vld [vmem:[#allocation5 + $0x90] sm:$0xff] }
 0x186   :  { %5088 = vmatpush1.bf16.msra.mxu0 %v6599_v46  ;;  %5120 = vmatpush1.bf16.msra.mxu1 %v6601_v47  ;;  %v173_v46 = vsub.s32 3, %v6774_v39  ;;  %v6793_v47 = vrot.slane %v76_v5, %v7646_v40 }
 0x187   :  { %5090 = vmatprep.subr.bf16.mxu0 %v6605_v53  ;;  %5122 = vmatprep.subr.bf16.mxu1 %v6607_v54  ;;  %v6795_v53 = vrot.slane %v76_v5, %v169_v17  ;;  %v6801_v54 = vrot.slane %v76_v5, %v7645_v18 }
 0x188   :  { %7695 = vst [vmem:[#allocation12_spill] sm:$0xff] %v6793_v47 }
 0x189   :  { %7696 = vst [vmem:[#allocation13_spill] sm:$0xff] %v6795_v53  ;;  %7697 = vst [vmem:[#allocation14_spill] sm:$0xff] %v6801_v54 }
 0x18a   :  { %5092 = vmatpush1.bf16.msra.mxu0 %v6613_v62  ;;  %5124 = vmatpush1.bf16.msra.mxu1 %v6615_v63  ;;  %v329_v62 = vunpack.c.0.s8 %v328_v37  ;;  %v6803_v63 = vrot.slane %v76_v5, %v173_v46  ;;  %v2095_v37 = vld [vmem:[#allocation5 + $0xb0] sm:$0xff]  ;;  %v2098_v46 = vld [vmem:[#allocation5 + $0xc8] sm:$0xff] }
 0x18b   :  { %5094 = vmatprep.subr.bf16.mxu0 %v6619_v9  ;;  %5126 = vmatprep.subr.bf16.mxu1 %v6621_v11 }
 0x18c   :  { %7698 = vst [vmem:[#allocation15_spill] sm:$0xff] %v6803_v63  ;;  %v6811_v26 = vsub.s32 %v329_v62, %v6774_v39  ;;  %v2102_v62 = vld [vmem:[#allocation5 + $0xe8] sm:$0xff]  ;;  %v2167_v39 = vld [vmem:[#allocation7 + $0xf0] sm:$0xff] }
 0x18e   :  { %5096 = vmatpush1.bf16.msra.mxu0 %v6625_v24  ;;  %5128 = vmatpush1.bf16.msra.mxu1 %v6627_v27 }
 0x18f   :  { %5098 = vmatprep.subr.bf16.mxu0 %v6631_v32  ;;  %5130 = vmatprep.subr.bf16.mxu1 %v6633_v33 }
 0x192   :  { %5100 = vmatpush1.bf16.msra.mxu0 %v6637_v30  ;;  %5132 = vmatpush1.bf16.msra.mxu1 %v6639_v34  ;;  %v1838_v30 = vpop.permute.xlu1 %1837  ;;  %v1830_v34 = vpop.permute.xlu0 %1829 }
 0x193   :  { %5102 = vmatprep.subr.bf16.mxu0 %v6643_v52  ;;  %5134 = vmatprep.subr.bf16.mxu1 %v6645_v56  ;;  %v2074_v52 = vld [vmem:[#allocation5 + $0x8] sm:$0xff]  ;;  %vm1839_vm14 = vcmp.eq.s32.totalorder %v6465_v6, %v1838_v30  ;;  %vm1831_vm15 = vcmp.eq.s32.totalorder %v6465_v6, %v1830_v34  ;;  %v6872_v30 = vpack.c.bf16 %v2102_v62, %v2098_v46  ;;  %v2121_v62 = vld [vmem:[#allocation5 + $0x180] sm:$0xff] }
 0x194   :  { %v245_v9 = vpop.f32.mrb[0].mxu0  ;;  %v316_v11 = vpop.f32.mrb[0].mxu1  ;;  %v4582_v8 = vsel %vm1839_vm14, 1.0, %v7647_v1  ;;  %v4580_v15 = vsel %vm1831_vm15, 1.0, %v7647_v1 }
 0x195   :  { %v246_v24 = vadd.f32 %v245_v9, %v6793_v47  ;;  %v317_v27 = vadd.f32 %v316_v11, %v6795_v53  ;;  %v247_v32 = vpop.f32.mrb[1].mxu0  ;;  %v318_v33 = vpop.f32.mrb[1].mxu1  ;;  %v1842_v14 = vadd.f32 %v4582_v8, %v4580_v15  ;;  %v2100_v9 = vld [vmem:[#allocation5 + $0xd8] sm:$0xff]  ;;  %v2111_v8 = vld [vmem:[#allocation5 + $0x130] sm:$0xff]  ;;  %v2114_v15 = vld [vmem:[#allocation5 + $0x148] sm:$0xff] }
 0x196   :  { %v248_v19 = vadd.f32 %v247_v32, %v6801_v54  ;;  %v319_v41 = vadd.f32 %v318_v33, %v6803_v63  ;;  %5104 = vmatpush1.bf16.msra.mxu0 %v6649_v35  ;;  %5136 = vmatpush1.bf16.msra.mxu1 %v6651_v38  ;;  %v2073_v38 = vld [vmem:[#allocation5] sm:$0xff]  ;;  %v2104_v11 = vld [vmem:[#allocation5 + $0xf8] sm:$0xff] }
 0x197   :  { %5106 = vmatprep.subr.bf16.mxu0 %v6655_v43  ;;  %5138 = vmatprep.subr.bf16.mxu1 %v6657_v44  ;;  %v2077_v43 = vld [vmem:[#allocation5 + $0x20] sm:$0xff]  ;;  %v6830_v44 = vpack.c.bf16 %v2078_v45, %v2074_v52  ;;  %v6874_v34 = vpack.c.bf16 %v2104_v11, %v2100_v9  ;;  %v2106_v52 = vld [vmem:[#allocation5 + $0x108] sm:$0xff]  ;;  %v2112_v45 = vld [vmem:[#allocation5 + $0x138] sm:$0xff] }
 0x198   :  { %v325_v56 = vcombine.low %v246_v24, %v248_v19  ;;  %v326_v42 = vcombine.low %v317_v27, %v319_v41  ;;  %v6866_v24 = vpack.c.bf16 %v2093_v7, %v2089_v3  ;;  %v6868_v27 = vpack.c.bf16 %v2095_v37, %v2091_v36  ;;  %v2097_v32 = vld [vmem:[#allocation5 + $0xc0] sm:$0xff]  ;;  %v2099_v19 = vld [vmem:[#allocation5 + $0xd0] sm:$0xff]  ;;  %v2126_v3 = vld [vmem:[#allocation5 + $0x1a8] sm:$0xff] }
 0x199   :  { %v2101_v33 = vld [vmem:[#allocation5 + $0xe0] sm:$0xff]  ;;  %v2103_v41 = vld [vmem:[#allocation5 + $0xf0] sm:$0xff]  ;;  %v2124_v7 = vld [vmem:[#allocation5 + $0x198] sm:$0xff] }
 0x19a   :  { %v6821_v55 = vrot.slane %v325_v56, %v6811_v26  ;;  %v6824_v35 = vrot.slane %v326_v42, %v6811_v26  ;;  %5108 = vmatpush1.bf16.msra.mxu0 %v6661_v61  ;;  %5140 = vmatpush1.bf16.msra.mxu1 %v6663_v4  ;;  %v2086_v61 = vld [vmem:[#allocation5 + $0x68] sm:$0xff]  ;;  %v2088_v4 = vld [vmem:[#allocation5 + $0x78] sm:$0xff]  ;;  %v6878_v49 = vpack.c.bf16 %v2101_v33, %v2097_v32  ;;  %v2125_v9 = vld [vmem:[#allocation5 + $0x1a0] sm:$0xff] }
 0x19b   :  { %5110 = vmatprep.subr.bf16.mxu0 %v6667_v12  ;;  %5142 = vmatprep.subr.bf16.mxu1 %v6669_v13  ;;  %v6840_v12 = vpack.c.bf16 %v2077_v43, %v2073_v38  ;;  %v6842_v13 = vpack.c.bf16 %v2079_v59, %v2075_v58  ;;  %v6846_v20 = vpack.c.bf16 %v2086_v61, %v2082_v60  ;;  %v2110_v56 = vld [vmem:[#allocation5 + $0x128] sm:$0xff]  ;;  %v2108_v42 = vld [vmem:[#allocation5 + $0x118] sm:$0xff]  ;;  %v2105_v38 = vld [vmem:[#allocation5 + $0x100] sm:$0xff] }
 0x19c   :  { %v6848_v21 = vpack.c.bf16 %v2088_v4, %v2084_v16  ;;  %v6880_v50 = vpack.c.bf16 %v2103_v41, %v2099_v19  ;;  %v2109_v43 = vld [vmem:[#allocation5 + $0x120] sm:$0xff]  ;;  %v6884_v58 = vpack.c.bf16 %v2110_v56, %v2106_v52  ;;  %v6886_v59 = vpack.c.bf16 %v2112_v45, %v2108_v42  ;;  %v2107_v60 = vld [vmem:[#allocation5 + $0x110] sm:$0xff]  ;;  %v2118_v61 = vld [vmem:[#allocation5 + $0x168] sm:$0xff] }
 0x19d   :  { %v2116_v16 = vld [vmem:[#allocation5 + $0x158] sm:$0xff]  ;;  %v6890_v31 = vpack.c.bf16 %v2109_v43, %v2105_v38  ;;  %v6892_v10 = vpack.c.bf16 %v2111_v8, %v2107_v60  ;;  %v6896_v29 = vpack.c.bf16 %v2118_v61, %v2114_v15  ;;  %v2123_v33 = vld [vmem:[#allocation5 + $0x190] sm:$0xff]  ;;  %v2130_v41 = vld [vmem:[#allocation5 + $0x1c8] sm:$0xff]  ;;  %v6914_v61 = vpack.c.bf16 %v2125_v9, %v2121_v62 }
 0x19e   :  { %5112 = vmatpush1.bf16.msra.mxu0 %v6675_v23  ;;  %5144 = vmatpush1.bf16.msra.mxu1 %v6677_v28  ;;  %v2090_v23 = vld [vmem:[#allocation5 + $0x88] sm:$0xff]  ;;  %v2092_v28 = vld [vmem:[#allocation5 + $0x98] sm:$0xff]  ;;  %v2127_v19 = vld [vmem:[#allocation5 + $0x1b0] sm:$0xff] }
 0x19f   :  { %5146 = vmatprep.subr.bf16.mxu0 %v6830_v44  ;;  %5178 = vmatprep.subr.bf16.mxu1 %v6832_v57  ;;  %v6858_v17 = vpack.c.bf16 %v2094_v48, %v2090_v23  ;;  %v6860_v5 = vpack.c.bf16 %v2096_v51, %v2092_v28  ;;  %v2120_v4 = vld [vmem:[#allocation5 + $0x178] sm:$0xff]  ;;  %7699 = vst [vmem:[#allocation16_spill] sm:$0xff] %v6896_v29  ;;  %v2115_v48 = vld [vmem:[#allocation5 + $0x150] sm:$0xff]  ;;  %v2122_v51 = vld [vmem:[#allocation5 + $0x188] sm:$0xff] }
 0x1a0   :  { %v6898_v23 = vpack.c.bf16 %v2120_v4, %v2116_v16  ;;  %v2119_v28 = vld [vmem:[#allocation5 + $0x170] sm:$0xff]  ;;  %v2128_v36 = vld [vmem:[#allocation5 + $0x1b8] sm:$0xff]  ;;  %v6908_v11 = vpack.c.bf16 %v2126_v3, %v2122_v51  ;;  %v2134_v42 = vld [vmem:[#allocation5 + $0x1e8] sm:$0xff]  ;;  %7702 = vst [vmem:[#allocation19_spill] sm:$0xff] %v6914_v61 }
 0x1a1   :  { %1972 = vmatmul.mubr.f32.vlgmr.msra.gmra.mrb[14].mxu0 %v1842_v14  ;;  %2043 = vmatmul.mubr.f32.vlgmr.msra.gmra.mrb[14].mxu1 %v1842_v14  ;;  %v2113_v14 = vld [vmem:[#allocation5 + $0x140] sm:$0xff]  ;;  %v6904_v46 = vpack.c.bf16 %v2119_v28, %v2115_v48  ;;  %v6910_v32 = vpack.c.bf16 %v2128_v36, %v2124_v7  ;;  %v2132_v45 = vld [vmem:[#allocation5 + $0x1d8] sm:$0xff]  ;;  %v6924_v28 = vpack.c.bf16 %v2134_v42, %v2130_v41  ;;  %v2131_v3 = vld [vmem:[#allocation5 + $0x1d0] sm:$0xff] }
 0x1a2   :  { %5148 = vmatpush1.bf16.msra.mxu0 %v6840_v12  ;;  %5180 = vmatpush1.bf16.msra.mxu1 %v6842_v13  ;;  %v6902_v37 = vpack.c.bf16 %v2117_v25, %v2113_v14  ;;  %7701 = vst [vmem:[#allocation18_spill] sm:$0xff] %v6908_v11  ;;  %v2136_v38 = vld [vmem:[#allocation5 + $0x1f8] sm:$0xff]  ;;  %v6920_v14 = vpack.c.bf16 %v2127_v19, %v2123_v33  ;;  %v2129_v25 = vld [vmem:[#allocation5 + $0x1c0] sm:$0xff]  ;;  %v2135_v7 = vld [vmem:[#allocation5 + $0x1f0] sm:$0xff] }
 0x1a3   :  { %5150 = vmatprep.subr.bf16.mxu0 %v6846_v20  ;;  %5182 = vmatprep.subr.bf16.mxu1 %v6848_v21  ;;  %v2133_v48 = vld [vmem:[#allocation5 + $0x1e0] sm:$0xff]  ;;  %7703 = vst [vmem:[#allocation20_spill] sm:$0xff] %v6924_v28  ;;  %v6926_v51 = vpack.c.bf16 %v2136_v38, %v2132_v45  ;;  %v6938_v19 = vpack.c.bf16 %v2135_v7, %v2131_v3 }
 0x1a4   :  { %2260 = vmatprep.mubr.f32.mxu0 %v7647_v1  ;;  %2331 = vmatprep.mubr.f32.mxu1 %v7647_v1  ;;  %7700 = vst [vmem:[#allocation17_spill] sm:$0xff] %v6902_v37  ;;  %v6928_v9 = vpack.c.bf16 %v2133_v48, %v2129_v25 }
 0x1a6   :  { %5152 = vmatpush1.bf16.msra.mxu0 %v6852_v0  ;;  %5184 = vmatpush1.bf16.msra.mxu1 %v6854_v2  ;;  %7704 = vst [vmem:[#allocation21_spill] sm:$0xff] %v6928_v9 }
 0x1a7   :  { %5154 = vmatprep.subr.bf16.mxu0 %v6858_v17  ;;  %5186 = vmatprep.subr.bf16.mxu1 %v6860_v5 }
 0x1aa   :  { %5156 = vmatpush1.bf16.msra.mxu0 %v6866_v24  ;;  %5188 = vmatpush1.bf16.msra.mxu1 %v6868_v27 }
 0x1ab   :  { %5158 = vmatprep.subr.bf16.mxu0 %v6872_v30  ;;  %5190 = vmatprep.subr.bf16.mxu1 %v6874_v34 }
 0x1ae   :  { %5160 = vmatpush1.bf16.msra.mxu0 %v6878_v49  ;;  %5192 = vmatpush1.bf16.msra.mxu1 %v6880_v50 }
 0x1af   :  { %5162 = vmatprep.subr.bf16.mxu0 %v6884_v58  ;;  %5194 = vmatprep.subr.bf16.mxu1 %v6886_v59 }
 0x1b2   :  { %5164 = vmatpush1.bf16.msra.mxu0 %v6890_v31  ;;  %5196 = vmatpush1.bf16.msra.mxu1 %v6892_v10 }
 0x1b3   :  { %5166 = vmatprep.subr.bf16.mxu0 %v6896_v29  ;;  %5198 = vmatprep.subr.bf16.mxu1 %v6898_v23 }
 0x1b4   :  { %v491_v52 = vpop.f32.mrb[2].mxu0  ;;  %v562_v56 = vpop.f32.mrb[2].mxu1 }
 0x1b5   :  { %v492_v43 = vadd.f32 %v491_v52, %v6793_v47  ;;  %v563_v60 = vadd.f32 %v562_v56, %v6795_v53  ;;  %v493_v8 = vpop.f32.mrb[3].mxu0  ;;  %v564_v15 = vpop.f32.mrb[3].mxu1  ;;  %v6949_v56 = vld [vmem:[%s7638_s5] sm:$0x3] }
 0x1b6   :  { %v494_v16 = vadd.f32 %v493_v8, %v6801_v54  ;;  %v565_v4 = vadd.f32 %v564_v15, %v6803_v63  ;;  %5168 = vmatpush1.bf16.msra.mxu0 %v6902_v37  ;;  %5200 = vmatpush1.bf16.msra.mxu1 %v6904_v46 }
 0x1b7   :  { %5170 = vmatprep.subr.bf16.mxu0 %v6908_v11  ;;  %5202 = vmatprep.subr.bf16.mxu1 %v6910_v32 }
 0x1b8   :  { %v571_v36 = vcombine.low %v492_v43, %v494_v16  ;;  %v572_v62 = vcombine.low %v563_v60, %v565_v4 }
 0x1ba   :  { %v6931_v52 = vrot.slane %v571_v36, %v6811_v26  ;;  %v6934_v33 = vrot.slane %v572_v62, %v6811_v26  ;;  %5172 = vmatpush1.bf16.msra.mxu0 %v6914_v61  ;;  %5204 = vmatpush1.bf16.msra.mxu1 %v6920_v14 }
 0x1bb   :  { %5174 = vmatprep.subr.bf16.mxu0 %v6924_v28  ;;  %5206 = vmatprep.subr.bf16.mxu1 %v6926_v51 }
 0x1be   :  { %5176 = vmatpush1.bf16.msra.mxu0 %v6928_v9  ;;  %5208 = vmatpush1.bf16.msra.mxu1 %v6938_v19 }
 0x1bf   :  { %5210 = vmatprep.subr.bf16.mxu0 %v6830_v44  ;;  %5242 = vmatprep.subr.bf16.mxu1 %v6832_v57 }
 0x1c1   :  { %2261 = vmatmul.mubr.f32.vlgmr.msra.gmra.mrb[16].mxu0 %v6949_v56  ;;  %2332 = vmatmul.mubr.f32.vlgmr.msra.gmra.mrb[16].mxu1 %v6949_v56 }
 0x1c2   :  { %5212 = vmatpush1.bf16.msra.mxu0 %v6840_v12  ;;  %5244 = vmatpush1.bf16.msra.mxu1 %v6842_v13 }
 0x1c3   :  { %5214 = vmatprep.subr.bf16.mxu0 %v6846_v20  ;;  %5246 = vmatprep.subr.bf16.mxu1 %v6848_v21 }
 0x1c4   :  { %2451 = vmatprep.mubr.f32.mxu0 %v7647_v1  ;;  %2522 = vmatprep.mubr.f32.mxu1 %v7647_v1 }
 0x1c6   :  { %5216 = vmatpush1.bf16.msra.mxu0 %v6852_v0  ;;  %5248 = vmatpush1.bf16.msra.mxu1 %v6854_v2 }
 0x1c7   :  { %5218 = vmatprep.subr.bf16.mxu0 %v6858_v17  ;;  %5250 = vmatprep.subr.bf16.mxu1 %v6860_v5 }
 0x1ca   :  { %5220 = vmatpush1.bf16.msra.mxu0 %v6866_v24  ;;  %5252 = vmatpush1.bf16.msra.mxu1 %v6868_v27 }
 0x1cb   :  { %5222 = vmatprep.subr.bf16.mxu0 %v6872_v30  ;;  %5254 = vmatprep.subr.bf16.mxu1 %v6874_v34 }
 0x1ce   :  { %5224 = vmatpush1.bf16.msra.mxu0 %v6878_v49  ;;  %5256 = vmatpush1.bf16.msra.mxu1 %v6880_v50 }
 0x1cf   :  { %5226 = vmatprep.subr.bf16.mxu0 %v6884_v58  ;;  %5258 = vmatprep.subr.bf16.mxu1 %v6886_v59 }
 0x1d2   :  { %5228 = vmatpush1.bf16.msra.mxu0 %v6890_v31  ;;  %5260 = vmatpush1.bf16.msra.mxu1 %v6892_v10 }
 0x1d3   :  { %5230 = vmatprep.subr.bf16.mxu0 %v6896_v29  ;;  %5262 = vmatprep.subr.bf16.mxu1 %v6898_v23 }
 0x1d4   :  { %v738_v42 = vpop.f32.mrb[4].mxu0  ;;  %v809_v45 = vpop.f32.mrb[4].mxu1 }
 0x1d5   :  { %v739_v38 = vadd.f32 %v738_v42, %v6793_v47  ;;  %v810_v43 = vadd.f32 %v809_v45, %v6795_v53  ;;  %v740_v60 = vpop.f32.mrb[5].mxu0  ;;  %v811_v8 = vpop.f32.mrb[5].mxu1 }
 0x1d6   :  { %v741_v15 = vadd.f32 %v740_v60, %v6801_v54  ;;  %v812_v16 = vadd.f32 %v811_v8, %v6803_v63  ;;  %5232 = vmatpush1.bf16.msra.mxu0 %v6902_v37  ;;  %5264 = vmatpush1.bf16.msra.mxu1 %v6904_v46 }
 0x1d7   :  { %5234 = vmatprep.subr.bf16.mxu0 %v6908_v11  ;;  %5266 = vmatprep.subr.bf16.mxu1 %v6910_v32 }
 0x1d8   :  { %v818_v4 = vcombine.low %v739_v38, %v741_v15  ;;  %v819_v25 = vcombine.low %v810_v43, %v812_v16 }
 0x1da   :  { %v6986_v48 = vrot.slane %v818_v4, %v6811_v26  ;;  %v6989_v3 = vrot.slane %v819_v25, %v6811_v26  ;;  %5236 = vmatpush1.bf16.msra.mxu0 %v6914_v61  ;;  %5268 = vmatpush1.bf16.msra.mxu1 %v6920_v14 }
 0x1db   :  { %5238 = vmatprep.subr.bf16.mxu0 %v6924_v28  ;;  %5270 = vmatprep.subr.bf16.mxu1 %v6926_v51 }
 0x1dc   :  { %7705 = vst [vmem:[#allocation22_spill] sm:$0xff] %v6986_v48  ;;  %7706 = vst [vmem:[#allocation23_spill] sm:$0xff] %v6989_v3 }
 0x1de   :  { %5240 = vmatpush1.bf16.msra.mxu0 %v6928_v9  ;;  %5272 = vmatpush1.bf16.msra.mxu1 %v6938_v19 }
 0x1df   :  { %5306 = vmatprep.subr.bf16.mxu1 %v6830_v44 }
 0x1f4   :  { %v985_v36 = vpop.f32.mrb[6].mxu0  ;;  %v1056_v62 = vpop.f32.mrb[6].mxu1 }
 0x1f5   :  { %v986_v42 = vadd.f32 %v985_v36, %v6793_v47  ;;  %v1057_v45 = vadd.f32 %v1056_v62, %v6795_v53  ;;  %v987_v38 = vpop.f32.mrb[7].mxu0  ;;  %v1058_v43 = vpop.f32.mrb[7].mxu1 }
 0x1f6   :  { %v988_v60 = vadd.f32 %v987_v38, %v6801_v54  ;;  %v1059_v8 = vadd.f32 %v1058_v43, %v6803_v63 }
 0x1f8   :  { %v1065_v15 = vcombine.low %v986_v42, %v988_v60  ;;  %v1066_v16 = vcombine.low %v1057_v45, %v1059_v8 }
 0x1fa   :  { %v7005_v4 = vrot.slane %v1065_v15, %v6811_v26  ;;  %v7008_v25 = vrot.slane %v1066_v16, %v6811_v26 }
 0x1fc   :  { %7707 = vst [vmem:[#allocation24_spill] sm:$0xff] %v7005_v4  ;;  %7708 = vst [vmem:[#allocation25_spill] sm:$0xff] %v7008_v25  ;;  %v2168_v25 = vld [vmem:[#allocation7 + $0xf8] sm:$0xff] }
 0x214   :  { %v1232_v36 = vpop.f32.mrb[8].mxu0  ;;  %v1303_v40 = vpop.f32.mrb[8].mxu1 }
 0x215   :  { %v1233_v62 = vadd.f32 %v1232_v36, %v6793_v47  ;;  %v1304_v7 = vadd.f32 %v1303_v40, %v6795_v53  ;;  %v1234_v38 = vpop.f32.mrb[9].mxu0  ;;  %v1305_v41 = vpop.f32.mrb[9].mxu1 }
 0x216   :  { %v1235_v42 = vadd.f32 %v1234_v38, %v6801_v54  ;;  %v1306_v45 = vadd.f32 %v1305_v41, %v6803_v63 }
 0x218   :  { %v1312_v43 = vcombine.low %v1233_v62, %v1235_v42  ;;  %v1313_v60 = vcombine.low %v1304_v7, %v1306_v45 }
 0x21a   :  { %v7017_v8 = vrot.slane %v1312_v43, %v6811_v26  ;;  %v7020_v15 = vrot.slane %v1313_v60, %v6811_v26 }
 0x21c   :  { %7709 = vst [vmem:[#allocation26_spill] sm:$0xff] %v7017_v8  ;;  %7710 = vst [vmem:[#allocation27_spill] sm:$0xff] %v7020_v15 }
 0x234   :  { %v1479_v36 = vpop.f32.mrb[10].mxu0  ;;  %v1550_v18 = vpop.f32.mrb[10].mxu1 }
 0x235   :  { %v1480_v40 = vadd.f32 %v1479_v36, %v6793_v47  ;;  %v1551_v1 = vadd.f32 %v1550_v18, %v6795_v53  ;;  %v1481_v38 = vpop.f32.mrb[11].mxu0  ;;  %v1552_v22 = vpop.f32.mrb[11].mxu1 }
 0x236   :  { %v1482_v41 = vadd.f32 %v1481_v38, %v6801_v54  ;;  %v1553_v7 = vadd.f32 %v1552_v22, %v6803_v63 }
 0x238   :  { %v1559_v62 = vcombine.low %v1480_v40, %v1482_v41  ;;  %v1560_v42 = vcombine.low %v1551_v1, %v1553_v7 }
 0x23a   :  { %v7029_v45 = vrot.slane %v1559_v62, %v6811_v26  ;;  %v7032_v43 = vrot.slane %v1560_v42, %v6811_v26 }
 0x23c   :  { %7711 = vst [vmem:[#allocation28_spill] sm:$0xff] %v7029_v45  ;;  %7712 = vst [vmem:[#allocation29_spill] sm:$0xff] %v7032_v43 }
 0x254   :  { %v1726_v36 = vpop.f32.mrb[12].mxu0  ;;  %v1797_v16 = vpop.f32.mrb[12].mxu1 }
 0x255   :  { %v1727_v18 = vadd.f32 %v1726_v36, %v6793_v47  ;;  %v1798_v15 = vadd.f32 %v1797_v16, %v6795_v53  ;;  %v1728_v38 = vpop.f32.mrb[13].mxu0  ;;  %v1799_v8 = vpop.f32.mrb[13].mxu1 }
 0x256   :  { %v1729_v22 = vadd.f32 %v1728_v38, %v6801_v54  ;;  %v1800_v1 = vadd.f32 %v1799_v8, %v6803_v63 }
 0x258   :  { %v1806_v40 = vcombine.low %v1727_v18, %v1729_v22  ;;  %v1807_v41 = vcombine.low %v1798_v15, %v1800_v1 }
 0x25a   :  { %v7041_v7 = vrot.slane %v1806_v40, %v6811_v26  ;;  %v7044_v62 = vrot.slane %v1807_v41, %v6811_v26 }
 0x25c   :  { %7713 = vst [vmem:[#allocation30_spill] sm:$0xff] %v7041_v7  ;;  %7714 = vst [vmem:[#allocation31_spill] sm:$0xff] %v7044_v62  ;;  %v2161_v62 = vld [vmem:[#allocation7 + $0xc0] sm:$0xff]  ;;  %v2166_v7 = vld [vmem:[#allocation7 + $0xe8] sm:$0xff] }
 0x274   :  { %v1973_v36 = vpop.f32.mrb[14].mxu0  ;;  %v2044_v60 = vpop.f32.mrb[14].mxu1 }
 0x275   :  { %v1974_v16 = vadd.f32 %v1973_v36, %v6793_v47  ;;  %v2045_v43 = vadd.f32 %v2044_v60, %v6795_v53  ;;  %v1975_v38 = vpop.f32.mrb[15].mxu0  ;;  %v2046_v45 = vpop.f32.mrb[15].mxu1  ;;  %v4625_v60 = vcombine.low %v6824_v35, %v6824_v35  ;;  %v7717_v36 = vcombine.low %v6821_v55, %v6824_v35 }
 0x276   :  { %v1976_v8 = vadd.f32 %v1975_v38, %v6801_v54  ;;  %v2047_v15 = vadd.f32 %v2046_v45, %v6803_v63 }
 0x277   :  { %v2182_v38 = vrot.slane %v7717_v36, %v6811_v26  ;;  %v2189_v45 = vrot.slane %v4625_v60, %v6811_v26 }
 0x278   :  { %v2053_v18 = vcombine.low %v1974_v16, %v1976_v8  ;;  %v2054_v22 = vcombine.low %v2045_v43, %v2047_v15 }
 0x279   :  { %v2190_v8 = vcombine.high %v2182_v38, %v2182_v38  ;;  %v2191_v15 = vcombine.high %v2189_v45, %v2189_v45 }
 0x27a   :  { %v7053_v1 = vrot.slane %v2053_v18, %v6811_v26  ;;  %v7056_v40 = vrot.slane %v2054_v22, %v6811_v26 }
 0x27c   :  { %7715 = vst [vmem:[#allocation32_spill] sm:$0xff] %v7053_v1  ;;  %7716 = vst [vmem:[#allocation33_spill] sm:$0xff] %v7056_v40 }
 0x294   :  { %v2262_v43 = vpop.f32.mrb[16].mxu0  ;;  %v2333_v16 = vpop.f32.mrb[16].mxu1 }
 0x295   :  { %v2263_v18 = vadd.f32 %v2262_v43, %v2182_v38  ;;  %v2334_v22 = vadd.f32 %v2333_v16, %v2189_v45  ;;  %v2264_v42 = vpop.f32.mrb[17].mxu0  ;;  %v2335_v63 = vpop.f32.mrb[17].mxu1 }
 0x296   :  { %v2265_v53 = vadd.f32 %v2264_v42, %v2190_v8  ;;  %v2336_v41 = vadd.f32 %v2335_v63, %v2191_v15  ;;  %v2171_v63 = vld [vmem:[%s7639_s6] sm:$0x3]  ;;  %v7718_v15 = vmov 0.0  }
 0x297   :  { %v4583_v47 = vmul.f32 -1.442695, %v2263_v18  ;;  %v4585_v40 = vmul.f32 -1.442695, %v2334_v22  ;;  %v2140_v18 = vld [vmem:[#allocation7 + $0x18] sm:$0xff] }
 0x298   :  { %v4584_v54 = vmul.f32 -1.442695, %v2265_v53 }
 0x299   :  { %5989 = vpow2.f32 %v4583_v47 }
 0x29a   :  { %5991 = vpow2.f32 %v4584_v54 }
 0x29b   :  { %5993 = vtanh.f32 %v2336_v41 }
 0x29c   :  { %5995 = vpow2.f32 %v4585_v40 }
 0x2a3   :  { %v5990_v1 = vpop.eup %5989 }
 0x2a4   :  { %v2347_v55 = vadd.f32 1.0, %v5990_v1  ;;  %v5992_v35 = vpop.eup %5991 }
 0x2a5   :  { %v2348_v60 = vadd.f32 1.0, %v5992_v35  ;;  %v5994_v36 = vpop.eup %5993  ;;  %v2139_v35 = vld [vmem:[#allocation7 + $0x10] sm:$0xff] }
 0x2a6   :  { %5997 = vrcp.f32 %v2347_v55  ;;  %v5996_v38 = vpop.eup %5995  ;;  %v2137_v55 = vld [vmem:[#allocation7] sm:$0xff] }
 0x2a7   :  { %5999 = vrcp.f32 %v2348_v60  ;;  %v2349_v47 = vadd.f32 1.0, %v5996_v38  ;;  %v7097_v60 = vpack.c.bf16 %v2139_v35, %v2137_v55  ;;  %v2144_v38 = vld [vmem:[#allocation7 + $0x38] sm:$0xff]  ;;  %v2149_v55 = vld [vmem:[#allocation7 + $0x60] sm:$0xff]  ;;  %v2151_v35 = vld [vmem:[#allocation7 + $0x70] sm:$0xff] }
 0x2a9   :  { %6001 = vrcp.f32 %v2349_v47  ;;  %v2146_v47 = vld [vmem:[#allocation7 + $0x48] sm:$0xff] }
 0x2b0   :  { %v5998_v45 = vpop.eup %5997 }
 0x2b1   :  { %v2358_v42 = vmul.f32 %v5998_v45, %v5994_v36  ;;  %v6000_v53 = vpop.eup %5999  ;;  %v2142_v36 = vld [vmem:[#allocation7 + $0x28] sm:$0xff] }
 0x2b2   :  { %v2357_v54 = vmul.f32 %v6000_v53, %v2171_v63  ;;  %v7102_v45 = vpack.c.bf16 %v2144_v38, %v2142_v36  ;;  %v7116_v36 = vpack.c.bf16 %v2151_v35, %v2149_v55  ;;  %v2154_v38 = vld [vmem:[#allocation7 + $0x88] sm:$0xff]  ;;  %v2157_v55 = vld [vmem:[#allocation7 + $0xa0] sm:$0xff]  ;;  %v2159_v35 = vld [vmem:[#allocation7 + $0xb0] sm:$0xff] }
 0x2b3   :  { %v6002_v41 = vpop.eup %6001  ;;  %v7128_v6 = vpack.c.bf16 %v2159_v35, %v2157_v55 }
 0x2b4   :  { %v2359_v1 = vadd.f32 %v2358_v42, %v2357_v54  ;;  %v2143_v42 = vld [vmem:[#allocation7 + $0x30] sm:$0xff]  ;;  %v2148_v54 = vld [vmem:[#allocation7 + $0x58] sm:$0xff] }
 0x2b6   :  { %6003 = vtanh.f32 %v2359_v1  ;;  %v7073_v40 = vsel %vm2172_vm0, %v2359_v1, %v2171_v63  ;;  %v2141_v63 = vld [vmem:[#allocation7 + $0x20] sm:$0xff]  ;;  %v7108_v1 = vpack.c.bf16 %v2148_v54, %v2146_v47  ;;  %v2155_v54 = vld [vmem:[#allocation7 + $0x90] sm:$0xff] }
 0x2b7   :  { %v7104_v53 = vpack.c.bf16 %v2143_v42, %v2141_v63  ;;  %v2156_v63 = vld [vmem:[#allocation7 + $0x98] sm:$0xff]  ;;  %v2153_v47 = vld [vmem:[#allocation7 + $0x80] sm:$0xff] }
 0x2b8   :  { %v7120_v42 = vpack.c.bf16 %v2156_v63, %v2154_v38  ;;  %v2162_v38 = vld [vmem:[#allocation7 + $0xc8] sm:$0xff]  ;;  %v2164_v63 = vld [vmem:[#allocation7 + $0xd8] sm:$0xff] }
 0x2c0   :  { %v6004_v43 = vpop.eup %6003 }
 0x2c1   :  { %v2361_v16 = vmul.f32 %v6004_v43, %v6002_v41  ;;  %v2145_v41 = vld [vmem:[#allocation7 + $0x40] sm:$0xff]  ;;  %v2147_v43 = vld [vmem:[#allocation7 + $0x50] sm:$0xff] }
 0x2c3   :  { %v2363_v8 = vsel %vm2172_vm0, %v2361_v16, %v6949_v56  ;;  %v2138_v56 = vld [vmem:[#allocation7 + $0x8] sm:$0xff]  ;;  %v7110_v16 = vpack.c.bf16 %v2147_v43, %v2145_v41  ;;  %v7122_v41 = vpack.c.bf16 %v2155_v54, %v2153_v47  ;;  %v7132_v47 = vpack.c.bf16 %v2164_v63, %v2162_v38  ;;  %v2163_v54 = vld [vmem:[#allocation7 + $0xd0] sm:$0xff] }
 0x2c4   :  { %2452 = vmatmul.mubr.f32.vlgmr.msra.gmra.mrb[18].mxu0 %v2363_v8  ;;  %2523 = vmatmul.mubr.f32.vlgmr.msra.gmra.mrb[18].mxu1 %v2363_v8  ;;  %v7095_v22 = vpack.c.bf16 %v2140_v18, %v2138_v56  ;;  %v2150_v8 = vld [vmem:[#allocation7 + $0x68] sm:$0xff]  ;;  %v2152_v56 = vld [vmem:[#allocation7 + $0x78] sm:$0xff]  ;;  %v7134_v4 = vpack.c.bf16 %v2163_v54, %v2161_v62  ;;  %v4626_v62 = vcombine.low %v6934_v33, %v6934_v33 }
 0x2c5   :  { %5308 = vmatpush1.bf16.msra.mxu1 %v6840_v12  ;;  %2628 = vmatprep.mubr.f32.mxu0 %v7718_v15  ;;  %v7114_v18 = vpack.c.bf16 %v2152_v56, %v2150_v8  ;;  %v2158_v43 = vld [vmem:[#allocation7 + $0xa8] sm:$0xff]  ;;  %v2160_v8 = vld [vmem:[#allocation7 + $0xb8] sm:$0xff] }
 0x2c6   :  { %5310 = vmatprep.subr.bf16.mxu1 %v6846_v20  ;;  %2734 = vmatprep.mubr.f32.mxu1 %v7718_v15  ;;  %7719 = vst [vmem:[#allocation34_spill] sm:$0xff] %v7095_v22  ;;  %v7126_v56 = vpack.c.bf16 %v2160_v8, %v2158_v43  ;;  %v7136_v43 = vpack.c.bf16 %v2168_v25, %v2166_v7  ;;  %v2165_v8 = vld [vmem:[#allocation7 + $0xe0] sm:$0xff] }
 0x2c7   :  { %5274 = vmatprep.subr.bf16.mxu0 %v7095_v22  ;;  %v7140_v55 = vpack.c.bf16 %v2167_v39, %v2165_v8  ;;  %v7720_v25 = vcombine.low %v6931_v52, %v6934_v33  ;;  %v2380_v35 = vrot.slane %v4626_v62, %v6811_v26 }
 0x2c8   :  { %5276 = vmatpush1.bf16.msra.mxu0 %v7097_v60 }
 0x2c9   :  { %5312 = vmatpush1.bf16.msra.mxu1 %v6852_v0  ;;  %5278 = vmatprep.subr.bf16.mxu0 %v7102_v45  ;;  %v2373_v7 = vrot.slane %v7720_v25, %v6811_v26  ;;  %v2382_v54 = vcombine.high %v2380_v35, %v2380_v35 }
 0x2ca   :  { %5314 = vmatprep.subr.bf16.mxu1 %v6858_v17 }
 0x2cb   :  { %v2381_v39 = vcombine.high %v2373_v7, %v2373_v7 }
 0x2cc   :  { %5280 = vmatpush1.bf16.msra.mxu0 %v7104_v53 }
 0x2cd   :  { %5316 = vmatpush1.bf16.msra.mxu1 %v6866_v24  ;;  %5282 = vmatprep.subr.bf16.mxu0 %v7108_v1 }
 0x2ce   :  { %5318 = vmatprep.subr.bf16.mxu1 %v6872_v30 }
 0x2d0   :  { %5284 = vmatpush1.bf16.msra.mxu0 %v7110_v16 }
 0x2d1   :  { %5320 = vmatpush1.bf16.msra.mxu1 %v6878_v49  ;;  %5286 = vmatprep.subr.bf16.mxu0 %v7114_v18 }
 0x2d2   :  { %5322 = vmatprep.subr.bf16.mxu1 %v6884_v58 }
 0x2d4   :  { %5288 = vmatpush1.bf16.msra.mxu0 %v7116_v36 }
 0x2d5   :  { %5324 = vmatpush1.bf16.msra.mxu1 %v6890_v31  ;;  %5290 = vmatprep.subr.bf16.mxu0 %v7120_v42 }
 0x2d6   :  { %5326 = vmatprep.subr.bf16.mxu1 %v6896_v29 }
 0x2d8   :  { %5292 = vmatpush1.bf16.msra.mxu0 %v7122_v41 }
 0x2d9   :  { %5328 = vmatpush1.bf16.msra.mxu1 %v6902_v37  ;;  %5294 = vmatprep.subr.bf16.mxu0 %v7126_v56 }
 0x2da   :  { %5330 = vmatprep.subr.bf16.mxu1 %v6908_v11 }
 0x2dc   :  { %5296 = vmatpush1.bf16.msra.mxu0 %v7128_v6 }
 0x2dd   :  { %5332 = vmatpush1.bf16.msra.mxu1 %v6914_v61  ;;  %5298 = vmatprep.subr.bf16.mxu0 %v7132_v47 }
 0x2de   :  { %5334 = vmatprep.subr.bf16.mxu1 %v6924_v28 }
 0x2e0   :  { %5300 = vmatpush1.bf16.msra.mxu0 %v7134_v4 }
 0x2e1   :  { %5336 = vmatpush1.bf16.msra.mxu1 %v6928_v9  ;;  %5302 = vmatprep.subr.bf16.mxu0 %v7136_v43 }
 0x2e2   :  { %5370 = vmatprep.subr.bf16.mxu1 %v7095_v22 }
 0x2e4   :  { %5304 = vmatpush1.bf16.msra.mxu0 %v7140_v55 }
 0x2e5   :  { %5338 = vmatprep.subr.bf16.mxu0 %v6832_v57 }
 0x397   :  { %v2453_v38 = vpop.f32.mrb[18].mxu0  ;;  %v2524_v63 = vpop.f32.mrb[18].mxu1 }
 0x398   :  { %v2454_v8 = vadd.f32 %v2453_v38, %v2373_v7  ;;  %v2525_v3 = vadd.f32 %v2524_v63, %v2380_v35  ;;  %v2455_v48 = vpop.f32.mrb[19].mxu0  ;;  %v2526_v22 = vpop.f32.mrb[19].mxu1 }
 0x399   :  { %v2456_v9 = vadd.f32 %v2455_v48, %v2381_v39  ;;  %v2527_v28 = vadd.f32 %v2526_v22, %v2382_v54  ;;  %v7725_v39 = vld [vmem:[#allocation20_spill] sm:$0xff]  ;;  %v7726_v54 = vld [vmem:[#allocation21_spill] sm:$0xff] }
 0x39a   :  { %v4586_v61 = vmul.f32 -1.442695, %v2454_v8  ;;  %v4588_v37 = vmul.f32 -1.442695, %v2525_v3  ;;  %v7723_v3 = vld [vmem:[#allocation18_spill] sm:$0xff] }
 0x39b   :  { %v4587_v11 = vmul.f32 -1.442695, %v2456_v9  ;;  %v7727_v8 = vld [vmem:[#allocation34_spill] sm:$0xff] }
 0x39c   :  { %6005 = vpow2.f32 %v4586_v61 }
 0x39d   :  { %6007 = vpow2.f32 %v4587_v11 }
 0x39e   :  { %6009 = vtanh.f32 %v2527_v28  ;;  %v7722_v28 = vld [vmem:[#allocation17_spill] sm:$0xff] }
 0x39f   :  { %6011 = vpow2.f32 %v4588_v37  ;;  %v7721_v37 = vld [vmem:[#allocation16_spill] sm:$0xff] }
 0x3a6   :  { %v6006_v29 = vpop.eup %6005 }
 0x3a7   :  { %v2538_v52 = vadd.f32 1.0, %v6006_v29  ;;  %v6008_v33 = vpop.eup %6007 }
 0x3a8   :  { %v2539_v62 = vadd.f32 1.0, %v6008_v33  ;;  %v6010_v25 = vpop.eup %6009  ;;  %v7728_v33 = vld [vmem:[#allocation22_spill] sm:$0xff] }
 0x3a9   :  { %6013 = vrcp.f32 %v2538_v52  ;;  %v6012_v7 = vpop.eup %6011  ;;  %v2169_v52 = vld [vmem:[%s7641_s8] sm:$0x3] }
 0x3aa   :  { %6015 = vrcp.f32 %v2539_v62  ;;  %v2540_v48 = vadd.f32 1.0, %v6012_v7  ;;  %v7729_v62 = vld [vmem:[#allocation23_spill] sm:$0xff] }
 0x3ac   :  { %6017 = vrcp.f32 %v2540_v48 }
 0x3b3   :  { %v6014_v35 = vpop.eup %6013 }
 0x3b4   :  { %v2549_v38 = vmul.f32 %v6014_v35, %v6010_v25  ;;  %v6016_v63 = vpop.eup %6015  ;;  %v7730_v25 = vcombine.low %v7728_v33, %v7729_v62  ;;  %v7731_v35 = vld [vmem:[#allocation11_spill] sm:$0xff] }
 0x3b5   :  { %v2548_v22 = vmul.f32 %v6016_v63, %v7073_v40  ;;  %v7724_v40 = vld [vmem:[#allocation19_spill] sm:$0xff]  ;;  %v7734_v48 = vsub.s32 1, %v7731_v35 }
 0x3b6   :  { %v6018_v29 = vpop.eup %6017  ;;  %v2656_v7 = vrot.slane %v7730_v25, %v6811_v26 }
 0x3b7   :  { %v7153_v9 = vadd.f32 %v2549_v38, %v2548_v22  ;;  %v7732_v38 = vsub.s32 0, %v7731_v35  ;;  %v7220_v22 = vrot.slane %v2169_v52, %v7734_v48 }
 0x3b9   :  { %6019 = vtanh.f32 %v7153_v9  ;;  %v7216_v63 = vrot.slane %v2169_v52, %v7732_v38  ;;  %7735 = vst [vmem:[#allocation17_spill] sm:$0xff] %v7220_v22  ;;  %v4627_v52 = vcombine.low %v7729_v62, %v7729_v62 }
 0x3bb   :  { %7733 = vst [vmem:[#allocation16_spill] sm:$0xff] %v7216_v63 }
 0x3c3   :  { %v6020_v11 = vpop.eup %6019 }
 0x3c4   :  { %v2552_v61 = vmul.f32 %v6020_v11, %v6018_v29 }
 0x3c6   :  { %2629 = vmatmul.mubr.f32.vlgmr.msra.gmra.mrb[20].mxu0 %v2552_v61  ;;  %2735 = vmatmul.mubr.f32.vlgmr.msra.gmra.mrb[20].mxu1 %v2552_v61 }
 0x3c7   :  { %5340 = vmatpush1.bf16.msra.mxu0 %v6842_v13  ;;  %2805 = vmatprep.mubr.f32.mxu0 %v7718_v15 }
 0x3c8   :  { %5342 = vmatprep.subr.bf16.mxu0 %v6848_v21  ;;  %5372 = vmatpush1.bf16.msra.mxu1 %v7097_v60 }
 0x3c9   :  { %5374 = vmatprep.subr.bf16.mxu1 %v7102_v45  ;;  %2900 = vmatprep.mubr.f32.mxu1 %v7718_v15 }
 0x3cb   :  { %5344 = vmatpush1.bf16.msra.mxu0 %v6854_v2 }
 0x3cc   :  { %5346 = vmatprep.subr.bf16.mxu0 %v6860_v5  ;;  %5376 = vmatpush1.bf16.msra.mxu1 %v7104_v53 }
 0x3cd   :  { %5378 = vmatprep.subr.bf16.mxu1 %v7108_v1 }
 0x3cf   :  { %5348 = vmatpush1.bf16.msra.mxu0 %v6868_v27 }
 0x3d0   :  { %5350 = vmatprep.subr.bf16.mxu0 %v6874_v34  ;;  %5380 = vmatpush1.bf16.msra.mxu1 %v7110_v16 }
 0x3d1   :  { %5382 = vmatprep.subr.bf16.mxu1 %v7114_v18 }
 0x3d3   :  { %5352 = vmatpush1.bf16.msra.mxu0 %v6880_v50 }
 0x3d4   :  { %5354 = vmatprep.subr.bf16.mxu0 %v6886_v59  ;;  %5384 = vmatpush1.bf16.msra.mxu1 %v7116_v36 }
 0x3d5   :  { %5386 = vmatprep.subr.bf16.mxu1 %v7120_v42 }
 0x3d7   :  { %5356 = vmatpush1.bf16.msra.mxu0 %v6892_v10 }
 0x3d8   :  { %5358 = vmatprep.subr.bf16.mxu0 %v6898_v23  ;;  %5388 = vmatpush1.bf16.msra.mxu1 %v7122_v41 }
 0x3d9   :  { %5390 = vmatprep.subr.bf16.mxu1 %v7126_v56 }
 0x3db   :  { %5360 = vmatpush1.bf16.msra.mxu0 %v6904_v46 }
 0x3dc   :  { %5362 = vmatprep.subr.bf16.mxu0 %v6910_v32  ;;  %5392 = vmatpush1.bf16.msra.mxu1 %v7128_v6 }
 0x3dd   :  { %5394 = vmatprep.subr.bf16.mxu1 %v7132_v47 }
 0x3df   :  { %5364 = vmatpush1.bf16.msra.mxu0 %v6920_v14 }
 0x3e0   :  { %5366 = vmatprep.subr.bf16.mxu0 %v6926_v51  ;;  %5396 = vmatpush1.bf16.msra.mxu1 %v7134_v4 }
 0x3e1   :  { %5398 = vmatprep.subr.bf16.mxu1 %v7136_v43 }
 0x3e3   :  { %5368 = vmatpush1.bf16.msra.mxu0 %v6938_v19 }
 0x3e4   :  { %5402 = vmatprep.subr.bf16.mxu0 %v6830_v44  ;;  %5400 = vmatpush1.bf16.msra.mxu1 %v7140_v55 }
 0x3e5   :  { %5434 = vmatprep.subr.bf16.mxu1 %v6832_v57 }
 0x3e6   :  { %2806 = vmatmul.mubr.f32.vlgmr.msra.gmra.mrb[22].mxu0 %v2552_v61  ;;  %v2664_v61 = vcombine.high %v2656_v7, %v2656_v7 }
 0x3e7   :  { %5404 = vmatpush1.bf16.msra.mxu0 %v6840_v12  ;;  %3007 = vmatprep.mubr.f32.mxu0 %v7718_v15 }
 0x3e8   :  { %5406 = vmatprep.subr.bf16.mxu0 %v6846_v20 }
 0x3eb   :  { %5408 = vmatpush1.bf16.msra.mxu0 %v6852_v0 }
 0x3ec   :  { %5410 = vmatprep.subr.bf16.mxu0 %v6858_v17 }
 0x3ef   :  { %5412 = vmatpush1.bf16.msra.mxu0 %v6866_v24 }
 0x3f0   :  { %5414 = vmatprep.subr.bf16.mxu0 %v6872_v30 }
 0x3f3   :  { %5416 = vmatpush1.bf16.msra.mxu0 %v6878_v49 }
 0x3f4   :  { %5418 = vmatprep.subr.bf16.mxu0 %v6884_v58 }
 0x3f7   :  { %5420 = vmatpush1.bf16.msra.mxu0 %v6890_v31 }
 0x3f8   :  { %5422 = vmatprep.subr.bf16.mxu0 %v7721_v37 }
 0x3fb   :  { %5424 = vmatpush1.bf16.msra.mxu0 %v7722_v28 }
 0x3fc   :  { %5426 = vmatprep.subr.bf16.mxu0 %v7723_v3 }
 0x3ff   :  { %5428 = vmatpush1.bf16.msra.mxu0 %v7724_v40 }
 0x400   :  { %5430 = vmatprep.subr.bf16.mxu0 %v7725_v39 }
 0x403   :  { %5432 = vmatpush1.bf16.msra.mxu0 %v7726_v54 }
 0x404   :  { %5466 = vmatprep.subr.bf16.mxu0 %v7727_v8 }
 0x499   :  { %v2630_v29 = vpop.f32.mrb[20].mxu0  ;;  %v2736_v11 = vpop.f32.mrb[20].mxu1 }
 0x49a   :  { %v2631_v8 = vadd.f32 %v2630_v29, %v7216_v63  ;;  %v2737_v54 = vadd.f32 %v2736_v11, %v2656_v7  ;;  %v2632_v39 = vpop.f32.mrb[21].mxu0  ;;  %v2738_v40 = vpop.f32.mrb[21].mxu1  ;;  %v2663_v7 = vrot.slane %v4627_v52, %v6811_v26 }
 0x49b   :  { %v2633_v3 = vadd.f32 %v2632_v39, %v7220_v22  ;;  %v2739_v33 = vadd.f32 %v2738_v40, %v2664_v61 }
 0x49c   :  { %v4590_v35 = vmul.f32 -1.442695, %v2737_v54  ;;  %v2665_v40 = vcombine.high %v2663_v7, %v2663_v7 }
 0x49d   :  { %v2637_v25 = vcombine.low %v2631_v8, %v2633_v3  ;;  %v4591_v38 = vmul.f32 -1.442695, %v2739_v33 }
 0x49f   :  { %4589 = vst.sshfl [vmem:[%s7642_s9] sm:$0x33 pattern:$0x76325410] %v2637_v25  ;;  %6021 = vpow2.f32 %v4591_v38 }
 0x4a0   :  { %6023 = vpow2.f32 %v4590_v35 }
 0x4a9   :  { %v6022_v48 = vpop.eup %6021 }
 0x4aa   :  { %v6024_v29 = vpop.eup %6023  ;;  %v2822_v11 = vadd.f32 1.0, %v6022_v48 }
 0x4ab   :  { %v2821_v63 = vadd.f32 1.0, %v6024_v29 }
 0x4ac   :  { %6025 = vrcp.f32 %v2822_v11 }
 0x4ad   :  { %6027 = vrcp.f32 %v2821_v63  ;;  %v7737_v63 = vld [vmem:[#allocation19_spill] sm:$0xff] }
 0x4b6   :  { %v6026_v54 = vpop.eup %6025 }
 0x4b7   :  { %v6028_v25 = vpop.eup %6027  ;;  %v2831_v35 = vmul.f32 %v6026_v54, %v7153_v9  ;;  %v7736_v9 = vld [vmem:[#allocation18_spill] sm:$0xff] }
 0x4b9   :  { %v2807_v39 = vpop.f32.mrb[22].mxu0 }
 0x4ba   :  { %v2808_v3 = vadd.f32 %v2807_v39, %v2663_v7  ;;  %v2809_v8 = vpop.f32.mrb[23].mxu0  ;;  %v7739_v39 = vld [vmem:[#allocation21_spill] sm:$0xff] }
 0x4bb   :  { %v2810_v61 = vadd.f32 %v2809_v8, %v2665_v40  ;;  %v7740_v40 = vld [vmem:[#allocation34_spill] sm:$0xff]  ;;  %v7742_v8 = vld [vmem:[#allocation25_spill] sm:$0xff] }
 0x4bc   :  { %v4592_v33 = vmul.f32 -1.442695, %v2808_v3  ;;  %v7741_v3 = vld [vmem:[#allocation24_spill] sm:$0xff] }
 0x4bd   :  { %6029 = vtanh.f32 %v2810_v61  ;;  %v7743_v61 = vcombine.low %v7741_v3, %v7742_v8  ;;  %v4628_v3 = vcombine.low %v7742_v8, %v7742_v8 }
 0x4be   :  { %6031 = vpow2.f32 %v4592_v33 }
 0x4bf   :  { %v2929_v33 = vrot.slane %v7743_v61, %v6811_v26 }
 0x4c7   :  { %v6030_v38 = vpop.eup %6029 }
 0x4c8   :  { %v6032_v62 = vpop.eup %6031  ;;  %v2832_v22 = vmul.f32 %v6030_v38, %v6028_v25  ;;  %v2937_v38 = vcombine.high %v2929_v33, %v2929_v33 }
 0x4c9   :  { %v2823_v52 = vadd.f32 1.0, %v6032_v62  ;;  %v7744_v62 = vld [vmem:[#allocation16_spill] sm:$0xff] }
 0x4ca   :  { %v7231_v48 = vadd.f32 %v2832_v22, %v2831_v35  ;;  %v7738_v22 = vld [vmem:[#allocation20_spill] sm:$0xff] }
 0x4cb   :  { %6033 = vrcp.f32 %v2823_v52 }
 0x4cc   :  { %6035 = vtanh.f32 %v7231_v48 }
 0x4d5   :  { %v6034_v29 = vpop.eup %6033 }
 0x4d6   :  { %v6036_v7 = vpop.eup %6035 }
 0x4d7   :  { %v2835_v11 = vmul.f32 %v6036_v7, %v6034_v29 }
 0x4d9   :  { %2901 = vmatmul.mubr.f32.vlgmr.msra.gmra.mrb[22].mxu1 %v2835_v11  ;;  %3008 = vmatmul.mubr.f32.vlgmr.msra.gmra.mrb[24].mxu0 %v2835_v11 }
 0x4da   :  { %5436 = vmatpush1.bf16.msra.mxu1 %v6842_v13  ;;  %3078 = vmatprep.mubr.f32.mxu1 %v7718_v15 }
 0x4db   :  { %5438 = vmatprep.subr.bf16.mxu1 %v6848_v21  ;;  %5468 = vmatpush1.bf16.msra.mxu0 %v7097_v60 }
 0x4dc   :  { %5470 = vmatprep.subr.bf16.mxu0 %v7102_v45  ;;  %3173 = vmatprep.mubr.f32.mxu0 %v7718_v15 }
 0x4de   :  { %5440 = vmatpush1.bf16.msra.mxu1 %v6854_v2 }
 0x4df   :  { %5442 = vmatprep.subr.bf16.mxu1 %v6860_v5  ;;  %5472 = vmatpush1.bf16.msra.mxu0 %v7104_v53 }
 0x4e0   :  { %5474 = vmatprep.subr.bf16.mxu0 %v7108_v1 }
 0x4e2   :  { %5444 = vmatpush1.bf16.msra.mxu1 %v6868_v27 }
 0x4e3   :  { %5446 = vmatprep.subr.bf16.mxu1 %v6874_v34  ;;  %5476 = vmatpush1.bf16.msra.mxu0 %v7110_v16 }
 0x4e4   :  { %5478 = vmatprep.subr.bf16.mxu0 %v7114_v18 }
 0x4e6   :  { %5448 = vmatpush1.bf16.msra.mxu1 %v6880_v50 }
 0x4e7   :  { %5450 = vmatprep.subr.bf16.mxu1 %v6886_v59  ;;  %5480 = vmatpush1.bf16.msra.mxu0 %v7116_v36 }
 0x4e8   :  { %5482 = vmatprep.subr.bf16.mxu0 %v7120_v42 }
 0x4ea   :  { %5452 = vmatpush1.bf16.msra.mxu1 %v6892_v10 }
 0x4eb   :  { %5454 = vmatprep.subr.bf16.mxu1 %v6898_v23  ;;  %5484 = vmatpush1.bf16.msra.mxu0 %v7122_v41 }
 0x4ec   :  { %5486 = vmatprep.subr.bf16.mxu0 %v7126_v56 }
 0x4ee   :  { %5456 = vmatpush1.bf16.msra.mxu1 %v6904_v46 }
 0x4ef   :  { %5458 = vmatprep.subr.bf16.mxu1 %v6910_v32  ;;  %5488 = vmatpush1.bf16.msra.mxu0 %v7128_v6 }
 0x4f0   :  { %5490 = vmatprep.subr.bf16.mxu0 %v7132_v47 }
 0x4f2   :  { %5460 = vmatpush1.bf16.msra.mxu1 %v6920_v14 }
 0x4f3   :  { %5462 = vmatprep.subr.bf16.mxu1 %v6926_v51  ;;  %5492 = vmatpush1.bf16.msra.mxu0 %v7134_v4 }
 0x4f4   :  { %5494 = vmatprep.subr.bf16.mxu0 %v7136_v43 }
 0x4f6   :  { %5464 = vmatpush1.bf16.msra.mxu1 %v6938_v19 }
 0x4f7   :  { %5498 = vmatprep.subr.bf16.mxu1 %v6830_v44  ;;  %5496 = vmatpush1.bf16.msra.mxu0 %v7140_v55 }
 0x4f8   :  { %5530 = vmatprep.subr.bf16.mxu0 %v6832_v57 }
 0x4f9   :  { %3079 = vmatmul.mubr.f32.vlgmr.msra.gmra.mrb[24].mxu1 %v2835_v11  ;;  %v7745_v11 = vld [vmem:[#allocation17_spill] sm:$0xff] }
 0x4fa   :  { %5500 = vmatpush1.bf16.msra.mxu1 %v6840_v12  ;;  %3280 = vmatprep.mubr.f32.mxu1 %v7718_v15 }
 0x4fb   :  { %5502 = vmatprep.subr.bf16.mxu1 %v6846_v20 }
 0x4fe   :  { %5504 = vmatpush1.bf16.msra.mxu1 %v6852_v0 }
 0x4ff   :  { %5506 = vmatprep.subr.bf16.mxu1 %v6858_v17 }
 0x502   :  { %5508 = vmatpush1.bf16.msra.mxu1 %v6866_v24 }
 0x503   :  { %5510 = vmatprep.subr.bf16.mxu1 %v6872_v30 }
 0x506   :  { %5512 = vmatpush1.bf16.msra.mxu1 %v6878_v49 }
 0x507   :  { %5514 = vmatprep.subr.bf16.mxu1 %v6884_v58 }
 0x50a   :  { %5516 = vmatpush1.bf16.msra.mxu1 %v6890_v31 }
 0x50b   :  { %5518 = vmatprep.subr.bf16.mxu1 %v7721_v37 }
 0x50e   :  { %5520 = vmatpush1.bf16.msra.mxu1 %v7722_v28 }
 0x50f   :  { %5522 = vmatprep.subr.bf16.mxu1 %v7736_v9 }
 0x512   :  { %5524 = vmatpush1.bf16.msra.mxu1 %v7737_v63 }
 0x513   :  { %5526 = vmatprep.subr.bf16.mxu1 %v7738_v22 }
 0x516   :  { %5528 = vmatpush1.bf16.msra.mxu1 %v7739_v39 }
 0x517   :  { %5562 = vmatprep.subr.bf16.mxu1 %v7740_v40 }
 0x5ac   :  { %v2902_v54 = vpop.f32.mrb[22].mxu1  ;;  %v3009_v25 = vpop.f32.mrb[24].mxu0 }
 0x5ad   :  { %v2903_v35 = vadd.f32 %v2902_v54, %v7744_v62  ;;  %v3010_v52 = vadd.f32 %v3009_v25, %v2929_v33  ;;  %v2904_v29 = vpop.f32.mrb[23].mxu1  ;;  %v3011_v7 = vpop.f32.mrb[25].mxu0  ;;  %v2936_v33 = vrot.slane %v4628_v3, %v6811_v26 }
 0x5ae   :  { %v2905_v63 = vadd.f32 %v2904_v29, %v7745_v11  ;;  %v3012_v22 = vadd.f32 %v3011_v7, %v2937_v38 }
 0x5af   :  { %v4594_v39 = vmul.f32 -1.442695, %v3010_v52  ;;  %v2938_v38 = vcombine.high %v2936_v33, %v2936_v33 }
 0x5b0   :  { %v2909_v9 = vcombine.low %v2903_v35, %v2905_v63  ;;  %v4595_v40 = vmul.f32 -1.442695, %v3012_v22 }
 0x5b2   :  { %4618 = vst.sshfl [vmem:[%s7642_s9 + $0x4] sm:$0x33 pattern:$0x76325410] %v2909_v9  ;;  %6037 = vpow2.f32 %v4595_v40 }
 0x5b3   :  { %6039 = vpow2.f32 %v4594_v39 }
 0x5bc   :  { %v6038_v61 = vpop.eup %6037 }
 0x5bd   :  { %v6040_v54 = vpop.eup %6039  ;;  %v3095_v25 = vadd.f32 1.0, %v6038_v61 }
 0x5be   :  { %v3094_v62 = vadd.f32 1.0, %v6040_v54 }
 0x5bf   :  { %6041 = vrcp.f32 %v3095_v25 }
 0x5c0   :  { %6043 = vrcp.f32 %v3094_v62  ;;  %v7747_v62 = vld [vmem:[#allocation19_spill] sm:$0xff] }
 0x5c9   :  { %v6042_v22 = vpop.eup %6041 }
 0x5ca   :  { %v6044_v39 = vpop.eup %6043  ;;  %v3104_v52 = vmul.f32 %v6042_v22, %v7231_v48  ;;  %v7746_v48 = vld [vmem:[#allocation18_spill] sm:$0xff] }
 0x5cc   :  { %v3080_v29 = vpop.f32.mrb[24].mxu1 }
 0x5cd   :  { %v3081_v63 = vadd.f32 %v3080_v29, %v2936_v33  ;;  %v3082_v35 = vpop.f32.mrb[25].mxu1  ;;  %v7749_v29 = vld [vmem:[#allocation21_spill] sm:$0xff] }
 0x5ce   :  { %v3083_v7 = vadd.f32 %v3082_v35, %v2938_v38  ;;  %v7750_v38 = vld [vmem:[#allocation34_spill] sm:$0xff]  ;;  %v7752_v35 = vld [vmem:[#allocation27_spill] sm:$0xff] }
 0x5cf   :  { %v4596_v9 = vmul.f32 -1.442695, %v3081_v63  ;;  %v7751_v63 = vld [vmem:[#allocation26_spill] sm:$0xff] }
 0x5d0   :  { %6045 = vtanh.f32 %v3083_v7  ;;  %v7753_v7 = vcombine.low %v7751_v63, %v7752_v35  ;;  %v4629_v63 = vcombine.low %v7752_v35, %v7752_v35 }
 0x5d1   :  { %6047 = vpow2.f32 %v4596_v9 }
 0x5d2   :  { %v3202_v9 = vrot.slane %v7753_v7, %v6811_v26 }
 0x5da   :  { %v6046_v40 = vpop.eup %6045 }
 0x5db   :  { %v6048_v8 = vpop.eup %6047  ;;  %v3105_v11 = vmul.f32 %v6046_v40, %v6044_v39  ;;  %v3210_v40 = vcombine.high %v3202_v9, %v3202_v9 }
 0x5dc   :  { %v3096_v3 = vadd.f32 1.0, %v6048_v8  ;;  %v7754_v8 = vld [vmem:[#allocation16_spill] sm:$0xff] }
 0x5dd   :  { %v7298_v61 = vadd.f32 %v3105_v11, %v3104_v52  ;;  %v7748_v11 = vld [vmem:[#allocation20_spill] sm:$0xff] }
 0x5de   :  { %6049 = vrcp.f32 %v3096_v3 }
 0x5df   :  { %6051 = vtanh.f32 %v7298_v61 }
 0x5e8   :  { %v6050_v54 = vpop.eup %6049 }
 0x5e9   :  { %v6052_v33 = vpop.eup %6051 }
 0x5ea   :  { %v3108_v25 = vmul.f32 %v6052_v33, %v6050_v54 }
 0x5ec   :  { %3174 = vmatmul.mubr.f32.vlgmr.msra.gmra.mrb[26].mxu0 %v3108_v25  ;;  %3281 = vmatmul.mubr.f32.vlgmr.msra.gmra.mrb[26].mxu1 %v3108_v25 }
 0x5ed   :  { %5532 = vmatpush1.bf16.msra.mxu0 %v6842_v13  ;;  %3351 = vmatprep.mubr.f32.mxu0 %v7718_v15 }
 0x5ee   :  { %5534 = vmatprep.subr.bf16.mxu0 %v6848_v21  ;;  %5564 = vmatpush1.bf16.msra.mxu1 %v7097_v60 }
 0x5ef   :  { %5566 = vmatprep.subr.bf16.mxu1 %v7102_v45  ;;  %3446 = vmatprep.mubr.f32.mxu1 %v7718_v15 }
 0x5f1   :  { %5536 = vmatpush1.bf16.msra.mxu0 %v6854_v2 }
 0x5f2   :  { %5538 = vmatprep.subr.bf16.mxu0 %v6860_v5  ;;  %5568 = vmatpush1.bf16.msra.mxu1 %v7104_v53 }
 0x5f3   :  { %5570 = vmatprep.subr.bf16.mxu1 %v7108_v1 }
 0x5f5   :  { %5540 = vmatpush1.bf16.msra.mxu0 %v6868_v27 }
 0x5f6   :  { %5542 = vmatprep.subr.bf16.mxu0 %v6874_v34  ;;  %5572 = vmatpush1.bf16.msra.mxu1 %v7110_v16 }
 0x5f7   :  { %5574 = vmatprep.subr.bf16.mxu1 %v7114_v18 }
 0x5f9   :  { %5544 = vmatpush1.bf16.msra.mxu0 %v6880_v50 }
 0x5fa   :  { %5546 = vmatprep.subr.bf16.mxu0 %v6886_v59  ;;  %5576 = vmatpush1.bf16.msra.mxu1 %v7116_v36 }
 0x5fb   :  { %5578 = vmatprep.subr.bf16.mxu1 %v7120_v42 }
 0x5fd   :  { %5548 = vmatpush1.bf16.msra.mxu0 %v6892_v10 }
 0x5fe   :  { %5550 = vmatprep.subr.bf16.mxu0 %v6898_v23  ;;  %5580 = vmatpush1.bf16.msra.mxu1 %v7122_v41 }
 0x5ff   :  { %5582 = vmatprep.subr.bf16.mxu1 %v7126_v56 }
 0x601   :  { %5552 = vmatpush1.bf16.msra.mxu0 %v6904_v46 }
 0x602   :  { %5554 = vmatprep.subr.bf16.mxu0 %v6910_v32  ;;  %5584 = vmatpush1.bf16.msra.mxu1 %v7128_v6 }
 0x603   :  { %5586 = vmatprep.subr.bf16.mxu1 %v7132_v47 }
 0x605   :  { %5556 = vmatpush1.bf16.msra.mxu0 %v6920_v14 }
 0x606   :  { %5558 = vmatprep.subr.bf16.mxu0 %v6926_v51  ;;  %5588 = vmatpush1.bf16.msra.mxu1 %v7134_v4 }
 0x607   :  { %5590 = vmatprep.subr.bf16.mxu1 %v7136_v43 }
 0x609   :  { %5560 = vmatpush1.bf16.msra.mxu0 %v6938_v19 }
 0x60a   :  { %5594 = vmatprep.subr.bf16.mxu0 %v6830_v44  ;;  %5592 = vmatpush1.bf16.msra.mxu1 %v7140_v55 }
 0x60b   :  { %5626 = vmatprep.subr.bf16.mxu1 %v6832_v57 }
 0x60c   :  { %3352 = vmatmul.mubr.f32.vlgmr.msra.gmra.mrb[28].mxu0 %v3108_v25  ;;  %v7755_v25 = vld [vmem:[#allocation17_spill] sm:$0xff] }
 0x60d   :  { %5596 = vmatpush1.bf16.msra.mxu0 %v6840_v12  ;;  %3553 = vmatprep.mubr.f32.mxu0 %v7718_v15 }
 0x60e   :  { %5598 = vmatprep.subr.bf16.mxu0 %v6846_v20 }
 0x611   :  { %5600 = vmatpush1.bf16.msra.mxu0 %v6852_v0 }
 0x612   :  { %5602 = vmatprep.subr.bf16.mxu0 %v6858_v17 }
 0x615   :  { %5604 = vmatpush1.bf16.msra.mxu0 %v6866_v24 }
 0x616   :  { %5606 = vmatprep.subr.bf16.mxu0 %v6872_v30 }
 0x619   :  { %5608 = vmatpush1.bf16.msra.mxu0 %v6878_v49 }
 0x61a   :  { %5610 = vmatprep.subr.bf16.mxu0 %v6884_v58 }
 0x61d   :  { %5612 = vmatpush1.bf16.msra.mxu0 %v6890_v31 }
 0x61e   :  { %5614 = vmatprep.subr.bf16.mxu0 %v7721_v37 }
 0x621   :  { %5616 = vmatpush1.bf16.msra.mxu0 %v7722_v28 }
 0x622   :  { %5618 = vmatprep.subr.bf16.mxu0 %v7746_v48 }
 0x625   :  { %5620 = vmatpush1.bf16.msra.mxu0 %v7747_v62 }
 0x626   :  { %5622 = vmatprep.subr.bf16.mxu0 %v7748_v11 }
 0x629   :  { %5624 = vmatpush1.bf16.msra.mxu0 %v7749_v29 }
 0x62a   :  { %5658 = vmatprep.subr.bf16.mxu0 %v7750_v38 }
 0x6bf   :  { %v3175_v22 = vpop.f32.mrb[26].mxu0  ;;  %v3282_v39 = vpop.f32.mrb[26].mxu1 }
 0x6c0   :  { %v3176_v52 = vadd.f32 %v3175_v22, %v7754_v8  ;;  %v3283_v3 = vadd.f32 %v3282_v39, %v3202_v9  ;;  %v3177_v54 = vpop.f32.mrb[27].mxu0  ;;  %v3284_v33 = vpop.f32.mrb[27].mxu1  ;;  %v3209_v9 = vrot.slane %v4629_v63, %v6811_v26 }
 0x6c1   :  { %v3178_v62 = vadd.f32 %v3177_v54, %v7755_v25  ;;  %v3285_v11 = vadd.f32 %v3284_v33, %v3210_v40 }
 0x6c2   :  { %v4598_v29 = vmul.f32 -1.442695, %v3283_v3  ;;  %v3211_v40 = vcombine.high %v3209_v9, %v3209_v9 }
 0x6c3   :  { %v3182_v48 = vcombine.low %v3176_v52, %v3178_v62  ;;  %v4599_v38 = vmul.f32 -1.442695, %v3285_v11 }
 0x6c5   :  { %4619 = vst.sshfl [vmem:[%s7642_s9 + $0x8] sm:$0x33 pattern:$0x76325410] %v3182_v48  ;;  %6053 = vpow2.f32 %v4599_v38 }
 0x6c6   :  { %6055 = vpow2.f32 %v4598_v29 }
 0x6cf   :  { %v6054_v7 = vpop.eup %6053 }
 0x6d0   :  { %v6056_v22 = vpop.eup %6055  ;;  %v3368_v39 = vadd.f32 1.0, %v6054_v7 }
 0x6d1   :  { %v3367_v8 = vadd.f32 1.0, %v6056_v22 }
 0x6d2   :  { %6057 = vrcp.f32 %v3368_v39 }
 0x6d3   :  { %6059 = vrcp.f32 %v3367_v8  ;;  %v7757_v8 = vld [vmem:[#allocation19_spill] sm:$0xff] }
 0x6dc   :  { %v6058_v11 = vpop.eup %6057 }
 0x6dd   :  { %v6060_v29 = vpop.eup %6059  ;;  %v3377_v3 = vmul.f32 %v6058_v11, %v7298_v61  ;;  %v7756_v61 = vld [vmem:[#allocation18_spill] sm:$0xff] }
 0x6df   :  { %v3353_v54 = vpop.f32.mrb[28].mxu0 }
 0x6e0   :  { %v3354_v62 = vadd.f32 %v3353_v54, %v3209_v9  ;;  %v3355_v52 = vpop.f32.mrb[29].mxu0  ;;  %v7759_v54 = vld [vmem:[#allocation21_spill] sm:$0xff] }
 0x6e1   :  { %v3356_v33 = vadd.f32 %v3355_v52, %v3211_v40  ;;  %v7760_v40 = vld [vmem:[#allocation34_spill] sm:$0xff]  ;;  %v7762_v52 = vld [vmem:[#allocation29_spill] sm:$0xff] }
 0x6e2   :  { %v4600_v48 = vmul.f32 -1.442695, %v3354_v62  ;;  %v7761_v62 = vld [vmem:[#allocation28_spill] sm:$0xff] }
 0x6e3   :  { %6061 = vtanh.f32 %v3356_v33  ;;  %v7763_v33 = vcombine.low %v7761_v62, %v7762_v52  ;;  %v4630_v62 = vcombine.low %v7762_v52, %v7762_v52 }
 0x6e4   :  { %6063 = vpow2.f32 %v4600_v48 }
 0x6e5   :  { %v3475_v48 = vrot.slane %v7763_v33, %v6811_v26 }
 0x6ed   :  { %v6062_v38 = vpop.eup %6061 }
 0x6ee   :  { %v6064_v35 = vpop.eup %6063  ;;  %v3378_v25 = vmul.f32 %v6062_v38, %v6060_v29  ;;  %v3483_v38 = vcombine.high %v3475_v48, %v3475_v48 }
 0x6ef   :  { %v3369_v63 = vadd.f32 1.0, %v6064_v35  ;;  %v7764_v35 = vld [vmem:[#allocation16_spill] sm:$0xff] }
 0x6f0   :  { %v7365_v7 = vadd.f32 %v3378_v25, %v3377_v3  ;;  %v7758_v25 = vld [vmem:[#allocation20_spill] sm:$0xff] }
 0x6f1   :  { %6065 = vrcp.f32 %v3369_v63 }
 0x6f2   :  { %6067 = vtanh.f32 %v7365_v7 }
 0x6fb   :  { %v6066_v22 = vpop.eup %6065 }
 0x6fc   :  { %v6068_v9 = vpop.eup %6067 }
 0x6fd   :  { %v3381_v39 = vmul.f32 %v6068_v9, %v6066_v22 }
 0x6ff   :  { %3447 = vmatmul.mubr.f32.vlgmr.msra.gmra.mrb[28].mxu1 %v3381_v39  ;;  %3554 = vmatmul.mubr.f32.vlgmr.msra.gmra.mrb[30].mxu0 %v3381_v39 }
 0x700   :  { %5628 = vmatpush1.bf16.msra.mxu1 %v6842_v13  ;;  %3624 = vmatprep.mubr.f32.mxu1 %v7718_v15 }
 0x701   :  { %5630 = vmatprep.subr.bf16.mxu1 %v6848_v21  ;;  %5660 = vmatpush1.bf16.msra.mxu0 %v7097_v60 }
 0x702   :  { %5662 = vmatprep.subr.bf16.mxu0 %v7102_v45  ;;  %3719 = vmatprep.mubr.f32.mxu0 %v7718_v15 }
 0x704   :  { %5632 = vmatpush1.bf16.msra.mxu1 %v6854_v2 }
 0x705   :  { %5634 = vmatprep.subr.bf16.mxu1 %v6860_v5  ;;  %5664 = vmatpush1.bf16.msra.mxu0 %v7104_v53 }
 0x706   :  { %5666 = vmatprep.subr.bf16.mxu0 %v7108_v1 }
 0x708   :  { %5636 = vmatpush1.bf16.msra.mxu1 %v6868_v27 }
 0x709   :  { %5638 = vmatprep.subr.bf16.mxu1 %v6874_v34  ;;  %5668 = vmatpush1.bf16.msra.mxu0 %v7110_v16 }
 0x70a   :  { %5670 = vmatprep.subr.bf16.mxu0 %v7114_v18 }
 0x70c   :  { %5640 = vmatpush1.bf16.msra.mxu1 %v6880_v50 }
 0x70d   :  { %5642 = vmatprep.subr.bf16.mxu1 %v6886_v59  ;;  %5672 = vmatpush1.bf16.msra.mxu0 %v7116_v36 }
 0x70e   :  { %5674 = vmatprep.subr.bf16.mxu0 %v7120_v42 }
 0x710   :  { %5644 = vmatpush1.bf16.msra.mxu1 %v6892_v10 }
 0x711   :  { %5646 = vmatprep.subr.bf16.mxu1 %v6898_v23  ;;  %5676 = vmatpush1.bf16.msra.mxu0 %v7122_v41 }
 0x712   :  { %5678 = vmatprep.subr.bf16.mxu0 %v7126_v56 }
 0x714   :  { %5648 = vmatpush1.bf16.msra.mxu1 %v6904_v46 }
 0x715   :  { %5650 = vmatprep.subr.bf16.mxu1 %v6910_v32  ;;  %5680 = vmatpush1.bf16.msra.mxu0 %v7128_v6 }
 0x716   :  { %5682 = vmatprep.subr.bf16.mxu0 %v7132_v47 }
 0x718   :  { %5652 = vmatpush1.bf16.msra.mxu1 %v6920_v14 }
 0x719   :  { %5654 = vmatprep.subr.bf16.mxu1 %v6926_v51  ;;  %5684 = vmatpush1.bf16.msra.mxu0 %v7134_v4 }
 0x71a   :  { %5686 = vmatprep.subr.bf16.mxu0 %v7136_v43 }
 0x71c   :  { %5656 = vmatpush1.bf16.msra.mxu1 %v6938_v19 }
 0x71d   :  { %5690 = vmatprep.subr.bf16.mxu1 %v6830_v44  ;;  %5688 = vmatpush1.bf16.msra.mxu0 %v7140_v55 }
 0x71e   :  { %5722 = vmatprep.subr.bf16.mxu0 %v6832_v57 }
 0x71f   :  { %3625 = vmatmul.mubr.f32.vlgmr.msra.gmra.mrb[30].mxu1 %v3381_v39  ;;  %v7765_v39 = vld [vmem:[#allocation17_spill] sm:$0xff] }
 0x720   :  { %5692 = vmatpush1.bf16.msra.mxu1 %v6840_v12  ;;  %3826 = vmatprep.mubr.f32.mxu1 %v7718_v15 }
 0x721   :  { %5694 = vmatprep.subr.bf16.mxu1 %v6846_v20 }
 0x724   :  { %5696 = vmatpush1.bf16.msra.mxu1 %v6852_v0 }
 0x725   :  { %5698 = vmatprep.subr.bf16.mxu1 %v6858_v17 }
 0x728   :  { %5700 = vmatpush1.bf16.msra.mxu1 %v6866_v24 }
 0x729   :  { %5702 = vmatprep.subr.bf16.mxu1 %v6872_v30 }
 0x72c   :  { %5704 = vmatpush1.bf16.msra.mxu1 %v6878_v49 }
 0x72d   :  { %5706 = vmatprep.subr.bf16.mxu1 %v6884_v58 }
 0x730   :  { %5708 = vmatpush1.bf16.msra.mxu1 %v6890_v31 }
 0x731   :  { %5710 = vmatprep.subr.bf16.mxu1 %v7721_v37 }
 0x734   :  { %5712 = vmatpush1.bf16.msra.mxu1 %v7722_v28 }
 0x735   :  { %5714 = vmatprep.subr.bf16.mxu1 %v7756_v61 }
 0x738   :  { %5716 = vmatpush1.bf16.msra.mxu1 %v7757_v8 }
 0x739   :  { %5718 = vmatprep.subr.bf16.mxu1 %v7758_v25 }
 0x73c   :  { %5720 = vmatpush1.bf16.msra.mxu1 %v7759_v54 }
 0x73d   :  { %5754 = vmatprep.subr.bf16.mxu1 %v7760_v40 }
 0x7d2   :  { %v3448_v11 = vpop.f32.mrb[28].mxu1  ;;  %v3555_v29 = vpop.f32.mrb[30].mxu0 }
 0x7d3   :  { %v3449_v3 = vadd.f32 %v3448_v11, %v7764_v35  ;;  %v3556_v63 = vadd.f32 %v3555_v29, %v3475_v48  ;;  %v3450_v22 = vpop.f32.mrb[29].mxu1  ;;  %v3557_v9 = vpop.f32.mrb[31].mxu0  ;;  %v3482_v48 = vrot.slane %v4630_v62, %v6811_v26 }
 0x7d4   :  { %v3451_v8 = vadd.f32 %v3450_v22, %v7765_v39  ;;  %v3558_v25 = vadd.f32 %v3557_v9, %v3483_v38 }
 0x7d5   :  { %v4602_v54 = vmul.f32 -1.442695, %v3556_v63  ;;  %v3484_v38 = vcombine.high %v3482_v48, %v3482_v48 }
 0x7d6   :  { %v3455_v61 = vcombine.low %v3449_v3, %v3451_v8  ;;  %v4603_v40 = vmul.f32 -1.442695, %v3558_v25 }
 0x7d8   :  { %4620 = vst.sshfl [vmem:[%s7642_s9 + $0xc] sm:$0x33 pattern:$0x76325410] %v3455_v61  ;;  %6069 = vpow2.f32 %v4603_v40 }
 0x7d9   :  { %6071 = vpow2.f32 %v4602_v54 }
 0x7e2   :  { %v6070_v33 = vpop.eup %6069 }
 0x7e3   :  { %v6072_v11 = vpop.eup %6071  ;;  %v3641_v29 = vadd.f32 1.0, %v6070_v33 }
 0x7e4   :  { %v3640_v35 = vadd.f32 1.0, %v6072_v11 }
 0x7e5   :  { %6073 = vrcp.f32 %v3641_v29 }
 0x7e6   :  { %6075 = vrcp.f32 %v3640_v35  ;;  %v7767_v35 = vld [vmem:[#allocation19_spill] sm:$0xff] }
 0x7ef   :  { %v6074_v25 = vpop.eup %6073 }
 0x7f0   :  { %v6076_v54 = vpop.eup %6075  ;;  %v3650_v63 = vmul.f32 %v6074_v25, %v7365_v7  ;;  %v7766_v7 = vld [vmem:[#allocation18_spill] sm:$0xff] }
 0x7f2   :  { %v3626_v22 = vpop.f32.mrb[30].mxu1 }
 0x7f3   :  { %v3627_v8 = vadd.f32 %v3626_v22, %v3482_v48  ;;  %v3628_v3 = vpop.f32.mrb[31].mxu1  ;;  %v7769_v22 = vld [vmem:[#allocation21_spill] sm:$0xff] }
 0x7f4   :  { %v3629_v9 = vadd.f32 %v3628_v3, %v3484_v38  ;;  %v7770_v38 = vld [vmem:[#allocation34_spill] sm:$0xff]  ;;  %v7772_v3 = vld [vmem:[#allocation31_spill] sm:$0xff] }
 0x7f5   :  { %v4604_v61 = vmul.f32 -1.442695, %v3627_v8  ;;  %v7771_v8 = vld [vmem:[#allocation30_spill] sm:$0xff] }
 0x7f6   :  { %6077 = vtanh.f32 %v3629_v9  ;;  %v7773_v9 = vcombine.low %v7771_v8, %v7772_v3  ;;  %v4631_v8 = vcombine.low %v7772_v3, %v7772_v3 }
 0x7f7   :  { %6079 = vpow2.f32 %v4604_v61 }
 0x7f8   :  { %v3748_v61 = vrot.slane %v7773_v9, %v6811_v26 }
 0x800   :  { %v6078_v40 = vpop.eup %6077 }
 0x801   :  { %v6080_v52 = vpop.eup %6079  ;;  %v3651_v39 = vmul.f32 %v6078_v40, %v6076_v54  ;;  %v3756_v40 = vcombine.high %v3748_v61, %v3748_v61 }
 0x802   :  { %v3642_v62 = vadd.f32 1.0, %v6080_v52  ;;  %v7774_v52 = vld [vmem:[#allocation16_spill] sm:$0xff] }
 0x803   :  { %v7432_v33 = vadd.f32 %v3651_v39, %v3650_v63  ;;  %v7768_v39 = vld [vmem:[#allocation20_spill] sm:$0xff] }
 0x804   :  { %6081 = vrcp.f32 %v3642_v62 }
 0x805   :  { %6083 = vtanh.f32 %v7432_v33 }
 0x80e   :  { %v6082_v11 = vpop.eup %6081 }
 0x80f   :  { %v6084_v48 = vpop.eup %6083 }
 0x810   :  { %v3654_v29 = vmul.f32 %v6084_v48, %v6082_v11 }
 0x812   :  { %3720 = vmatmul.mubr.f32.vlgmr.msra.gmra.mrb[32].mxu0 %v3654_v29  ;;  %3827 = vmatmul.mubr.f32.vlgmr.msra.gmra.mrb[32].mxu1 %v3654_v29 }
 0x813   :  { %5724 = vmatpush1.bf16.msra.mxu0 %v6842_v13  ;;  %3897 = vmatprep.mubr.f32.mxu0 %v7718_v15 }
 0x814   :  { %5726 = vmatprep.subr.bf16.mxu0 %v6848_v21  ;;  %5756 = vmatpush1.bf16.msra.mxu1 %v7097_v60 }
 0x815   :  { %5758 = vmatprep.subr.bf16.mxu1 %v7102_v45  ;;  %3992 = vmatprep.mubr.f32.mxu1 %v7718_v15 }
 0x817   :  { %5728 = vmatpush1.bf16.msra.mxu0 %v6854_v2 }
 0x818   :  { %5730 = vmatprep.subr.bf16.mxu0 %v6860_v5  ;;  %5760 = vmatpush1.bf16.msra.mxu1 %v7104_v53 }
 0x819   :  { %5762 = vmatprep.subr.bf16.mxu1 %v7108_v1 }
 0x81b   :  { %5732 = vmatpush1.bf16.msra.mxu0 %v6868_v27 }
 0x81c   :  { %5734 = vmatprep.subr.bf16.mxu0 %v6874_v34  ;;  %5764 = vmatpush1.bf16.msra.mxu1 %v7110_v16 }
 0x81d   :  { %5766 = vmatprep.subr.bf16.mxu1 %v7114_v18 }
 0x81f   :  { %5736 = vmatpush1.bf16.msra.mxu0 %v6880_v50 }
 0x820   :  { %5738 = vmatprep.subr.bf16.mxu0 %v6886_v59  ;;  %5768 = vmatpush1.bf16.msra.mxu1 %v7116_v36 }
 0x821   :  { %5770 = vmatprep.subr.bf16.mxu1 %v7120_v42 }
 0x823   :  { %5740 = vmatpush1.bf16.msra.mxu0 %v6892_v10 }
 0x824   :  { %5742 = vmatprep.subr.bf16.mxu0 %v6898_v23  ;;  %5772 = vmatpush1.bf16.msra.mxu1 %v7122_v41 }
 0x825   :  { %5774 = vmatprep.subr.bf16.mxu1 %v7126_v56 }
 0x827   :  { %5744 = vmatpush1.bf16.msra.mxu0 %v6904_v46 }
 0x828   :  { %5746 = vmatprep.subr.bf16.mxu0 %v6910_v32  ;;  %5776 = vmatpush1.bf16.msra.mxu1 %v7128_v6 }
 0x829   :  { %5778 = vmatprep.subr.bf16.mxu1 %v7132_v47 }
 0x82b   :  { %5748 = vmatpush1.bf16.msra.mxu0 %v6920_v14 }
 0x82c   :  { %5750 = vmatprep.subr.bf16.mxu0 %v6926_v51  ;;  %5780 = vmatpush1.bf16.msra.mxu1 %v7134_v4 }
 0x82d   :  { %5782 = vmatprep.subr.bf16.mxu1 %v7136_v43 }
 0x82f   :  { %5752 = vmatpush1.bf16.msra.mxu0 %v6938_v19 }
 0x830   :  { %5786 = vmatprep.subr.bf16.mxu0 %v6830_v44  ;;  %5784 = vmatpush1.bf16.msra.mxu1 %v7140_v55 }
 0x831   :  { %5818 = vmatprep.subr.bf16.mxu1 %v6832_v57 }
 0x832   :  { %3898 = vmatmul.mubr.f32.vlgmr.msra.gmra.mrb[34].mxu0 %v3654_v29  ;;  %v7775_v29 = vld [vmem:[#allocation17_spill] sm:$0xff] }
 0x833   :  { %5788 = vmatpush1.bf16.msra.mxu0 %v6840_v12  ;;  %4099 = vmatprep.mubr.f32.mxu0 %v7718_v15 }
 0x834   :  { %5790 = vmatprep.subr.bf16.mxu0 %v6846_v20 }
 0x837   :  { %5792 = vmatpush1.bf16.msra.mxu0 %v6852_v0 }
 0x838   :  { %5794 = vmatprep.subr.bf16.mxu0 %v6858_v17 }
 0x83b   :  { %5796 = vmatpush1.bf16.msra.mxu0 %v6866_v24 }
 0x83c   :  { %5798 = vmatprep.subr.bf16.mxu0 %v6872_v30 }
 0x83f   :  { %5800 = vmatpush1.bf16.msra.mxu0 %v6878_v49 }
 0x840   :  { %5802 = vmatprep.subr.bf16.mxu0 %v6884_v58 }
 0x843   :  { %5804 = vmatpush1.bf16.msra.mxu0 %v6890_v31 }
 0x844   :  { %5806 = vmatprep.subr.bf16.mxu0 %v7721_v37 }
 0x847   :  { %5808 = vmatpush1.bf16.msra.mxu0 %v7722_v28 }
 0x848   :  { %5810 = vmatprep.subr.bf16.mxu0 %v7766_v7 }
 0x84b   :  { %5812 = vmatpush1.bf16.msra.mxu0 %v7767_v35 }
 0x84c   :  { %5814 = vmatprep.subr.bf16.mxu0 %v7768_v39 }
 0x84f   :  { %5816 = vmatpush1.bf16.msra.mxu0 %v7769_v22 }
 0x850   :  { %5850 = vmatprep.subr.bf16.mxu0 %v7770_v38 }
 0x8e5   :  { %v3721_v25 = vpop.f32.mrb[32].mxu0  ;;  %v3828_v54 = vpop.f32.mrb[32].mxu1 }
 0x8e6   :  { %v3722_v63 = vadd.f32 %v3721_v25, %v7774_v52  ;;  %v3829_v62 = vadd.f32 %v3828_v54, %v3748_v61  ;;  %v3723_v11 = vpop.f32.mrb[33].mxu0  ;;  %v3830_v48 = vpop.f32.mrb[33].mxu1  ;;  %v3755_v61 = vrot.slane %v4631_v8, %v6811_v26 }
 0x8e7   :  { %v3724_v35 = vadd.f32 %v3723_v11, %v7775_v29  ;;  %v3831_v39 = vadd.f32 %v3830_v48, %v3756_v40 }
 0x8e8   :  { %v4606_v22 = vmul.f32 -1.442695, %v3829_v62  ;;  %v3757_v40 = vcombine.high %v3755_v61, %v3755_v61 }
 0x8e9   :  { %v3728_v7 = vcombine.low %v3722_v63, %v3724_v35  ;;  %v4607_v38 = vmul.f32 -1.442695, %v3831_v39 }
 0x8eb   :  { %4621 = vst.sshfl [vmem:[%s7642_s9 + $0x10] sm:$0x33 pattern:$0x76325410] %v3728_v7  ;;  %6085 = vpow2.f32 %v4607_v38 }
 0x8ec   :  { %6087 = vpow2.f32 %v4606_v22 }
 0x8f5   :  { %v6086_v9 = vpop.eup %6085 }
 0x8f6   :  { %v6088_v25 = vpop.eup %6087  ;;  %v3914_v54 = vadd.f32 1.0, %v6086_v9 }
 0x8f7   :  { %v3913_v52 = vadd.f32 1.0, %v6088_v25 }
 0x8f8   :  { %6089 = vrcp.f32 %v3914_v54 }
 0x8f9   :  { %6091 = vrcp.f32 %v3913_v52 }
 0x902   :  { %v6090_v39 = vpop.eup %6089 }
 0x903   :  { %v6092_v22 = vpop.eup %6091  ;;  %v3923_v62 = vmul.f32 %v6090_v39, %v7432_v33  ;;  %v7784_v33 = vld [vmem:[#allocation16_spill] sm:$0xff] }
 0x905   :  { %v3899_v11 = vpop.f32.mrb[34].mxu0 }
 0x906   :  { %v3900_v35 = vadd.f32 %v3899_v11, %v3755_v61  ;;  %v3901_v63 = vpop.f32.mrb[35].mxu0 }
 0x907   :  { %v3902_v48 = vadd.f32 %v3901_v63, %v3757_v40  ;;  %v7785_v40 = vld [vmem:[#allocation17_spill] sm:$0xff] }
 0x908   :  { %v4608_v7 = vmul.f32 -1.442695, %v3900_v35 }
 0x909   :  { %6093 = vtanh.f32 %v3902_v48 }
 0x90a   :  { %6095 = vpow2.f32 %v4608_v7 }
 0x913   :  { %v6094_v38 = vpop.eup %6093 }
 0x914   :  { %v6096_v3 = vpop.eup %6095  ;;  %v3924_v29 = vmul.f32 %v6094_v38, %v6092_v22 }
 0x915   :  { %v3915_v8 = vadd.f32 1.0, %v6096_v3 }
 0x916   :  { %v7499_v9 = vadd.f32 %v3924_v29, %v3923_v62 }
 0x917   :  { %6097 = vrcp.f32 %v3915_v8 }
 0x918   :  { %6099 = vtanh.f32 %v7499_v9 }
 0x921   :  { %v6098_v25 = vpop.eup %6097 }
 0x922   :  { %v6100_v61 = vpop.eup %6099 }
 0x923   :  { %v3927_v54 = vmul.f32 %v6100_v61, %v6098_v25 }
 0x925   :  { %3993 = vmatmul.mubr.f32.vlgmr.msra.gmra.mrb[34].mxu1 %v3927_v54  ;;  %4100 = vmatmul.mubr.f32.vlgmr.msra.gmra.mrb[36].mxu0 %v3927_v54 }
 0x926   :  { %5820 = vmatpush1.bf16.msra.mxu1 %v6842_v13  ;;  %4170 = vmatprep.mubr.f32.mxu1 %v7718_v15 }
 0x927   :  { %5822 = vmatprep.subr.bf16.mxu1 %v6848_v21  ;;  %5852 = vmatpush1.bf16.msra.mxu0 %v7097_v60 }
 0x928   :  { %5854 = vmatprep.subr.bf16.mxu0 %v7102_v45  ;;  %4265 = vmatprep.mubr.f32.mxu0 %v7718_v15 }
 0x92a   :  { %5824 = vmatpush1.bf16.msra.mxu1 %v6854_v2 }
 0x92b   :  { %5826 = vmatprep.subr.bf16.mxu1 %v6860_v5  ;;  %5856 = vmatpush1.bf16.msra.mxu0 %v7104_v53 }
 0x92c   :  { %5858 = vmatprep.subr.bf16.mxu0 %v7108_v1 }
 0x92e   :  { %5828 = vmatpush1.bf16.msra.mxu1 %v6868_v27 }
 0x92f   :  { %5830 = vmatprep.subr.bf16.mxu1 %v6874_v34  ;;  %5860 = vmatpush1.bf16.msra.mxu0 %v7110_v16 }
 0x930   :  { %5862 = vmatprep.subr.bf16.mxu0 %v7114_v18 }
 0x932   :  { %5832 = vmatpush1.bf16.msra.mxu1 %v6880_v50 }
 0x933   :  { %5834 = vmatprep.subr.bf16.mxu1 %v6886_v59  ;;  %5864 = vmatpush1.bf16.msra.mxu0 %v7116_v36 }
 0x934   :  { %5866 = vmatprep.subr.bf16.mxu0 %v7120_v42 }
 0x936   :  { %5836 = vmatpush1.bf16.msra.mxu1 %v6892_v10 }
 0x937   :  { %5838 = vmatprep.subr.bf16.mxu1 %v6898_v23  ;;  %5868 = vmatpush1.bf16.msra.mxu0 %v7122_v41 }
 0x938   :  { %5870 = vmatprep.subr.bf16.mxu0 %v7126_v56 }
 0x93a   :  { %5840 = vmatpush1.bf16.msra.mxu1 %v6904_v46 }
 0x93b   :  { %5842 = vmatprep.subr.bf16.mxu1 %v6910_v32  ;;  %5872 = vmatpush1.bf16.msra.mxu0 %v7128_v6 }
 0x93c   :  { %5874 = vmatprep.subr.bf16.mxu0 %v7132_v47 }
 0x93e   :  { %5844 = vmatpush1.bf16.msra.mxu1 %v6920_v14 }
 0x93f   :  { %5846 = vmatprep.subr.bf16.mxu1 %v6926_v51  ;;  %5876 = vmatpush1.bf16.msra.mxu0 %v7134_v4 }
 0x940   :  { %5878 = vmatprep.subr.bf16.mxu0 %v7136_v43 }
 0x942   :  { %5848 = vmatpush1.bf16.msra.mxu1 %v6938_v19 }
 0x943   :  { %5882 = vmatprep.subr.bf16.mxu1 %v6830_v44  ;;  %5880 = vmatpush1.bf16.msra.mxu0 %v7140_v55  ;;  %v7776_v44 = vld [vmem:[#allocation18_spill] sm:$0xff] }
 0x944   :  { %5914 = vmatprep.subr.bf16.mxu0 %v6832_v57  ;;  %v7777_v57 = vld [vmem:[#allocation19_spill] sm:$0xff] }
 0x945   :  { %4171 = vmatmul.mubr.f32.vlgmr.msra.gmra.mrb[36].mxu1 %v3927_v54 }
 0x946   :  { %5884 = vmatpush1.bf16.msra.mxu1 %v6840_v12  ;;  %4349 = vmatprep.mubr.f32.mxu1 %v7718_v15  ;;  %v7778_v12 = vld [vmem:[#allocation20_spill] sm:$0xff] }
 0x947   :  { %5886 = vmatprep.subr.bf16.mxu1 %v6846_v20  ;;  %v7779_v20 = vld [vmem:[#allocation21_spill] sm:$0xff] }
 0x94a   :  { %5888 = vmatpush1.bf16.msra.mxu1 %v6852_v0  ;;  %v7780_v0 = vld [vmem:[#allocation34_spill] sm:$0xff] }
 0x94b   :  { %5890 = vmatprep.subr.bf16.mxu1 %v6858_v17  ;;  %v7781_v17 = vld [vmem:[#allocation32_spill] sm:$0xff] }
 0x94e   :  { %5892 = vmatpush1.bf16.msra.mxu1 %v6866_v24  ;;  %v7782_v24 = vld [vmem:[#allocation33_spill] sm:$0xff] }
 0x94f   :  { %5894 = vmatprep.subr.bf16.mxu1 %v6872_v30  ;;  %v7783_v30 = vcombine.low %v7781_v17, %v7782_v24  ;;  %v4632_v22 = vcombine.low %v7782_v24, %v7782_v24 }
 0x951   :  { %v4028_v62 = vrot.slane %v4632_v22, %v6811_v26 }
 0x952   :  { %5896 = vmatpush1.bf16.msra.mxu1 %v6878_v49  ;;  %v4021_v49 = vrot.slane %v7783_v30, %v6811_v26 }
 0x953   :  { %5898 = vmatprep.subr.bf16.mxu1 %v6884_v58  ;;  %v4030_v54 = vcombine.high %v4028_v62, %v4028_v62 }
 0x956   :  { %5900 = vmatpush1.bf16.msra.mxu1 %v6890_v31 }
 0x957   :  { %5902 = vmatprep.subr.bf16.mxu1 %v7721_v37  ;;  %v4029_v37 = vcombine.high %v4021_v49, %v4021_v49 }
 0x95a   :  { %5904 = vmatpush1.bf16.msra.mxu1 %v7722_v28 }
 0x95b   :  { %5906 = vmatprep.subr.bf16.mxu1 %v7776_v44 }
 0x95e   :  { %5908 = vmatpush1.bf16.msra.mxu1 %v7777_v57 }
 0x95f   :  { %5910 = vmatprep.subr.bf16.mxu1 %v7778_v12 }
 0x962   :  { %5912 = vmatpush1.bf16.msra.mxu1 %v7779_v20 }
 0x963   :  { %5946 = vmatprep.subr.bf16.mxu1 %v7780_v0 }
 0x9f8   :  { %v3994_v58 = vpop.f32.mrb[34].mxu1  ;;  %v4101_v31 = vpop.f32.mrb[36].mxu0 }
 0x9f9   :  { %v3995_v28 = vadd.f32 %v3994_v58, %v7784_v33  ;;  %v4102_v52 = vadd.f32 %v4101_v31, %v4021_v49  ;;  %v3996_v29 = vpop.f32.mrb[35].mxu1  ;;  %v4103_v11 = vpop.f32.mrb[37].mxu0 }
 0x9fa   :  { %v3997_v35 = vadd.f32 %v3996_v29, %v7785_v40  ;;  %v4104_v63 = vadd.f32 %v4103_v11, %v4029_v37 }
 0x9fb   :  { %v4610_v39 = vmul.f32 -1.442695, %v4102_v52 }
 0x9fc   :  { %v4001_v48 = vcombine.low %v3995_v28, %v3997_v35  ;;  %v4611_v7 = vmul.f32 -1.442695, %v4104_v63 }
 0x9fe   :  { %4622 = vst.sshfl [vmem:[%s7642_s9 + $0x14] sm:$0x33 pattern:$0x76325410] %v4001_v48  ;;  %6101 = vpow2.f32 %v4611_v7 }
 0x9ff   :  { %6103 = vpow2.f32 %v4610_v39 }
 0xa08   :  { %v6102_v38 = vpop.eup %6101 }
 0xa09   :  { %v6104_v3 = vpop.eup %6103  ;;  %v4187_v8 = vadd.f32 1.0, %v6102_v38 }
 0xa0a   :  { %v4186_v25 = vadd.f32 1.0, %v6104_v3 }
 0xa0b   :  { %6105 = vrcp.f32 %v4187_v8 }
 0xa0c   :  { %6107 = vrcp.f32 %v4186_v25 }
 0xa15   :  { %v6106_v0 = vpop.eup %6105 }
 0xa16   :  { %v6108_v17 = vpop.eup %6107  ;;  %v4196_v49 = vmul.f32 %v6106_v0, %v7499_v9 }
 0xa18   :  { %v4172_v61 = vpop.f32.mrb[36].mxu1 }
 0xa19   :  { %v4173_v44 = vadd.f32 %v4172_v61, %v4028_v62  ;;  %v4174_v57 = vpop.f32.mrb[37].mxu1 }
 0xa1a   :  { %v4175_v12 = vadd.f32 %v4174_v57, %v4030_v54 }
 0xa1b   :  { %v4612_v20 = vmul.f32 -1.442695, %v4173_v44 }
 0xa1c   :  { %6109 = vtanh.f32 %v4175_v12 }
 0xa1d   :  { %6111 = vpow2.f32 %v4612_v20 }
 0xa26   :  { %v6110_v30 = vpop.eup %6109 }
 0xa27   :  { %v6112_v24 = vpop.eup %6111  ;;  %v4197_v58 = vmul.f32 %v6110_v30, %v6108_v17 }
 0xa28   :  { %v4188_v26 = vadd.f32 1.0, %v6112_v24 }
 0xa29   :  { %v7566_v31 = vadd.f32 %v4197_v58, %v4196_v49 }
 0xa2a   :  { %6113 = vrcp.f32 %v4188_v26 }
 0xa2b   :  { %6115 = vtanh.f32 %v7566_v31 }
 0xa34   :  { %v6114_v37 = vpop.eup %6113 }
 0xa35   :  { %v6116_v28 = vpop.eup %6115 }
 0xa36   :  { %v7569_v52 = vmul.f32 %v6116_v28, %v6114_v37 }
 0xa38   :  { %4266 = vmatmul.mubr.f32.vlgmr.msra.gmra.mrb[38].mxu0 %v7569_v52  ;;  %4350 = vmatmul.mubr.f32.vlgmr.msra.gmra.mrb[38].mxu1 %v7569_v52 }
 0xa39   :  { %5916 = vmatpush1.bf16.msra.mxu0 %v6842_v13  ;;  %4420 = vmatprep.mubr.f32.mxu0 %v7718_v15 }
 0xa3a   :  { %5918 = vmatprep.subr.bf16.mxu0 %v6848_v21  ;;  %5948 = vmatpush1.bf16.msra.mxu1 %v7097_v60  ;;  %v7788_v60 = vld [vmem:[#allocation13_spill] sm:$0xff] }
 0xa3b   :  { %5950 = vmatprep.subr.bf16.mxu1 %v7102_v45  ;;  %4517 = vmatprep.mubr.f32.mxu1 %v7718_v15 }
 0xa3d   :  { %5920 = vmatpush1.bf16.msra.mxu0 %v6854_v2 }
 0xa3e   :  { %5922 = vmatprep.subr.bf16.mxu0 %v6860_v5  ;;  %5952 = vmatpush1.bf16.msra.mxu1 %v7104_v53 }
 0xa3f   :  { %5954 = vmatprep.subr.bf16.mxu1 %v7108_v1  ;;  %v7789_v1 = vld [vmem:[#allocation15_spill] sm:$0xff] }
 0xa41   :  { %5924 = vmatpush1.bf16.msra.mxu0 %v6868_v27 }
 0xa42   :  { %5926 = vmatprep.subr.bf16.mxu0 %v6874_v34  ;;  %5956 = vmatpush1.bf16.msra.mxu1 %v7110_v16 }
 0xa43   :  { %5958 = vmatprep.subr.bf16.mxu1 %v7114_v18 }
 0xa45   :  { %5928 = vmatpush1.bf16.msra.mxu0 %v6880_v50  ;;  %v7786_v50 = vld [vmem:[#allocation14_spill] sm:$0xff] }
 0xa46   :  { %5930 = vmatprep.subr.bf16.mxu0 %v6886_v59  ;;  %5960 = vmatpush1.bf16.msra.mxu1 %v7116_v36 }
 0xa47   :  { %5962 = vmatprep.subr.bf16.mxu1 %v7120_v42 }
 0xa49   :  { %5932 = vmatpush1.bf16.msra.mxu0 %v6892_v10  ;;  %v7787_v10 = vld [vmem:[#allocation12_spill] sm:$0xff] }
 0xa4a   :  { %5934 = vmatprep.subr.bf16.mxu0 %v6898_v23  ;;  %5964 = vmatpush1.bf16.msra.mxu1 %v7122_v41 }
 0xa4b   :  { %5966 = vmatprep.subr.bf16.mxu1 %v7126_v56 }
 0xa4d   :  { %5936 = vmatpush1.bf16.msra.mxu0 %v6904_v46 }
 0xa4e   :  { %5938 = vmatprep.subr.bf16.mxu0 %v6910_v32  ;;  %5968 = vmatpush1.bf16.msra.mxu1 %v7128_v6 }
 0xa4f   :  { %5970 = vmatprep.subr.bf16.mxu1 %v7132_v47 }
 0xa51   :  { %5940 = vmatpush1.bf16.msra.mxu0 %v6920_v14 }
 0xa52   :  { %5942 = vmatprep.subr.bf16.mxu0 %v6926_v51  ;;  %5972 = vmatpush1.bf16.msra.mxu1 %v7134_v4 }
 0xa53   :  { %5974 = vmatprep.subr.bf16.mxu1 %v7136_v43 }
 0xa55   :  { %5944 = vmatpush1.bf16.msra.mxu0 %v6938_v19 }
 0xa56   :  { %5976 = vmatpush1.bf16.msra.mxu1 %v7140_v55 }
 0xa58   :  { %4421 = vmatmul.mubr.f32.vlgmr.msra.gmra.mrb[40].mxu0 %v7569_v52 }
 0xb0b   :  { %v4267_v13 = vpop.f32.mrb[38].mxu0  ;;  %v4351_v21 = vpop.f32.mrb[38].mxu1 }
 0xb0c   :  { %v4268_v6 = vadd.f32 %v4267_v13, %v7784_v33  ;;  %v4269_v2 = vpop.f32.mrb[39].mxu0  ;;  %v4353_v5 = vpop.f32.mrb[39].mxu1  ;;  %v4352_v23 = vadd.f32 %v4351_v21, %v7787_v10 }
 0xb0d   :  { %v4270_v27 = vadd.f32 %v4269_v2, %v7785_v40  ;;  %v4354_v59 = vadd.f32 %v4353_v5, %v7786_v50 }
 0xb0e   :  { %v4614_v32 = vmul.f32 -1.442695, %v4352_v23 }
 0xb0f   :  { %v4274_v34 = vcombine.low %v4268_v6, %v4270_v27  ;;  %v4615_v46 = vmul.f32 -1.442695, %v4354_v59 }
 0xb11   :  { %4623 = vst.sshfl [vmem:[%s7642_s9 + $0x18] sm:$0x33 pattern:$0x76325410] %v4274_v34  ;;  %6117 = vpow2.f32 %v4615_v46 }
 0xb12   :  { %6119 = vpow2.f32 %v4614_v32 }
 0xb1b   :  { %v6118_v14 = vpop.eup %6117 }
 0xb1c   :  { %v6120_v51 = vpop.eup %6119  ;;  %v4437_v19 = vadd.f32 1.0, %v6118_v14 }
 0xb1d   :  { %v4436_v4 = vadd.f32 1.0, %v6120_v51 }
 0xb1e   :  { %6121 = vrcp.f32 %v4437_v19 }
 0xb1f   :  { %6123 = vrcp.f32 %v4436_v4 }
 0xb28   :  { %v6122_v36 = vpop.eup %6121 }
 0xb29   :  { %v6124_v42 = vpop.eup %6123  ;;  %v4446_v47 = vmul.f32 %v6122_v36, %v7566_v31 }
 0xb2b   :  { %v4422_v15 = vpop.f32.mrb[40].mxu0 }
 0xb2c   :  { %v4423_v45 = vadd.f32 %v4422_v15, %v7788_v60  ;;  %v4424_v53 = vpop.f32.mrb[41].mxu0 }
 0xb2d   :  { %v4425_v16 = vadd.f32 %v4424_v53, %v7789_v1 }
 0xb2e   :  { %v4616_v18 = vmul.f32 -1.442695, %v4423_v45 }
 0xb2f   :  { %6125 = vtanh.f32 %v4425_v16 }
 0xb30   :  { %6127 = vpow2.f32 %v4616_v18 }
 0xb39   :  { %v6126_v41 = vpop.eup %6125 }
 0xb3a   :  { %v6128_v56 = vpop.eup %6127  ;;  %v4447_v43 = vmul.f32 %v6126_v41, %v6124_v42 }
 0xb3b   :  { %v4438_v55 = vadd.f32 1.0, %v6128_v56 }
 0xb3c   :  { %v4448_v9 = vadd.f32 %v4447_v43, %v4446_v47 }
 0xb3d   :  { %6129 = vrcp.f32 %v4438_v55 }
 0xb3e   :  { %6131 = vtanh.f32 %v4448_v9  ;;  %v4451_v11 = vsel %vm2172_vm0, %v7566_v31, %v4448_v9 }
 0xb3f   :  { %4538 = vst [vmem:[%s7644_s11] sm:$0x3] %v4451_v11 }
 0xb47   :  { %v6130_v35 = vpop.eup %6129 }
 0xb48   :  { %v6132_v63 = vpop.eup %6131 }
 0xb49   :  { %v4450_v48 = vmul.f32 %v6132_v63, %v6130_v35 }
 0xb4b   :  { %v4452_v7 = vsel %vm2172_vm0, %v7569_v52, %v4450_v48 }
 0xb4c   :  { %4518 = vmatmul.mubr.f32.vlgmr.msra.gmra.mrb[40].mxu1 %v4452_v7  ;;  %4537 = vst [vmem:[%s7643_s10] sm:$0x3] %v4452_v7 }
 0xc1f   :  { %v4519_v39 = vpop.f32.mrb[40].mxu1 }
 0xc20   :  { %v4520_v22 = vadd.f32 %v4519_v39, %v7784_v33  ;;  %v4521_v38 = vpop.f32.mrb[41].mxu1 }
 0xc21   :  { %v4522_v3 = vadd.f32 %v4521_v38, %v7785_v40 }
 0xc23   :  { %v4526_v62 = vcombine.low %v4520_v22, %v4522_v3 }
 0xc25   :  { %4624 = vst.sshfl [vmem:[%s7642_s9 + $0x1c] sm:$0x33 pattern:$0x76325410] %v4526_v62 }
 0xc26   :  { %4551 = vsyncpa [#allocation4], 1 }
 0xc27   :  { %4552 = vsyncpa [#allocation6], 1 }

</bundles_post_ra>
